<compile_context>
chip_gen: v5e
topology: v5e:2x2
jax: 0.10.0
libtpu: 0.0.40
codegen_flags: <defaults>
</compile_context>

<pallas_src>
import jax
import jax.numpy as jnp
from jax.experimental import pallas as pl
from jax.experimental.pallas import tpu as pltpu

HIDDEN = 1024                      # fixed by nn.Linear(feat_dim, 1024)
_LANE = 128
_SUBLANE = 8
_TB = 128                          # batch (M) tile
_TS_MAX = 512                      # max sequence chunk per step
_NEG_FILL = float(jnp.finfo(jnp.float32).min)  # padding value that never wins the max


def _round_up(x, m):
    return ((x + m - 1) // m) * m


def _mlp_char_kernel(x_ref, w1_ref, b1_ref, w2_ref, b2_ref, out_ref, max_sc):
    # x_ref:  (TB, TS, F) f32        w1_ref: (F, 1024) compute dtype
    # b1_ref: (1, 1024)   f32        w2_ref: (1024, Lp) compute dtype
    # b2_ref: (1, Lp)     f32        out_ref: (TB, Lp) f32
    # max_sc: (TB, F)     f32 running max over the sequence axis
    s = pl.program_id(1)

    # Max-pool this sequence chunk (VPU / f32), fold into the running max.
    chunk_max = jnp.max(x_ref[...], axis=1)                      # (TB, F)

    @pl.when(s == 0)
    def _():
        max_sc[...] = chunk_max

    @pl.when(s != 0)
    def _():
        max_sc[...] = jnp.maximum(max_sc[...], chunk_max)

    # Finalize: run the two Linear layers once, on the last sequence step only.
    @pl.when(s == pl.num_programs(1) - 1)
    def _():
        pooled = max_sc[...].astype(w1_ref.dtype)                # bf16 MXU operands
        h = jnp.dot(pooled, w1_ref[...],
                    preferred_element_type=jnp.float32) + b1_ref[...]     # (TB, 1024) f32
        o = jnp.dot(h.astype(w2_ref.dtype), w2_ref[...],
                    preferred_element_type=jnp.float32) + b2_ref[...]     # (TB, Lp)  f32
        out_ref[...] = o.astype(out_ref.dtype)


def mlp_char_forward(feats, masks, params, *, compute_dtype=jnp.bfloat16):
    """Mirrors mlp_char.forward.

    Args:
      feats: list; feats[0] has shape (B, 1, S, F) float32.
      masks: list; masks[0] has shape (B, 1, S). Unused (as in the reference).
      params: dict with w1 (F, 1024), b1 (1, 1024), w2 (1024, L), b2 (1, L), all f32.
      compute_dtype: dtype for MXU operands (accumulation is always f32).

    Returns:
      [char_out (B, L) float32, blank_scene_out (0, L) float32]
    """
    del masks  # intentionally unused, matching the PyTorch forward
    x = feats[0][:, 0, :, :].astype(jnp.float32)                 # (B, S, F)
    B, S, F = x.shape
    L = params["w2"].shape[1]

    # ---- Tile sizes / padded extents -------------------------------------
    TB = _TB
    TS = min(_TS_MAX, _round_up(max(S, 1), _SUBLANE))
    n_b = pl.cdiv(B, TB)
    n_s = pl.cdiv(S, TS)
    B_pad = n_b * TB
    S_pad = n_s * TS
    L_pad = _round_up(max(L, 1), _LANE)

    # Pad S with a huge negative so padded rows never win the max; pad B with zeros
    # (padded batch rows are sliced off at the end).
    if S_pad != S:
        x = jnp.pad(x, ((0, 0), (0, S_pad - S), (0, 0)),
                    mode="constant", constant_values=_NEG_FILL)
    if B_pad != B:
        x = jnp.pad(x, ((0, B_pad - B), (0, 0), (0, 0)))

    # Weights: cast once to the MXU compute dtype; zero-pad the label (lane) dim.
    w1 = params["w1"].astype(compute_dtype)                      # (F, 1024)
    b1 = params["b1"].astype(jnp.float32)                        # (1, 1024)
    w2 = params["w2"].astype(compute_dtype)                      # (1024, L)
    b2 = params["b2"].astype(jnp.float32)                        # (1, L)
    if L_pad != L:
        w2 = jnp.pad(w2, ((0, 0), (0, L_pad - L)))
        b2 = jnp.pad(b2, ((0, 0), (0, L_pad - L)))

    # ---- VMEM budget / cost hint -----------------------------------------
    c_sz = jnp.dtype(compute_dtype).itemsize
    vmem_est = (
        2 * TB * TS * F * 4                                   # x tiles (double-buffered)
        + 2 * TB * L_pad * 4                                  # out tiles
        + 2 * (F * HIDDEN + HIDDEN * L_pad) * c_sz            # resident weights (x2 margin)
        + 2 * (HIDDEN + L_pad) * 4                            # biases
        + TB * F * 4                                          # running-max scratch
        + TB * HIDDEN * 4                                     # h intermediate
    )
    vmem_limit = int(min(max(2 * vmem_est, 32 * 1024 * 1024), 96 * 1024 * 1024))

    cost = pl.CostEstimate(
        flops=2 * B_pad * HIDDEN * (F + L_pad),
        transcendentals=0,
        bytes_accessed=(B_pad * S_pad * F * 4
                        + (F * HIDDEN + HIDDEN * L_pad) * c_sz
                        + (HIDDEN + L_pad) * 4
                        + B_pad * L_pad * 4),
    )

    out_padded = pl.pallas_call(
        _mlp_char_kernel,
        out_shape=jax.ShapeDtypeStruct((B_pad, L_pad), jnp.float32),
        grid_spec=pltpu.PrefetchScalarGridSpec(
            num_scalar_prefetch=0,
            grid=(n_b, n_s),                                  # batch (parallel), seq (reduction, last)
            in_specs=[
                pl.BlockSpec((TB, TS, F), lambda i, s: (i, s, 0)),      # x: streamed
                pl.BlockSpec((F, HIDDEN), lambda i, s: (0, 0)),         # w1: resident
                pl.BlockSpec((1, HIDDEN), lambda i, s: (0, 0)),         # b1: resident
                pl.BlockSpec((HIDDEN, L_pad), lambda i, s: (0, 0)),     # w2: resident
                pl.BlockSpec((1, L_pad), lambda i, s: (0, 0)),          # b2: resident
            ],
            out_specs=pl.BlockSpec((TB, L_pad), lambda i, s: (i, 0)),   # same block across s
            scratch_shapes=[pltpu.VMEM((TB, F), jnp.float32)],          # running max
        ),
        compiler_params=pltpu.CompilerParams(
            dimension_semantics=("parallel", "arbitrary"),
            vmem_limit_bytes=vmem_limit,
        ),
        cost_estimate=cost,
    )(x, w1, b1, w2, b2)

    out = out_padded[:B, :L]
    blank_scene_out = jnp.zeros((0, L), dtype=jnp.float32)
    return [out, blank_scene_out]


def init_params(key, feat_dim, num_labels):
    """Deterministic synthetic init (shapes match nn.Linear(feat_dim,1024) + nn.Linear(1024,num_labels)).

    Weights are stored pre-transposed ((in, out)); biases as (1, out) 2-D tiles.
    """
    k1, k2, k3, k4 = jax.random.split(key, 4)
    w1 = jax.random.normal(k1, (feat_dim, HIDDEN), jnp.float32) * 0.02
    b1 = jax.random.normal(k2, (1, HIDDEN), jnp.float32) * 0.02
    w2 = jax.random.normal(k3, (HIDDEN, num_labels), jnp.float32) * 0.02
    b2 = jax.random.normal(k4, (1, num_labels), jnp.float32) * 0.02
    return {"w1": w1, "b1": b1, "w2": w2, "b2": b2}


if __name__ == "__main__":
    key = jax.random.PRNGKey(0)
    kx, km, kp = jax.random.split(key, 3)

    B, S, F, L = 2, 8, 32, 4
    char_feats = jax.random.normal(kx, (B, 1, S, F), jnp.float32)
    char_masks = (jax.random.uniform(km, (B, 1, S)) > 0.2).astype(jnp.float32)

    params = init_params(kp, feat_dim=F, num_labels=L)

    outs = mlp_char_forward([char_feats], [char_masks], params)
    char_out, scene_out = outs
    jax.block_until_ready(char_out)

    # Reference in plain JAX with the same bf16-operand / f32-accumulate matmul path.
    x = char_feats[:, 0, :, :]
    pooled = jnp.max(x, axis=1)
    h_ref = jnp.dot(pooled.astype(jnp.bfloat16), params["w1"].astype(jnp.bfloat16),
                    preferred_element_type=jnp.float32) + params["b1"]
    ref = jnp.dot(h_ref.astype(jnp.bfloat16), params["w2"].astype(jnp.bfloat16),
                  preferred_element_type=jnp.float32) + params["b2"]

    assert char_out.shape == (B, L)
    assert scene_out.shape == (0, L)
    assert jnp.allclose(char_out, ref, atol=1e-3, rtol=1e-3)

    print("KERNEL_OK")
</pallas_src>

<mosaic_0001>
module attributes {stable_mosaic.version = 11 : i64} {
  func.func @_mlp_char_kernel(%arg0: i32, %arg1: i32, %arg2: memref<128x8x32xf32, #tpu.memory_space<vmem>>, %arg3: memref<32x1024xbf16, #tpu.memory_space<vmem>>, %arg4: memref<1x1024xf32, #tpu.memory_space<vmem>>, %arg5: memref<1024x128xbf16, #tpu.memory_space<vmem>>, %arg6: memref<1x128xf32, #tpu.memory_space<vmem>>, %arg7: memref<128x128xf32, #tpu.memory_space<vmem>>, %arg8: memref<128x32xf32, #tpu.memory_space<vmem>>) attributes {dimension_semantics = [#tpu.dimension_semantics<parallel>, #tpu.dimension_semantics<arbitrary>], iteration_bounds = array<i64: 1, 1>, scalar_prefetch = 0 : i64, scratch_operands = 1 : i64, tpu.core_type = #tpu.core_type<tc>, window_params = [{transform_indices = @transform_0, window_bounds = array<i64: 128, 8, 32>}, {pipeline_mode = #tpu.pipeline_mode<synchronous>, transform_indices = @transform_1, window_bounds = array<i64: 32, 1024>}, {pipeline_mode = #tpu.pipeline_mode<synchronous>, transform_indices = @transform_2, window_bounds = array<i64: 1, 1024>}, {pipeline_mode = #tpu.pipeline_mode<synchronous>, transform_indices = @transform_3, window_bounds = array<i64: 1024, 128>}, {pipeline_mode = #tpu.pipeline_mode<synchronous>, transform_indices = @transform_4, window_bounds = array<i64: 1, 128>}, {transform_indices = @transform_5, window_bounds = array<i64: 128, 128>}]} {
    %c0 = arith.constant 0 : index
    %c0_0 = arith.constant 0 : index
    %c0_1 = arith.constant 0 : index
    %0 = vector.load %arg2[%c0, %c0_0, %c0_1] : memref<128x8x32xf32, #tpu.memory_space<vmem>>, vector<128x8x32xf32>
    %cst = arith.constant dense<0xFF800000> : vector<128x32xf32>
    %1 = vector.multi_reduction <maximumf>, %0, %cst [1] : vector<128x8x32xf32> to vector<128x32xf32>
    %c0_i32 = arith.constant 0 : i32
    %2 = arith.cmpi eq, %arg1, %c0_i32 : i32
    %3 = arith.extui %2 : i1 to i32
    %c0_i32_2 = arith.constant 0 : i32
    %4 = arith.cmpi ne, %3, %c0_i32_2 : i32
    scf.if %4 {
      %c0_7 = arith.constant 0 : index
      %c0_8 = arith.constant 0 : index
      %11 = vector.load %arg8[%c0_7, %c0_8] : memref<128x32xf32, #tpu.memory_space<vmem>>, vector<128x32xf32>
      tpu.vector_store %arg8[%c0_7, %c0_8], %1 {strides = array<i32>} : memref<128x32xf32, #tpu.memory_space<vmem>>, vector<128x32xf32>,
    } else {
    }
    %c0_i32_3 = arith.constant 0 : i32
    %5 = arith.cmpi ne, %arg1, %c0_i32_3 : i32
    %6 = arith.extui %5 : i1 to i32
    %c0_i32_4 = arith.constant 0 : i32
    %7 = arith.cmpi ne, %6, %c0_i32_4 : i32
    scf.if %7 {
      %c0_7 = arith.constant 0 : index
      %c0_8 = arith.constant 0 : index
      %11 = vector.load %arg8[%c0_7, %c0_8] : memref<128x32xf32, #tpu.memory_space<vmem>>, vector<128x32xf32>
      %12 = arith.maximumf %11, %1 : vector<128x32xf32>
      %c0_9 = arith.constant 0 : index
      %c0_10 = arith.constant 0 : index
      %13 = vector.load %arg8[%c0_9, %c0_10] : memref<128x32xf32, #tpu.memory_space<vmem>>, vector<128x32xf32>
      tpu.vector_store %arg8[%c0_9, %c0_10], %12 {strides = array<i32>} : memref<128x32xf32, #tpu.memory_space<vmem>>, vector<128x32xf32>,
    } else {
    }
    %c0_i32_5 = arith.constant 0 : i32
    %8 = arith.cmpi eq, %arg1, %c0_i32_5 : i32
    %9 = arith.extui %8 : i1 to i32
    %c0_i32_6 = arith.constant 0 : i32
    %10 = arith.cmpi ne, %9, %c0_i32_6 : i32
    scf.if %10 {
      %c0_7 = arith.constant 0 : index
      %c0_8 = arith.constant 0 : index
      %11 = vector.load %arg8[%c0_7, %c0_8] : memref<128x32xf32, #tpu.memory_space<vmem>>, vector<128x32xf32>
      %12 = arith.truncf %11 : vector<128x32xf32> to vector<128x32xbf16>
      %c0_9 = arith.constant 0 : index
      %c0_10 = arith.constant 0 : index
      %13 = vector.load %arg3[%c0_9, %c0_10] : memref<32x1024xbf16, #tpu.memory_space<vmem>>, vector<32x1024xbf16>
      %cst_11 = arith.constant dense<0.000000e+00> : vector<128x1024xf32>
      %14 = tpu.matmul %12, %13, %cst_11 {dimension_numbers = #tpu.dot_dimension_numbers<[1], [0], [0], [1], [0, 0, 1, 1], [], []>} : vector<128x32xbf16>, vector<32x1024xbf16>, vector<128x1024xf32> -> vector<128x1024xf32>
      %c0_12 = arith.constant 0 : index
      %c0_13 = arith.constant 0 : index
      %15 = vector.load %arg4[%c0_12, %c0_13] : memref<1x1024xf32, #tpu.memory_space<vmem>>, vector<1x1024xf32>
      %16 = vector.broadcast %15 : vector<1x1024xf32> to vector<128x1024xf32>
      %17 = arith.addf %14, %16 : vector<128x1024xf32>
      %18 = arith.truncf %17 : vector<128x1024xf32> to vector<128x1024xbf16>
      %c0_14 = arith.constant 0 : index
      %c0_15 = arith.constant 0 : index
      %19 = vector.load %arg5[%c0_14, %c0_15] : memref<1024x128xbf16, #tpu.memory_space<vmem>>, vector<1024x128xbf16>
      %cst_16 = arith.constant dense<0.000000e+00> : vector<128x128xf32>
      %20 = tpu.matmul %18, %19, %cst_16 {dimension_numbers = #tpu.dot_dimension_numbers<[1], [0], [0], [1], [0, 0, 1, 1], [], []>} : vector<128x1024xbf16>, vector<1024x128xbf16>, vector<128x128xf32> -> vector<128x128xf32>
      %c0_17 = arith.constant 0 : index
      %c0_18 = arith.constant 0 : index
      %21 = vector.load %arg6[%c0_17, %c0_18] : memref<1x128xf32, #tpu.memory_space<vmem>>, vector<1x128xf32>
      %22 = vector.broadcast %21 : vector<1x128xf32> to vector<128x128xf32>
      %23 = arith.addf %20, %22 : vector<128x128xf32>
      %c0_19 = arith.constant 0 : index
      %c0_20 = arith.constant 0 : index
      %24 = vector.load %arg7[%c0_19, %c0_20] : memref<128x128xf32, #tpu.memory_space<vmem>>, vector<128x128xf32>
      tpu.vector_store %arg7[%c0_19, %c0_20], %23 {strides = array<i32>} : memref<128x128xf32, #tpu.memory_space<vmem>>, vector<128x128xf32>,
    } else {
    }
    return
  }
  func.func @transform_0(%arg0: i32, %arg1: i32) -> (i32, i32, i32) {
    %c0_i32 = arith.constant 0 : i32
    %c0_i32_0 = arith.constant 0 : i32
    return %arg0, %arg1, %c0_i32 : i32, i32, i32
  }
  func.func @transform_1(%arg0: i32, %arg1: i32) -> (i32, i32) {
    %c0_i32 = arith.constant 0 : i32
    %c0_i32_0 = arith.constant 0 : i32
    %c0_i32_1 = arith.constant 0 : i32
    return %c0_i32, %c0_i32_0 : i32, i32
  }
  func.func @transform_2(%arg0: i32, %arg1: i32) -> (i32, i32) {
    %c0_i32 = arith.constant 0 : i32
    %c0_i32_0 = arith.constant 0 : i32
    %c0_i32_1 = arith.constant 0 : i32
    return %c0_i32, %c0_i32_0 : i32, i32
  }
  func.func @transform_3(%arg0: i32, %arg1: i32) -> (i32, i32) {
    %c0_i32 = arith.constant 0 : i32
    %c0_i32_0 = arith.constant 0 : i32
    %c0_i32_1 = arith.constant 0 : i32
    return %c0_i32, %c0_i32_0 : i32, i32
  }
  func.func @transform_4(%arg0: i32, %arg1: i32) -> (i32, i32) {
    %c0_i32 = arith.constant 0 : i32
    %c0_i32_0 = arith.constant 0 : i32
    %c0_i32_1 = arith.constant 0 : i32
    return %c0_i32, %c0_i32_0 : i32, i32
  }
  func.func @transform_5(%arg0: i32, %arg1: i32) -> (i32, i32) {
    %c0_i32 = arith.constant 0 : i32
    %c0_i32_0 = arith.constant 0 : i32
    return %arg0, %c0_i32 : i32, i32
  }
}

</mosaic_0001>

<bundles_post_ra>
// kernel: tpu_custom_call.1
= control target key start
LH: loop header
LB: loop body
LE: loop exit
PB: predicated region body
PF: predicated region fallthrough
CT: control target
= control target key end

     0   :  { %vm150_vm0 = vcmask 261120   ;;  %s5702_s0 = inlined_call_operand.vmem [shape: f32[128,8,32], index: 0, kind: input, shape index: {}]   ;;  %s5703_s1 = inlined_call_operand.vmem [shape: bf16[32,1024], index: 1, kind: input, shape index: {}]   ;;  %s5704_s2 = inlined_call_operand.vmem [shape: f32[1,1024], index: 2, kind: input, shape index: {}]   ;;  %s5705_s3 = inlined_call_operand.vmem [shape: bf16[1024,128], index: 3, kind: input, shape index: {}]   ;;  %s5706_s4 = inlined_call_operand.vmem [shape: f32[1,128], index: 4, kind: input, shape index: {}]   ;;  %s5707_s5 = inlined_call_operand.hbm [shape: f32[128,128], index: 5, kind: output, shape index: {}]  }
   0x1   :  { %v3242_v0 = vld [vmem:[%s5703_s1 + $0x40] sm:$0xf]  ;;  %v3600_v2 = vld [vmem:[%s5703_s1 + $0x44] sm:$0xf]  ;;  %v3250_v5 = vld [vmem:[%s5703_s1 + $0x48] sm:$0xf] }
   0x2   :  { %v3604_v1 = vld [vmem:[%s5703_s1 + $0x5c] sm:$0xf0]  ;;  %v3244_v4 = vld [vmem:[%s5703_s1 + $0x60] sm:$0xf0]  ;;  %v3605_v6 = vld [vmem:[%s5703_s1 + $0x64] sm:$0xf0] }
   0x3   :  { %v3243_v3 = vor.u32 %v3604_v1, %v3242_v0  ;;  %v3247_v7 = vor.u32 %v3600_v2, %v3244_v4  ;;  %v3251_v8 = vor.u32 %v3605_v6, %v3250_v5  ;;  %v3601_v9 = vld [vmem:[%s5703_s1 + $0x4c] sm:$0xf]  ;;  %v3210_v11 = vld [vmem:[%s5703_s1] sm:$0xf]  ;;  %v3592_v14 = vld [vmem:[%s5703_s1 + $0x4] sm:$0xf] }
   0x4   :  { %v3252_v10 = vld [vmem:[%s5703_s1 + $0x68] sm:$0xf0]  ;;  %v3596_v13 = vld [vmem:[%s5703_s1 + $0x1c] sm:$0xf0]  ;;  %v3212_v15 = vld [vmem:[%s5703_s1 + $0x20] sm:$0xf0] }
   0x5   :  { %1816 = vmatpush.bf16.msra.mxu0 %v3243_v3  ;;  %v3255_v12 = vor.u32 %v3601_v9, %v3252_v10  ;;  %1865 = vmatpush.bf16.msra.mxu1 %v3247_v7  ;;  %v3211_v16 = vor.u32 %v3596_v13, %v3210_v11  ;;  %v3215_v17 = vor.u32 %v3592_v14, %v3212_v15  ;;  %v3218_v18 = vld [vmem:[%s5703_s1 + $0x8] sm:$0xf]  ;;  %v3593_v20 = vld [vmem:[%s5703_s1 + $0xc] sm:$0xf]  ;;  %v22_v23 = vld [vmem:[%s5702_s0] sm:$0xff] }
   0x6   :  { %1914 = vmatpush.bf16.msra.mxu2 %v3251_v8  ;;  %v3597_v19 = vld [vmem:[%s5703_s1 + $0x24] sm:$0xf0]  ;;  %v3220_v22 = vld [vmem:[%s5703_s1 + $0x28] sm:$0xf0]  ;;  %v24_v26 = vld [vmem:[%s5702_s0 + $0x10] sm:$0xff]  ;;  %v151_v29 = vsel %vm150_vm0, %v22_v23, -inf }
   0x7   :  { %1963 = vmatpush.bf16.msra.mxu3 %v3255_v12  ;;  %v3219_v21 = vor.u32 %v3597_v19, %v3218_v18  ;;  %v23_v24 = vld [vmem:[%s5702_s0 + $0x8] sm:$0xff]  ;;  %v3223_v25 = vor.u32 %v3593_v20, %v3220_v22  ;;  %v25_v27 = vld [vmem:[%s5702_s0 + $0x18] sm:$0xff]  ;;  %v26_v28 = vld [vmem:[%s5702_s0 + $0x20] sm:$0xff]  ;;  %v152_v34 = vrot.slane %v151_v29, 4  ;;  %v165_v36 = vsel %vm150_vm0, %v24_v26, -inf }
   0x8   :  { %v158_v30 = vsel %vm150_vm0, %v23_v24, -inf  ;;  %v27_v31 = vld [vmem:[%s5702_s0 + $0x28] sm:$0xff]  ;;  %v28_v32 = vld [vmem:[%s5702_s0 + $0x30] sm:$0xff]  ;;  %v29_v33 = vld [vmem:[%s5702_s0 + $0x38] sm:$0xff]  ;;  %v166_v37 = vrot.slane %v165_v36, 4  ;;  %v172_v38 = vsel %vm150_vm0, %v25_v27, -inf }
   0x9   :  { %1817 = vmatpush.bf16.msra.mxu0 %v3211_v16  ;;  %v159_v35 = vrot.slane %v158_v30, 4  ;;  %1866 = vmatpush.bf16.msra.mxu1 %v3215_v17  ;;  %v179_v39 = vsel %vm150_vm0, %v26_v28, -inf  ;;  %v153_v40 = vmax.f32 %v151_v29, %v152_v34  ;;  %v173_v42 = vrot.slane %v172_v38, 4  ;;  %v30_v4 = vld [vmem:[%s5702_s0 + $0x40] sm:$0xff]  ;;  %v31_v5 = vld [vmem:[%s5702_s0 + $0x48] sm:$0xff] }
   0xa   :  { %1915 = vmatpush.bf16.msra.mxu2 %v3219_v21  ;;  %v180_v43 = vrot.slane %v179_v39, 4  ;;  %v167_v44 = vmax.f32 %v165_v36, %v166_v37  ;;  %v186_v45 = vsel %vm150_vm0, %v27_v31, -inf  ;;  %v193_v46 = vsel %vm150_vm0, %v28_v32, -inf }
   0xb   :  { %1964 = vmatpush.bf16.msra.mxu3 %v3223_v25  ;;  %v160_v41 = vmax.f32 %v158_v30, %v159_v35  ;;  %v200_v47 = vsel %vm150_vm0, %v29_v33, -inf  ;;  %v154_v48 = vrot.slane %v153_v40, 2  ;;  %v174_v50 = vmax.f32 %v172_v38, %v173_v42 }
   0xc   :  { %v181_v51 = vmax.f32 %v179_v39, %v180_v43  ;;  %v168_v52 = vrot.slane %v167_v44, 2  ;;  %v187_v53 = vrot.slane %v186_v45, 4  ;;  %v194_v54 = vrot.slane %v193_v46, 4 }
   0xd   :  { %v161_v49 = vrot.slane %v160_v41, 2  ;;  %v201_v55 = vrot.slane %v200_v47, 4  ;;  %v155_v56 = vmax.f32 %v153_v40, %v154_v48  ;;  %v175_v58 = vrot.slane %v174_v50, 2 }
   0xe   :  { %v182_v59 = vrot.slane %v181_v51, 2  ;;  %v169_v60 = vmax.f32 %v167_v44, %v168_v52  ;;  %v188_v61 = vmax.f32 %v186_v45, %v187_v53  ;;  %v195_v62 = vmax.f32 %v193_v46, %v194_v54 }
   0xf   :  { %v162_v57 = vmax.f32 %v160_v41, %v161_v49  ;;  %v202_v63 = vmax.f32 %v200_v47, %v201_v55  ;;  %v156_v0 = vrot.slane %v155_v56, 1  ;;  %v176_v2 = vmax.f32 %v174_v50, %v175_v58 }
  0x10   :  { %v183_v3 = vmax.f32 %v181_v51, %v182_v59  ;;  %v170_v6 = vrot.slane %v169_v60, 1  ;;  %v189_v7 = vrot.slane %v188_v61, 2  ;;  %v196_v8 = vrot.slane %v195_v62, 2 }
  0x11   :  { %v163_v1 = vrot.slane %v162_v57, 1  ;;  %v203_v9 = vrot.slane %v202_v63, 2  ;;  %v3821_v10 = vmax.f32 %v155_v56, %v156_v0  ;;  %v177_v12 = vrot.slane %v176_v2, 1 }
  0x12   :  { %v184_v13 = vrot.slane %v183_v3, 1 }
  0x13   :  { %v3823_v11 = vmax.f32 %v162_v57, %v163_v1 }
  0x14   :  { %10 = vsyncpa [#allocation4], 0  ;;  %v32_v14 = vld [vmem:[%s5702_s0 + $0x50] sm:$0xff]  ;;  %v33_v15 = vld [vmem:[%s5702_s0 + $0x58] sm:$0xff]  ;;  %v3834_v17 = vmax.f32 %v169_v60, %v170_v6  ;;  %v190_v18 = vmax.f32 %v188_v61, %v189_v7  ;;  %v197_v19 = vmax.f32 %v195_v62, %v196_v8  ;;  %v204_v20 = vmax.f32 %v202_v63, %v203_v9  ;;  %s3703_s6 = smov 128   ;;  %s3704_s7 = smov 8  }
  0x15   :  { %v34_v16 = vld [vmem:[%s5702_s0 + $0x60] sm:$0xff]  ;;  %v3836_v21 = vmax.f32 %v176_v2, %v177_v12  ;;  %v3838_v22 = vmax.f32 %v183_v3, %v184_v13  ;;  %v207_v23 = vsel %vm150_vm0, %v30_v4, -inf  ;;  %v214_v24 = vsel %vm150_vm0, %v31_v5, -inf  ;;  %v35_v25 = vld [vmem:[%s5702_s0 + $0x68] sm:$0xff]  ;;  %v36_v30 = vld [vmem:[%s5702_s0 + $0x70] sm:$0xff] }
  0x16   :  { %v191_v26 = vrot.slane %v190_v18, 1  ;;  %v198_v27 = vrot.slane %v197_v19, 1  ;;  %v205_v28 = vrot.slane %v204_v20, 1  ;;  %v208_v29 = vrot.slane %v207_v23, 4  ;;  %v37_v31 = vld [vmem:[%s5702_s0 + $0x78] sm:$0xff] }
  0x17   :  { %v215_v32 = vrot.slane %v214_v24, 4  ;;  %v221_v33 = vsel %vm150_vm0, %v32_v14, -inf  ;;  %v228_v34 = vsel %vm150_vm0, %v33_v15, -inf  ;;  %v235_v35 = vsel %vm150_vm0, %v34_v16, -inf }
  0x18   :  { %vm1179_vm1 = vcmask 1041409   ;;  %v3854_v36 = vmax.f32 %v190_v18, %v191_v26  ;;  %v3856_v37 = vmax.f32 %v197_v19, %v198_v27  ;;  %v3858_v38 = vmax.f32 %v204_v20, %v205_v28  ;;  %v3266_v19 = vld [vmem:[%s5703_s1 + $0x58] sm:$0xf]  ;;  %v3258_v27 = vld [vmem:[%s5703_s1 + $0x50] sm:$0xf] }
  0x19   :  { %v209_v39 = vmax.f32 %v207_v23, %v208_v29  ;;  %vm1181_vm2 = vcmask 1042434   ;;  %v216_v40 = vmax.f32 %v214_v24, %v215_v32  ;;  %v222_v41 = vrot.slane %v221_v33, 4  ;;  %v3607_v26 = vld [vmem:[%s5703_s1 + $0x74] sm:$0xf0] }
  0x1a   :  { %v229_v42 = vrot.slane %v228_v34, 4  ;;  %v236_v43 = vrot.slane %v235_v35, 4  ;;  %v242_v45 = vsel %vm150_vm0, %v35_v25, -inf  ;;  %v249_v46 = vsel %vm150_vm0, %v36_v30, -inf }
  0x1b   :  { %v210_v44 = vrot.slane %v209_v39, 2  ;;  %v256_v47 = vsel %vm150_vm0, %v37_v31, -inf  ;;  %v217_v48 = vrot.slane %v216_v40, 2  ;;  %v223_v49 = vmax.f32 %v221_v33, %v222_v41  ;;  %v3268_v31 = vld [vmem:[%s5703_s1 + $0x78] sm:$0xf0] }
  0x1c   :  { %v230_v50 = vmax.f32 %v228_v34, %v229_v42  ;;  %v237_v51 = vmax.f32 %v235_v35, %v236_v43  ;;  %v243_v53 = vrot.slane %v242_v45, 4  ;;  %v250_v54 = vrot.slane %v249_v46, 4 }
  0x1d   :  { %v211_v52 = vmax.f32 %v209_v39, %v210_v44  ;;  %v257_v55 = vrot.slane %v256_v47, 4  ;;  %v218_v56 = vmax.f32 %v216_v40, %v217_v48  ;;  %v224_v57 = vrot.slane %v223_v49, 2  ;;  %v3602_v39 = vld [vmem:[%s5703_s1 + $0x54] sm:$0xf]  ;;  %v38_v40 = vld [vmem:[%s5702_s0 + $0x80] sm:$0xff] }
  0x1e   :  { %v231_v58 = vrot.slane %v230_v50, 2  ;;  %v238_v59 = vrot.slane %v237_v51, 2  ;;  %v244_v61 = vmax.f32 %v242_v45, %v243_v53  ;;  %v251_v62 = vmax.f32 %v249_v46, %v250_v54  ;;  %v40_v44 = vld [vmem:[%s5702_s0 + $0x90] sm:$0xff] }
  0x1f   :  { %v212_v60 = vrot.slane %v211_v52, 1  ;;  %v258_v63 = vmax.f32 %v256_v47, %v257_v55  ;;  %v219_v0 = vrot.slane %v218_v56, 1  ;;  %v225_v1 = vmax.f32 %v223_v49, %v224_v57  ;;  %v43_v57 = vld [vmem:[%s5702_s0 + $0xa8] sm:$0xff] }
  0x20   :  { %v232_v2 = vmax.f32 %v230_v50, %v231_v58  ;;  %v239_v3 = vmax.f32 %v237_v51, %v238_v59  ;;  %v245_v5 = vrot.slane %v244_v61, 2  ;;  %v252_v6 = vrot.slane %v251_v62, 2  ;;  %v44_v58 = vld [vmem:[%s5702_s0 + $0xb0] sm:$0xff] }
  0x21   :  { %v213_v4 = vmax.f32 %v211_v52, %v212_v60  ;;  %v259_v7 = vrot.slane %v258_v63, 2  ;;  %v220_v8 = vmax.f32 %v218_v56, %v219_v0  ;;  %v226_v9 = vrot.slane %v225_v1, 1  ;;  %v42_v52 = vld [vmem:[%s5702_s0 + $0xa0] sm:$0xff] }
  0x22   :  { %v233_v12 = vrot.slane %v232_v2, 1  ;;  %v240_v13 = vrot.slane %v239_v3, 1  ;;  %v246_v14 = vmax.f32 %v244_v61, %v245_v5  ;;  %v253_v15 = vmax.f32 %v251_v62, %v252_v6 }
  0x23   :  { %v260_v16 = vmax.f32 %v258_v63, %v259_v7  ;;  %v1180_v18 = vsel %vm1179_vm1, %v3823_v11, %v3821_v10  ;;  %v227_v20 = vmax.f32 %v225_v1, %v226_v9  ;;  %v3606_v10 = vld [vmem:[%s5703_s1 + $0x6c] sm:$0xf0]  ;;  %vm1183_vm3 = vcmask 1043459  }
  0x24   :  { %v234_v23 = vmax.f32 %v232_v2, %v233_v12  ;;  %v241_v24 = vmax.f32 %v239_v3, %v240_v13  ;;  %v1182_v25 = vsel %vm1181_vm2, %v3834_v17, %v1180_v18  ;;  %v247_v11 = vrot.slane %v246_v14, 1  ;;  %v3603_v17 = vld [vmem:[%s5703_s1 + $0x5c] sm:$0xf] }
  0x25   :  { %v254_v28 = vrot.slane %v253_v15, 1  ;;  %v261_v29 = vrot.slane %v260_v16, 1  ;;  %v1184_v30 = vsel %vm1183_vm3, %v3836_v21, %v1182_v25  ;;  %vm1185_vm4 = vcmask 1044484   ;;  %v3260_v21 = vld [vmem:[%s5703_s1 + $0x70] sm:$0xf0]  ;;  %v45_v3 = vld [vmem:[%s5702_s0 + $0xb8] sm:$0xff] }
  0x26   :  { %vm1187_vm5 = vcmask 1045509   ;;  %vm1189_vm6 = vcmask 1046534   ;;  %v248_v32 = vmax.f32 %v246_v14, %v247_v11  ;;  %v1186_v35 = vsel %vm1185_vm4, %v3838_v22, %v1184_v30  ;;  %v39_v22 = vld [vmem:[%s5702_s0 + $0x88] sm:$0xff] }
  0x27   :  { %v255_v33 = vmax.f32 %v253_v15, %v254_v28  ;;  %v262_v34 = vmax.f32 %v260_v16, %v261_v29  ;;  %v1188_v41 = vsel %vm1187_vm5, %v3854_v36, %v1186_v35  ;;  %vm1191_vm7 = vcmask 1047559   ;;  %v41_v36 = vld [vmem:[%s5702_s0 + $0x98] sm:$0xff]  ;;  %v47_v35 = vld [vmem:[%s5702_s0 + $0xc8] sm:$0xff] }
  0x28   :  { %v1193_v42 = vsel %vm1179_vm1, %v220_v8, %v213_v4  ;;  %v3267_v43 = vor.u32 %v3607_v26, %v3266_v19  ;;  %v1190_v45 = vsel %vm1189_vm6, %v3856_v37, %v1188_v41  ;;  %v3259_v47 = vor.u32 %v3606_v10, %v3258_v27 }
  0x29   :  { %v1194_v46 = vsel %vm1181_vm2, %v227_v20, %v1193_v42  ;;  %v3271_v48 = vor.u32 %v3603_v17, %v3268_v31  ;;  %v1192_v49 = vsel %vm1191_vm7, %v3858_v38, %v1190_v45  ;;  %v3263_v51 = vor.u32 %v3602_v39, %v3260_v21 }
  0x2a   :  { %v1195_v50 = vsel %vm1183_vm3, %v234_v23, %v1194_v46  ;;  %2110 = vmatpush.bf16.msrb.mxu2 %v3267_v43  ;;  %v263_v37 = vsel %vm150_vm0, %v38_v40, -inf  ;;  %1314 = vst.msk [vmem:[#allocation2] sm:$0xff] %vm150_vm0, %v1192_v49  ;;  %2012 = vmatpush.bf16.msrb.mxu0 %v3259_v47  ;;  %v270_v55 = vsel %vm150_vm0, %v39_v22, -inf  ;;  %v277_v38 = vsel %vm150_vm0, %v40_v44, -inf  ;;  %v48_v47 = vld [vmem:[%s5702_s0 + $0xd0] sm:$0xff] }
  0x2b   :  { %v1196_v53 = vsel %vm1185_vm4, %v241_v24, %v1195_v50  ;;  %2159 = vmatpush.bf16.msrb.mxu3 %v3271_v48  ;;  %v264_v54 = vrot.slane %v263_v37, 4  ;;  %2061 = vmatpush.bf16.msrb.mxu1 %v3263_v51  ;;  %v271_v59 = vrot.slane %v270_v55, 4  ;;  %v278_v60 = vrot.slane %v277_v38, 4  ;;  %v49_v48 = vld [vmem:[%s5702_s0 + $0xd8] sm:$0xff] }
  0x2c   :  { %v1197_v56 = vsel %vm1187_vm5, %v248_v32, %v1196_v53  ;;  %v284_v61 = vsel %vm150_vm0, %v41_v36, -inf  ;;  %v291_v1 = vsel %vm150_vm0, %v42_v52, -inf  ;;  %v298_v9 = vsel %vm150_vm0, %v43_v57, -inf  ;;  %v50_v36 = vld [vmem:[%s5702_s0 + $0xe0] sm:$0xff] }
  0x2d   :  { %v1198_v62 = vsel %vm1189_vm6, %v255_v33, %v1197_v56  ;;  %v265_v63 = vmax.f32 %v263_v37, %v264_v54  ;;  %v285_v0 = vrot.slane %v284_v61, 4  ;;  %v272_v4 = vmax.f32 %v270_v55, %v271_v59  ;;  %v51_v55 = vld [vmem:[%s5702_s0 + $0xe8] sm:$0xff] }
  0x2e   :  { %v1199_v2 = vsel %vm1191_vm7, %v262_v34, %v1198_v62  ;;  %v279_v5 = vmax.f32 %v277_v38, %v278_v60  ;;  %v292_v6 = vrot.slane %v291_v1, 4  ;;  %v305_v12 = vsel %vm150_vm0, %v44_v58, -inf  ;;  %v46_v34 = vld [vmem:[%s5702_s0 + $0xc0] sm:$0xff] }
  0x2f   :  { %1315 = vst.msk [vmem:[#allocation2 + $0x8] sm:$0xff] %vm150_vm0, %v1199_v2  ;;  %v266_v7 = vrot.slane %v265_v63, 2  ;;  %v286_v8 = vmax.f32 %v284_v61, %v285_v0  ;;  %v273_v13 = vrot.slane %v272_v4, 2  ;;  %v299_v16 = vrot.slane %v298_v9, 4 }
  0x30   :  { %v280_v14 = vrot.slane %v279_v5, 2  ;;  %v293_v15 = vmax.f32 %v291_v1, %v292_v6  ;;  %v306_v20 = vrot.slane %v305_v12, 4  ;;  %v312_v23 = vsel %vm150_vm0, %v45_v3, -inf }
  0x31   :  { %v267_v18 = vmax.f32 %v265_v63, %v266_v7  ;;  %v287_v19 = vrot.slane %v286_v8, 2  ;;  %v274_v24 = vmax.f32 %v272_v4, %v273_v13  ;;  %v300_v27 = vmax.f32 %v298_v9, %v299_v16  ;;  %v1648_v17 = vld [vmem:[#allocation2] sm:$0xff]  ;;  %v52_v63 = vld [vmem:[%s5702_s0 + $0xf0] sm:$0xff] }
  0x32   :  { %v281_v25 = vmax.f32 %v279_v5, %v280_v14  ;;  %v294_v26 = vrot.slane %v293_v15, 2  ;;  %v307_v28 = vmax.f32 %v305_v12, %v306_v20  ;;  %v313_v29 = vrot.slane %v312_v23, 4 }
  0x33   :  { %v268_v10 = vrot.slane %v267_v18, 1  ;;  %v288_v11 = vmax.f32 %v286_v8, %v287_v19  ;;  %v275_v30 = vrot.slane %v274_v24, 1  ;;  %v301_v33 = vrot.slane %v300_v27, 2  ;;  %v53_v8 = vld [vmem:[%s5702_s0 + $0xf8] sm:$0xff] }
  0x34   :  { %v282_v31 = vrot.slane %v281_v25, 1  ;;  %v295_v32 = vmax.f32 %v293_v15, %v294_v26  ;;  %v308_v40 = vrot.slane %v307_v28, 2  ;;  %v314_v41 = vmax.f32 %v312_v23, %v313_v29 }
  0x35   :  { %v3949_v39 = vmax.f32 %v267_v18, %v268_v10  ;;  %v289_v21 = vrot.slane %v288_v11, 1  ;;  %v3951_v43 = vmax.f32 %v274_v24, %v275_v30  ;;  %v302_v45 = vmax.f32 %v300_v27, %v301_v33 }
  0x36   :  { %v1649_v42 = vld [vmem:[#allocation2 + $0x8] sm:$0xff]  ;;  %v3953_v22 = vmax.f32 %v281_v25, %v282_v31  ;;  %v296_v44 = vrot.slane %v295_v32, 1  ;;  %v309_v50 = vmax.f32 %v307_v28, %v308_v40  ;;  %v315_v51 = vrot.slane %v314_v41, 2 }
  0x37   :  { %v3955_v46 = vpack.c.bf16 %v1649_v42, %v1648_v17  ;;  %v3966_v49 = vmax.f32 %v288_v11, %v289_v21  ;;  %v303_v37 = vrot.slane %v302_v45, 1  ;;  %v319_v53 = vsel %vm150_vm0, %v46_v34, -inf }
  0x38   :  { %v3968_v52 = vmax.f32 %v295_v32, %v296_v44  ;;  %v326_v54 = vsel %vm150_vm0, %v47_v35, -inf  ;;  %v310_v38 = vrot.slane %v309_v50, 1  ;;  %v316_v56 = vmax.f32 %v314_v41, %v315_v51 }
  0x39   :  { %3272 = vmatmul.msk.bf16.vlgmr.msra.gmra.mxu0 %vm150_vm0, %v3955_v46  ;;  %3280 = vmatmul.msk.bf16.vlgmr.msra.gmra.mxu1 %vm150_vm0, %v3955_v46  ;;  %v320_v57 = vrot.slane %v319_v53, 4  ;;  %v327_v58 = vrot.slane %v326_v54, 4  ;;  %v3983_v59 = vmax.f32 %v302_v45, %v303_v37  ;;  %v333_v60 = vsel %vm150_vm0, %v48_v47, -inf }
  0x3a   :  { %3288 = vmatmul.msk.bf16.vlgmr.msra.gmra.mxu2 %vm150_vm0, %v3955_v46  ;;  %3296 = vmatmul.msk.bf16.vlgmr.msra.gmra.mxu3 %vm150_vm0, %v3955_v46  ;;  %v340_v61 = vsel %vm150_vm0, %v49_v48, -inf  ;;  %v347_v62 = vsel %vm150_vm0, %v50_v36, -inf  ;;  %v3991_v0 = vmax.f32 %v309_v50, %v310_v38  ;;  %v317_v1 = vrot.slane %v316_v56, 1  ;;  %v54_v48 = vld [vmem:[%s5702_s0 + $0x100] sm:$0xff] }
  0x3b   :  { %v321_v2 = vmax.f32 %v319_v53, %v320_v57  ;;  %v328_v3 = vmax.f32 %v326_v54, %v327_v58  ;;  %v334_v4 = vrot.slane %v333_v60, 4  ;;  %v341_v5 = vrot.slane %v340_v61, 4 }
  0x3c   :  { %v348_v6 = vrot.slane %v347_v62, 4  ;;  %v354_v7 = vsel %vm150_vm0, %v51_v55, -inf  ;;  %v3997_v9 = vmax.f32 %v316_v56, %v317_v1  ;;  %v361_v19 = vsel %vm150_vm0, %v52_v63, -inf  ;;  %v55_v56 = vld [vmem:[%s5702_s0 + $0x108] sm:$0xff]  ;;  %v56_v63 = vld [vmem:[%s5702_s0 + $0x110] sm:$0xff] }
  0x3d   :  { %v322_v12 = vrot.slane %v321_v2, 2  ;;  %v329_v13 = vrot.slane %v328_v3, 2  ;;  %v355_v14 = vrot.slane %v354_v7, 4  ;;  %v335_v15 = vmax.f32 %v333_v60, %v334_v4 }
  0x3e   :  { %v342_v16 = vmax.f32 %v340_v61, %v341_v5  ;;  %v349_v18 = vmax.f32 %v347_v62, %v348_v6  ;;  %v362_v25 = vrot.slane %v361_v19, 4  ;;  %v368_v11 = vsel %vm150_vm0, %v53_v8, -inf  ;;  %v58_v8 = vld [vmem:[%s5702_s0 + $0x120] sm:$0xff] }
  0x3f   :  { %v323_v20 = vmax.f32 %v321_v2, %v322_v12  ;;  %v330_v23 = vmax.f32 %v328_v3, %v329_v13  ;;  %v356_v24 = vmax.f32 %v354_v7, %v355_v14  ;;  %v336_v26 = vrot.slane %v335_v15, 2  ;;  %v57_v7 = vld [vmem:[%s5702_s0 + $0x118] sm:$0xff] }
  0x40   :  { %v343_v27 = vrot.slane %v342_v16, 2  ;;  %v350_v10 = vrot.slane %v349_v18, 2  ;;  %v363_v30 = vmax.f32 %v361_v19, %v362_v25  ;;  %v369_v34 = vrot.slane %v368_v11, 4  ;;  %v59_v19 = vld [vmem:[%s5702_s0 + $0x128] sm:$0xff] }
  0x41   :  { %v324_v28 = vrot.slane %v323_v20, 1  ;;  %v331_v29 = vrot.slane %v330_v23, 1  ;;  %v357_v17 = vrot.slane %v356_v24, 2  ;;  %v337_v31 = vmax.f32 %v335_v15, %v336_v26 }
  0x42   :  { %v344_v32 = vmax.f32 %v342_v16, %v343_v27  ;;  %v351_v33 = vmax.f32 %v349_v18, %v350_v10  ;;  %v364_v41 = vrot.slane %v363_v30, 2  ;;  %v370_v47 = vmax.f32 %v368_v11, %v369_v34  ;;  %v61_v27 = vld [vmem:[%s5702_s0 + $0x138] sm:$0xff] }
  0x43   :  { %v325_v35 = vmax.f32 %v323_v20, %v324_v28  ;;  %v332_v21 = vmax.f32 %v330_v23, %v331_v29  ;;  %v358_v40 = vmax.f32 %v356_v24, %v357_v17  ;;  %v338_v42 = vrot.slane %v337_v31, 1  ;;  %v60_v20 = vld [vmem:[%s5702_s0 + $0x130] sm:$0xff] }
  0x44   :  { %v345_v44 = vrot.slane %v344_v32, 1  ;;  %v352_v45 = vrot.slane %v351_v33, 1  ;;  %v365_v50 = vmax.f32 %v363_v30, %v364_v41  ;;  %v1200_v51 = vsel %vm1179_vm1, %v3951_v43, %v3949_v39 }
  0x45   :  { %v359_v36 = vrot.slane %v358_v40, 1  ;;  %v1207_v37 = vsel %vm1179_vm1, %v332_v21, %v325_v35  ;;  %v339_v53 = vmax.f32 %v337_v31, %v338_v42  ;;  %v371_v38 = vrot.slane %v370_v47, 2  ;;  %v62_v21 = vld [vmem:[%s5702_s0 + $0x140] sm:$0xff] }
  0x46   :  { %v346_v54 = vmax.f32 %v344_v32, %v345_v44  ;;  %v353_v55 = vmax.f32 %v351_v33, %v352_v45  ;;  %v366_v58 = vrot.slane %v365_v50, 1  ;;  %v1201_v60 = vsel %vm1181_vm2, %v3953_v22, %v1200_v51 }
  0x47   :  { %v360_v57 = vmax.f32 %v358_v40, %v359_v36  ;;  %v375_v61 = vsel %vm150_vm0, %v54_v48, -inf  ;;  %v372_v62 = vmax.f32 %v370_v47, %v371_v38  ;;  %v1202_v39 = vsel %vm1183_vm3, %v3966_v49, %v1201_v60 }
  0x48   :  { %v1208_v43 = vsel %vm1181_vm2, %v339_v53, %v1207_v37  ;;  %v376_v1 = vrot.slane %v375_v61, 4  ;;  %v367_v2 = vmax.f32 %v365_v50, %v366_v58  ;;  %v1203_v3 = vsel %vm1185_vm4, %v3968_v52, %v1202_v39 }
  0x49   :  { %v1209_v4 = vsel %vm1183_vm3, %v346_v54, %v1208_v43  ;;  %v382_v22 = vsel %vm150_vm0, %v55_v56, -inf  ;;  %v373_v5 = vrot.slane %v372_v62, 1  ;;  %v1204_v6 = vsel %vm1187_vm5, %v3983_v59, %v1203_v3  ;;  %v63_v43 = vld [vmem:[%s5702_s0 + $0x148] sm:$0xff] }
  0x4a   :  { %v1210_v49 = vsel %vm1185_vm4, %v353_v55, %v1209_v4  ;;  %v377_v12 = vmax.f32 %v375_v61, %v376_v1  ;;  %v1205_v52 = vsel %vm1189_vm6, %v3991_v0, %v1204_v6  ;;  %v383_v14 = vrot.slane %v382_v22, 4 }
  0x4b   :  { %v1211_v13 = vsel %vm1187_vm5, %v360_v57, %v1210_v49  ;;  %v389_v15 = vsel %vm150_vm0, %v56_v63, -inf  ;;  %v374_v59 = vmax.f32 %v372_v62, %v373_v5  ;;  %v1206_v16 = vsel %vm1191_vm7, %v3997_v9, %v1205_v52  ;;  %v64_v63 = vld [vmem:[%s5702_s0 + $0x150] sm:$0xff] }
  0x4c   :  { %v1212_v18 = vsel %vm1189_vm6, %v367_v2, %v1211_v13  ;;  %v378_v0 = vrot.slane %v377_v12, 2  ;;  %1316 = vst.msk [vmem:[#allocation2 + $0x10] sm:$0xff] %vm150_vm0, %v1206_v16  ;;  %v384_v23 = vmax.f32 %v382_v22, %v383_v14  ;;  %v390_v24 = vrot.slane %v389_v15, 4 }
  0x4d   :  { %v396_v25 = vsel %vm150_vm0, %v57_v7, -inf  ;;  %v403_v26 = vsel %vm150_vm0, %v58_v8, -inf  ;;  %v1213_v9 = vsel %vm1191_vm7, %v374_v59, %v1212_v18  ;;  %v410_v30 = vsel %vm150_vm0, %v59_v19, -inf  ;;  %v65_v7 = vld [vmem:[%s5702_s0 + $0x158] sm:$0xff]  ;;  %v66_v8 = vld [vmem:[%s5702_s0 + $0x160] sm:$0xff]  ;;  %v67_v19 = vld [vmem:[%s5702_s0 + $0x168] sm:$0xff] }
  0x4e   :  { %v379_v10 = vmax.f32 %v377_v12, %v378_v0  ;;  %v397_v11 = vrot.slane %v396_v25, 4  ;;  %v404_v28 = vrot.slane %v403_v26, 4  ;;  %1317 = vst.msk [vmem:[#allocation2 + $0x18] sm:$0xff] %vm150_vm0, %v1213_v9  ;;  %v385_v29 = vrot.slane %v384_v23, 2 }
  0x4f   :  { %v391_v17 = vmax.f32 %v389_v15, %v390_v24  ;;  %v417_v31 = vsel %vm150_vm0, %v60_v20, -inf  ;;  %v411_v35 = vrot.slane %v410_v30, 4  ;;  %v424_v44 = vsel %vm150_vm0, %v61_v27, -inf  ;;  %v68_v20 = vld [vmem:[%s5702_s0 + $0x170] sm:$0xff] }
  0x50   :  { %v380_v32 = vrot.slane %v379_v10, 1  ;;  %v398_v33 = vmax.f32 %v396_v25, %v397_v11  ;;  %v405_v34 = vmax.f32 %v403_v26, %v404_v28  ;;  %v386_v40 = vmax.f32 %v384_v23, %v385_v29  ;;  %v69_v11 = vld [vmem:[%s5702_s0 + $0x178] sm:$0xff] }
  0x51   :  { %v392_v41 = vrot.slane %v391_v17, 2  ;;  %v418_v42 = vrot.slane %v417_v31, 4  ;;  %v412_v36 = vmax.f32 %v410_v30, %v411_v35  ;;  %v425_v53 = vrot.slane %v424_v44, 4 }
  0x52   :  { %v4060_v45 = vmax.f32 %v379_v10, %v380_v32  ;;  %v399_v47 = vrot.slane %v398_v33, 2  ;;  %v406_v48 = vrot.slane %v405_v34, 2  ;;  %v387_v50 = vrot.slane %v386_v40, 1 }
  0x53   :  { %v393_v51 = vmax.f32 %v391_v17, %v392_v41  ;;  %v419_v37 = vmax.f32 %v417_v31, %v418_v42  ;;  %v1650_v54 = vld [vmem:[#allocation2 + $0x10] sm:$0xff]  ;;  %v413_v56 = vrot.slane %v412_v36, 2  ;;  %v431_v57 = vsel %vm150_vm0, %v62_v21, -inf }
  0x54   :  { %v400_v55 = vmax.f32 %v398_v33, %v399_v47  ;;  %v407_v38 = vmax.f32 %v405_v34, %v406_v48  ;;  %v4063_v58 = vmax.f32 %v386_v40, %v387_v50  ;;  %v426_v62 = vmax.f32 %v424_v44, %v425_v53 }
  0x55   :  { %v394_v60 = vrot.slane %v393_v51, 1  ;;  %v420_v61 = vrot.slane %v419_v37, 2  ;;  %v1651_v39 = vld [vmem:[#allocation2 + $0x18] sm:$0xff]  ;;  %v414_v3 = vmax.f32 %v412_v36, %v413_v56  ;;  %v432_v4 = vrot.slane %v431_v57, 4 }
  0x56   :  { %v401_v1 = vrot.slane %v400_v55, 1  ;;  %v408_v2 = vrot.slane %v407_v38, 1  ;;  %v4071_v22 = vpack.c.bf16 %v1651_v39, %v1650_v54  ;;  %v427_v49 = vrot.slane %v426_v62, 2 }
  0x57   :  { %v4073_v5 = vmax.f32 %v393_v51, %v394_v60  ;;  %v421_v6 = vmax.f32 %v419_v37, %v420_v61  ;;  %v415_v13 = vrot.slane %v414_v3, 1  ;;  %v433_v14 = vmax.f32 %v431_v57, %v432_v4 }
  0x58   :  { %v4081_v12 = vmax.f32 %v400_v55, %v401_v1  ;;  %v4083_v52 = vmax.f32 %v407_v38, %v408_v2  ;;  %3273 = vmatmul.msk.bf16.gmra.mxu0 %vm150_vm0, %v4071_v22  ;;  %3281 = vmatmul.msk.bf16.gmra.mxu1 %vm150_vm0, %v4071_v22  ;;  %v428_v59 = vmax.f32 %v426_v62, %v427_v49  ;;  %v438_v16 = vsel %vm150_vm0, %v63_v43, -inf  ;;  %v70_v1 = vld [vmem:[%s5702_s0 + $0x180] sm:$0xff] }
  0x59   :  { %v422_v15 = vrot.slane %v421_v6, 1  ;;  %v445_v18 = vsel %vm150_vm0, %v64_v63, -inf  ;;  %3289 = vmatmul.msk.bf16.gmra.mxu2 %vm150_vm0, %v4071_v22  ;;  %3297 = vmatmul.msk.bf16.gmra.mxu3 %vm150_vm0, %v4071_v22  ;;  %v4101_v0 = vmax.f32 %v414_v3, %v415_v13  ;;  %v434_v23 = vrot.slane %v433_v14, 2 }
  0x5a   :  { %v439_v24 = vrot.slane %v438_v16, 4  ;;  %v446_v25 = vrot.slane %v445_v18, 4  ;;  %v429_v9 = vrot.slane %v428_v59, 1  ;;  %v452_v27 = vsel %vm150_vm0, %v65_v7, -inf }
  0x5b   :  { %v4103_v26 = vmax.f32 %v421_v6, %v422_v15  ;;  %v459_v10 = vsel %vm150_vm0, %v66_v8, -inf  ;;  %v435_v28 = vmax.f32 %v433_v14, %v434_v23  ;;  %v453_v30 = vrot.slane %v452_v27, 4 }
  0x5c   :  { %v440_v29 = vmax.f32 %v438_v16, %v439_v24  ;;  %v447_v17 = vmax.f32 %v445_v18, %v446_v25  ;;  %v4110_v31 = vmax.f32 %v428_v59, %v429_v9  ;;  %v460_v32 = vrot.slane %v459_v10, 4  ;;  %v72_v24 = vld [vmem:[%s5702_s0 + $0x190] sm:$0xff] }
  0x5d   :  { %v466_v33 = vsel %vm150_vm0, %v67_v19, -inf  ;;  %v473_v34 = vsel %vm150_vm0, %v68_v20, -inf  ;;  %v436_v35 = vrot.slane %v435_v28, 1  ;;  %v454_v41 = vmax.f32 %v452_v27, %v453_v30  ;;  %v75_v30 = vld [vmem:[%s5702_s0 + $0x1a8] sm:$0xff] }
  0x5e   :  { %v441_v21 = vrot.slane %v440_v29, 2  ;;  %v448_v40 = vrot.slane %v447_v17, 2  ;;  %v461_v42 = vmax.f32 %v459_v10, %v460_v32  ;;  %v467_v44 = vrot.slane %v466_v33, 4 }
  0x5f   :  { %v474_v47 = vrot.slane %v473_v34, 4  ;;  %v480_v48 = vsel %vm150_vm0, %v69_v11, -inf  ;;  %v437_v36 = vmax.f32 %v435_v28, %v436_v35  ;;  %v455_v37 = vrot.slane %v454_v41, 2 }
  0x60   :  { %v442_v50 = vmax.f32 %v440_v29, %v441_v21  ;;  %v449_v51 = vmax.f32 %v447_v17, %v448_v40  ;;  %v462_v53 = vrot.slane %v461_v42, 2  ;;  %v468_v54 = vmax.f32 %v466_v33, %v467_v44  ;;  %v73_v29 = vld [vmem:[%s5702_s0 + $0x198] sm:$0xff]  ;;  %v74_v17 = vld [vmem:[%s5702_s0 + $0x1a0] sm:$0xff]  ;;  %v76_v40 = vld [vmem:[%s5702_s0 + $0x1b0] sm:$0xff] }
  0x61   :  { %v475_v55 = vmax.f32 %v473_v34, %v474_v47  ;;  %v481_v38 = vrot.slane %v480_v48, 4  ;;  %v456_v60 = vmax.f32 %v454_v41, %v455_v37  ;;  %v1214_v61 = vsel %vm1179_vm1, %v4063_v58, %v4060_v45  ;;  %v71_v45 = vld [vmem:[%s5702_s0 + $0x188] sm:$0xff] }
  0x62   :  { %v443_v56 = vrot.slane %v442_v50, 1  ;;  %v450_v57 = vrot.slane %v449_v51, 1  ;;  %v463_v62 = vmax.f32 %v461_v42, %v462_v53  ;;  %v469_v39 = vrot.slane %v468_v54, 2 }
  0x63   :  { %v476_v43 = vrot.slane %v475_v55, 2  ;;  %v482_v63 = vmax.f32 %v480_v48, %v481_v38  ;;  %v457_v4 = vrot.slane %v456_v60, 1  ;;  %v1215_v6 = vsel %vm1181_vm2, %v4073_v5, %v1214_v61 }
  0x64   :  { %v444_v2 = vmax.f32 %v442_v50, %v443_v56  ;;  %v451_v3 = vmax.f32 %v449_v51, %v450_v57  ;;  %v464_v49 = vrot.slane %v463_v62, 1  ;;  %v470_v7 = vmax.f32 %v468_v54, %v469_v39  ;;  %v77_v51 = vld [vmem:[%s5702_s0 + $0x1b8] sm:$0xff] }
  0x65   :  { %v477_v8 = vmax.f32 %v475_v55, %v476_v43  ;;  %v483_v13 = vrot.slane %v482_v63, 2  ;;  %v458_v58 = vmax.f32 %v456_v60, %v457_v4  ;;  %v1216_v14 = vsel %vm1183_vm3, %v4081_v12, %v1215_v6  ;;  %v78_v43 = vld [vmem:[%s5702_s0 + $0x1c0] sm:$0xff] }
  0x66   :  { %v1221_v15 = vsel %vm1179_vm1, %v444_v2, %v437_v36  ;;  %v487_v59 = vsel %vm150_vm0, %v70_v1, -inf  ;;  %v465_v16 = vmax.f32 %v463_v62, %v464_v49  ;;  %v471_v18 = vrot.slane %v470_v7, 1 }
  0x67   :  { %v478_v19 = vrot.slane %v477_v8, 1  ;;  %v484_v5 = vmax.f32 %v482_v63, %v483_v13  ;;  %v1217_v20 = vsel %vm1185_vm4, %v4083_v52, %v1216_v14  ;;  %v1222_v23 = vsel %vm1181_vm2, %v451_v3, %v1221_v15 }
  0x68   :  { %v488_v25 = vrot.slane %v487_v59, 4  ;;  %v494_v12 = vsel %vm150_vm0, %v71_v45, -inf  ;;  %v472_v9 = vmax.f32 %v470_v7, %v471_v18  ;;  %v1218_v11 = vsel %vm1187_vm5, %v4101_v0, %v1217_v20 }
  0x69   :  { %v479_v27 = vmax.f32 %v477_v8, %v478_v19  ;;  %v485_v10 = vrot.slane %v484_v5, 1  ;;  %v1219_v28 = vsel %vm1189_vm6, %v4103_v26, %v1218_v11  ;;  %v1223_v52 = vsel %vm1183_vm3, %v458_v58, %v1222_v23  ;;  %v79_v8 = vld [vmem:[%s5702_s0 + $0x1c8] sm:$0xff] }
  0x6a   :  { %v489_v32 = vmax.f32 %v487_v59, %v488_v25  ;;  %v495_v33 = vrot.slane %v494_v12, 4  ;;  %v1220_v26 = vsel %vm1191_vm7, %v4110_v31, %v1219_v28  ;;  %v1224_v34 = vsel %vm1185_vm4, %v465_v16, %v1223_v52 }
  0x6b   :  { %v486_v0 = vmax.f32 %v484_v5, %v485_v10  ;;  %v501_v35 = vsel %vm150_vm0, %v72_v24, -inf  ;;  %v1225_v21 = vsel %vm1187_vm5, %v472_v9, %v1224_v34  ;;  %1318 = vst.msk [vmem:[#allocation2 + $0x20] sm:$0xff] %vm150_vm0, %v1220_v26  ;;  %v508_v48 = vsel %vm150_vm0, %v73_v29, -inf }
  0x6c   :  { %v490_v41 = vrot.slane %v489_v32, 2  ;;  %v496_v42 = vmax.f32 %v494_v12, %v495_v33  ;;  %v502_v44 = vrot.slane %v501_v35, 4  ;;  %v1226_v47 = vsel %vm1189_vm6, %v479_v27, %v1225_v21  ;;  %v80_v12 = vld [vmem:[%s5702_s0 + $0x1d0] sm:$0xff]  ;;  %v83_v33 = vld [vmem:[%s5702_s0 + $0x1e8] sm:$0xff] }
  0x6d   :  { %v515_v31 = vsel %vm150_vm0, %v74_v17, -inf  ;;  %v522_v36 = vsel %vm150_vm0, %v75_v30, -inf  ;;  %v1227_v50 = vsel %vm1191_vm7, %v486_v0, %v1226_v47  ;;  %v509_v55 = vrot.slane %v508_v48, 4  ;;  %v81_v30 = vld [vmem:[%s5702_s0 + $0x1d8] sm:$0xff] }
  0x6e   :  { %v491_v37 = vmax.f32 %v489_v32, %v490_v41  ;;  %v497_v53 = vrot.slane %v496_v42, 2  ;;  %v503_v54 = vmax.f32 %v501_v35, %v502_v44  ;;  %1319 = vst.msk [vmem:[#allocation2 + $0x28] sm:$0xff] %vm150_vm0, %v1227_v50  ;;  %v516_v38 = vrot.slane %v515_v31, 4  ;;  %v82_v32 = vld [vmem:[%s5702_s0 + $0x1e0] sm:$0xff]  ;;  %v84_v44 = vld [vmem:[%s5702_s0 + $0x1f0] sm:$0xff] }
  0x6f   :  { %v523_v56 = vrot.slane %v522_v36, 4  ;;  %v529_v57 = vsel %vm150_vm0, %v76_v40, -inf  ;;  %v510_v63 = vmax.f32 %v508_v48, %v509_v55  ;;  %v536_v3 = vsel %vm150_vm0, %v77_v51, -inf }
  0x70   :  { %v492_v60 = vrot.slane %v491_v37, 1  ;;  %v498_v61 = vmax.f32 %v496_v42, %v497_v53  ;;  %v504_v62 = vrot.slane %v503_v54, 2  ;;  %v530_v39 = vrot.slane %v529_v57, 4 }
  0x71   :  { %v517_v1 = vmax.f32 %v515_v31, %v516_v38  ;;  %v524_v2 = vmax.f32 %v522_v36, %v523_v56  ;;  %v511_v13 = vrot.slane %v510_v63, 2  ;;  %v537_v14 = vrot.slane %v536_v3, 4 }
  0x72   :  { %v4174_v4 = vmax.f32 %v491_v37, %v492_v60  ;;  %v499_v6 = vrot.slane %v498_v61, 1  ;;  %v505_v49 = vmax.f32 %v503_v54, %v504_v62  ;;  %v531_v7 = vmax.f32 %v529_v57, %v530_v39  ;;  %v1652_v15 = vld [vmem:[#allocation2 + $0x20] sm:$0xff]  ;;  %v85_v57 = vld [vmem:[%s5702_s0 + $0x1f8] sm:$0xff] }
  0x73   :  { %v518_v45 = vrot.slane %v517_v1, 2  ;;  %v525_v58 = vrot.slane %v524_v2, 2  ;;  %v543_v19 = vsel %vm150_vm0, %v78_v43, -inf  ;;  %v512_v5 = vmax.f32 %v510_v63, %v511_v13 }
  0x74   :  { %v4179_v59 = vmax.f32 %v498_v61, %v499_v6  ;;  %v506_v16 = vrot.slane %v505_v49, 1  ;;  %v532_v18 = vrot.slane %v531_v7, 2  ;;  %v538_v24 = vmax.f32 %v536_v3, %v537_v14 }
  0x75   :  { %v519_v20 = vmax.f32 %v517_v1, %v518_v45  ;;  %v526_v23 = vmax.f32 %v524_v2, %v525_v58  ;;  %v1653_v25 = vld [vmem:[#allocation2 + $0x28] sm:$0xff]  ;;  %v544_v10 = vrot.slane %v543_v19, 4  ;;  %v550_v11 = vsel %vm150_vm0, %v79_v8, -inf }
  0x76   :  { %v4185_v9 = vmax.f32 %v505_v49, %v506_v16  ;;  %v533_v27 = vmax.f32 %v531_v7, %v532_v18  ;;  %v4188_v28 = vpack.c.bf16 %v1653_v25, %v1652_v15  ;;  %v513_v52 = vrot.slane %v512_v5, 1 }
  0x77   :  { %v520_v29 = vrot.slane %v519_v20, 1  ;;  %v527_v17 = vrot.slane %v526_v23, 1  ;;  %v539_v26 = vrot.slane %v538_v24, 2  ;;  %v545_v34 = vmax.f32 %v543_v19, %v544_v10  ;;  %v86_v10 = vld [vmem:[%s5702_s0 + $0x200] sm:$0xff] }
  0x78   :  { %v534_v0 = vrot.slane %v533_v27, 1  ;;  %v551_v35 = vrot.slane %v550_v11, 4  ;;  %3274 = vmatmul.msk.bf16.gmra.mxu0 %vm150_vm0, %v4188_v28  ;;  %3282 = vmatmul.msk.bf16.gmra.mxu1 %vm150_vm0, %v4188_v28  ;;  %v514_v21 = vmax.f32 %v512_v5, %v513_v52  ;;  %v557_v42 = vsel %vm150_vm0, %v80_v12, -inf }
  0x79   :  { %v4203_v40 = vmax.f32 %v519_v20, %v520_v29  ;;  %v4205_v41 = vmax.f32 %v526_v23, %v527_v17  ;;  %3290 = vmatmul.msk.bf16.gmra.mxu2 %vm150_vm0, %v4188_v28  ;;  %3298 = vmatmul.msk.bf16.gmra.mxu3 %vm150_vm0, %v4188_v28  ;;  %v540_v48 = vmax.f32 %v538_v24, %v539_v26  ;;  %v546_v31 = vrot.slane %v545_v34, 2 }
  0x7a   :  { %v4215_v47 = vmax.f32 %v533_v27, %v534_v0  ;;  %v552_v36 = vmax.f32 %v550_v11, %v551_v35  ;;  %v558_v50 = vrot.slane %v557_v42, 4  ;;  %v564_v51 = vsel %vm150_vm0, %v81_v30, -inf }
  0x7b   :  { %v571_v37 = vsel %vm150_vm0, %v82_v32, -inf  ;;  %v578_v53 = vsel %vm150_vm0, %v83_v33, -inf  ;;  %v541_v54 = vrot.slane %v540_v48, 1  ;;  %v547_v55 = vmax.f32 %v545_v34, %v546_v31  ;;  %v87_v34 = vld [vmem:[%s5702_s0 + $0x208] sm:$0xff] }
  0x7c   :  { %v553_v38 = vrot.slane %v552_v36, 2  ;;  %v565_v56 = vrot.slane %v564_v51, 4  ;;  %v559_v60 = vmax.f32 %v557_v42, %v558_v50  ;;  %v572_v61 = vrot.slane %v571_v37, 4 }
  0x7d   :  { %v579_v62 = vrot.slane %v578_v53, 4  ;;  %v585_v39 = vsel %vm150_vm0, %v84_v44, -inf  ;;  %v542_v43 = vmax.f32 %v540_v48, %v541_v54  ;;  %v548_v63 = vrot.slane %v547_v55, 1 }
  0x7e   :  { %v554_v1 = vmax.f32 %v552_v36, %v553_v38  ;;  %v566_v2 = vmax.f32 %v564_v51, %v565_v56  ;;  %v560_v3 = vrot.slane %v559_v60, 2  ;;  %v573_v6 = vmax.f32 %v571_v37, %v572_v61  ;;  %v89_v51 = vld [vmem:[%s5702_s0 + $0x218] sm:$0xff] }
  0x7f   :  { %v580_v49 = vmax.f32 %v578_v53, %v579_v62  ;;  %v586_v7 = vrot.slane %v585_v39, 4  ;;  %v549_v8 = vmax.f32 %v547_v55, %v548_v63  ;;  %v592_v58 = vsel %vm150_vm0, %v85_v57, -inf  ;;  %v90_v57 = vld [vmem:[%s5702_s0 + $0x220] sm:$0xff] }
  0x80   :  { %v555_v13 = vrot.slane %v554_v1, 1  ;;  %v567_v45 = vrot.slane %v566_v2, 2  ;;  %v561_v14 = vmax.f32 %v559_v60, %v560_v3  ;;  %v574_v15 = vrot.slane %v573_v6, 2  ;;  %v91_v60 = vld [vmem:[%s5702_s0 + $0x228] sm:$0xff] }
  0x81   :  { %v581_v16 = vrot.slane %v580_v49, 2  ;;  %v587_v18 = vmax.f32 %v585_v39, %v586_v7  ;;  %v593_v20 = vrot.slane %v592_v58, 4  ;;  %v1228_v23 = vsel %vm1179_vm1, %v4179_v59, %v4174_v4 }
  0x82   :  { %v556_v19 = vmax.f32 %v554_v1, %v555_v13  ;;  %v568_v5 = vmax.f32 %v566_v2, %v567_v45  ;;  %v562_v24 = vrot.slane %v561_v14, 1  ;;  %v575_v25 = vmax.f32 %v573_v6, %v574_v15  ;;  %v92_v2 = vld [vmem:[%s5702_s0 + $0x230] sm:$0xff] }
  0x83   :  { %v582_v12 = vmax.f32 %v580_v49, %v581_v16  ;;  %v588_v27 = vrot.slane %v587_v18, 2  ;;  %v594_v52 = vmax.f32 %v592_v58, %v593_v20  ;;  %v1229_v29 = vsel %vm1181_vm2, %v4185_v9, %v1228_v23  ;;  %v93_v58 = vld [vmem:[%s5702_s0 + $0x238] sm:$0xff] }
  0x84   :  { %v569_v11 = vrot.slane %v568_v5, 1  ;;  %v1235_v17 = vsel %vm1179_vm1, %v556_v19, %v549_v8  ;;  %v563_v30 = vmax.f32 %v561_v14, %v562_v24  ;;  %v576_v32 = vrot.slane %v575_v25, 1 }
  0x85   :  { %v583_v33 = vrot.slane %v582_v12, 1  ;;  %v589_v0 = vmax.f32 %v587_v18, %v588_v27  ;;  %v595_v59 = vrot.slane %v594_v52, 2  ;;  %v1230_v26 = vsel %vm1183_vm3, %v514_v21, %v1229_v29  ;;  %v88_v21 = vld [vmem:[%s5702_s0 + $0x210] sm:$0xff]  ;;  %v94_v27 = vld [vmem:[%s5702_s0 + $0x240] sm:$0xff] }
  0x86   :  { %v570_v4 = vmax.f32 %v568_v5, %v569_v11  ;;  %v599_v35 = vsel %vm150_vm0, %v86_v10, -inf  ;;  %v577_v42 = vmax.f32 %v575_v25, %v576_v32  ;;  %v1231_v9 = vsel %vm1185_vm4, %v4203_v40, %v1230_v26 }
  0x87   :  { %v584_v44 = vmax.f32 %v582_v12, %v583_v33  ;;  %v590_v48 = vrot.slane %v589_v0, 1  ;;  %v596_v31 = vmax.f32 %v594_v52, %v595_v59  ;;  %v1232_v36 = vsel %vm1187_vm5, %v4205_v41, %v1231_v9  ;;  %v95_v9 = vld [vmem:[%s5702_s0 + $0x248] sm:$0xff] }
  0x88   :  { %v1236_v50 = vsel %vm1181_vm2, %v563_v30, %v1235_v17  ;;  %v600_v37 = vrot.slane %v599_v35, 4  ;;  %v1233_v54 = vsel %vm1189_vm6, %v4215_v47, %v1232_v36  ;;  %v606_v55 = vsel %vm150_vm0, %v87_v34, -inf }
  0x89   :  { %v591_v53 = vmax.f32 %v589_v0, %v590_v48  ;;  %v1237_v40 = vsel %vm1183_vm3, %v570_v4, %v1236_v50  ;;  %v597_v41 = vrot.slane %v596_v31, 1  ;;  %v1234_v38 = vsel %vm1191_vm7, %v542_v43, %v1233_v54 }
  0x8a   :  { %v1238_v56 = vsel %vm1185_vm4, %v577_v42, %v1237_v40  ;;  %v601_v61 = vmax.f32 %v599_v35, %v600_v37  ;;  %1320 = vst.msk [vmem:[#allocation2 + $0x30] sm:$0xff] %vm150_vm0, %v1234_v38  ;;  %v607_v62 = vrot.slane %v606_v55, 4  ;;  %v613_v39 = vsel %vm150_vm0, %v88_v21, -inf  ;;  %v96_v37 = vld [vmem:[%s5702_s0 + $0x250] sm:$0xff]  ;;  %v97_v38 = vld [vmem:[%s5702_s0 + $0x258] sm:$0xff] }
  0x8b   :  { %v1239_v47 = vsel %vm1187_vm5, %v584_v44, %v1238_v56  ;;  %v620_v43 = vsel %vm150_vm0, %v89_v51, -inf  ;;  %v598_v63 = vmax.f32 %v596_v31, %v597_v41  ;;  %v614_v6 = vrot.slane %v613_v39, 4 }
  0x8c   :  { %v1240_v1 = vsel %vm1189_vm6, %v591_v53, %v1239_v47  ;;  %v602_v3 = vrot.slane %v601_v61, 2  ;;  %v608_v49 = vmax.f32 %v606_v55, %v607_v62  ;;  %v621_v7 = vrot.slane %v620_v43, 4 }
  0x8d   :  { %v627_v8 = vsel %vm150_vm0, %v90_v57, -inf  ;;  %v634_v13 = vsel %vm150_vm0, %v91_v60, -inf  ;;  %v1241_v45 = vsel %vm1191_vm7, %v598_v63, %v1240_v1  ;;  %v615_v15 = vmax.f32 %v613_v39, %v614_v6  ;;  %v99_v63 = vld [vmem:[%s5702_s0 + $0x268] sm:$0xff] }
  0x8e   :  { %v603_v14 = vmax.f32 %v601_v61, %v602_v3  ;;  %v628_v16 = vrot.slane %v627_v8, 4  ;;  %1321 = vst.msk [vmem:[#allocation2 + $0x38] sm:$0xff] %vm150_vm0, %v1241_v45  ;;  %v609_v18 = vrot.slane %v608_v49, 2  ;;  %v622_v19 = vmax.f32 %v620_v43, %v621_v7  ;;  %v98_v61 = vld [vmem:[%s5702_s0 + $0x260] sm:$0xff]  ;;  %v100_v45 = vld [vmem:[%s5702_s0 + $0x270] sm:$0xff] }
  0x8f   :  { %v635_v5 = vrot.slane %v634_v13, 4  ;;  %v641_v20 = vsel %vm150_vm0, %v92_v2, -inf  ;;  %v616_v24 = vrot.slane %v615_v15, 2  ;;  %v648_v29 = vsel %vm150_vm0, %v93_v58, -inf }
  0x90   :  { %v604_v23 = vrot.slane %v603_v14, 1  ;;  %v629_v25 = vmax.f32 %v627_v8, %v628_v16  ;;  %v642_v12 = vrot.slane %v641_v20, 4  ;;  %v610_v10 = vmax.f32 %v608_v49, %v609_v18 }
  0x91   :  { %v623_v11 = vrot.slane %v622_v19, 2  ;;  %v636_v52 = vmax.f32 %v634_v13, %v635_v5  ;;  %v617_v30 = vmax.f32 %v615_v15, %v616_v24  ;;  %v649_v26 = vrot.slane %v648_v29, 4  ;;  %v1654_v34 = vld [vmem:[#allocation2 + $0x30] sm:$0xff] }
  0x92   :  { %v4282_v17 = vmax.f32 %v603_v14, %v604_v23  ;;  %v630_v32 = vrot.slane %v629_v25, 2  ;;  %v643_v33 = vmax.f32 %v641_v20, %v642_v12  ;;  %v611_v0 = vrot.slane %v610_v10, 1  ;;  %v101_v23 = vld [vmem:[%s5702_s0 + $0x278] sm:$0xff] }
  0x93   :  { %v624_v4 = vmax.f32 %v622_v19, %v623_v11  ;;  %v637_v59 = vrot.slane %v636_v52, 2  ;;  %v618_v35 = vrot.slane %v617_v30, 1  ;;  %v655_v48 = vsel %vm150_vm0, %v94_v27, -inf }
  0x94   :  { %v631_v42 = vmax.f32 %v629_v25, %v630_v32  ;;  %v644_v44 = vrot.slane %v643_v33, 2  ;;  %v4288_v31 = vmax.f32 %v610_v10, %v611_v0  ;;  %v650_v21 = vmax.f32 %v648_v29, %v649_v26 }
  0x95   :  { %v625_v36 = vrot.slane %v624_v4, 1  ;;  %v638_v50 = vmax.f32 %v636_v52, %v637_v59  ;;  %v1655_v51 = vld [vmem:[#allocation2 + $0x38] sm:$0xff]  ;;  %v4293_v53 = vmax.f32 %v617_v30, %v618_v35  ;;  %v656_v55 = vrot.slane %v655_v48, 4 }
  0x96   :  { %v632_v54 = vrot.slane %v631_v42, 1  ;;  %v645_v40 = vmax.f32 %v643_v33, %v644_v44  ;;  %v4295_v41 = vpack.c.bf16 %v1655_v51, %v1654_v34  ;;  %v651_v60 = vrot.slane %v650_v21, 2 }
  0x97   :  { %v4300_v56 = vmax.f32 %v624_v4, %v625_v36  ;;  %v639_v57 = vrot.slane %v638_v50, 1  ;;  %v657_v39 = vmax.f32 %v655_v48, %v656_v55  ;;  %v662_v43 = vsel %vm150_vm0, %v95_v9, -inf }
  0x98   :  { %v4305_v47 = vmax.f32 %v631_v42, %v632_v54  ;;  %v646_v62 = vrot.slane %v645_v40, 1  ;;  %3275 = vmatmul.msk.bf16.gmra.mxu0 %vm150_vm0, %v4295_v41  ;;  %3283 = vmatmul.msk.bf16.gmra.mxu1 %vm150_vm0, %v4295_v41  ;;  %v652_v2 = vmax.f32 %v650_v21, %v651_v60  ;;  %v663_v3 = vrot.slane %v662_v43, 4 }
  0x99   :  { %v4315_v1 = vmax.f32 %v638_v50, %v639_v57  ;;  %v669_v6 = vsel %vm150_vm0, %v96_v37, -inf  ;;  %3291 = vmatmul.msk.bf16.gmra.mxu2 %vm150_vm0, %v4295_v41  ;;  %3299 = vmatmul.msk.bf16.gmra.mxu3 %vm150_vm0, %v4295_v41  ;;  %v658_v7 = vrot.slane %v657_v39, 2  ;;  %v676_v13 = vsel %vm150_vm0, %v97_v38, -inf }
  0x9a   :  { %v4322_v49 = vmax.f32 %v645_v40, %v646_v62  ;;  %v670_v8 = vrot.slane %v669_v6, 4  ;;  %v653_v58 = vrot.slane %v652_v2, 1  ;;  %v664_v14 = vmax.f32 %v662_v43, %v663_v3  ;;  %v3599_v62 = vld [vmem:[%s5703_s1 + $0x34] sm:$0xf0] }
  0x9b   :  { %v677_v15 = vrot.slane %v676_v13, 4  ;;  %v683_v16 = vsel %vm150_vm0, %v98_v61, -inf  ;;  %v659_v18 = vmax.f32 %v657_v39, %v658_v7  ;;  %v690_v20 = vsel %vm150_vm0, %v99_v63, -inf  ;;  %v3234_v61 = vld [vmem:[%s5703_s1 + $0x18] sm:$0xf] }
  0x9c   :  { %v671_v19 = vmax.f32 %v669_v6, %v670_v8  ;;  %v684_v5 = vrot.slane %v683_v16, 4  ;;  %v654_v24 = vmax.f32 %v652_v2, %v653_v58  ;;  %v665_v25 = vrot.slane %v664_v14, 2  ;;  %v3226_v63 = vld [vmem:[%s5703_s1 + $0x10] sm:$0xf]  ;;  %v3595_v8 = vld [vmem:[%s5703_s1 + $0x1c] sm:$0xf] }
  0x9d   :  { %v678_v12 = vmax.f32 %v676_v13, %v677_v15  ;;  %v691_v27 = vrot.slane %v690_v20, 4  ;;  %v660_v10 = vrot.slane %v659_v18, 1  ;;  %v697_v29 = vsel %vm150_vm0, %v100_v45, -inf  ;;  %v3228_v15 = vld [vmem:[%s5703_s1 + $0x30] sm:$0xf0] }
  0x9e   :  { %v672_v11 = vrot.slane %v671_v19, 2  ;;  %v685_v52 = vmax.f32 %v683_v16, %v684_v5  ;;  %v666_v30 = vmax.f32 %v664_v14, %v665_v25  ;;  %v698_v0 = vrot.slane %v697_v29, 4 }
  0x9f   :  { %v679_v32 = vrot.slane %v678_v12, 2  ;;  %v692_v33 = vmax.f32 %v690_v20, %v691_v27  ;;  %v661_v4 = vmax.f32 %v659_v18, %v660_v10  ;;  %v704_v34 = vsel %vm150_vm0, %v101_v23, -inf  ;;  %v103_v20 = vld [vmem:[%s5702_s0 + $0x288] sm:$0xff]  ;;  %v104_v23 = vld [vmem:[%s5702_s0 + $0x290] sm:$0xff]  ;;  %v105_v10 = vld [vmem:[%s5702_s0 + $0x298] sm:$0xff] }
  0xa0   :  { %v673_v59 = vmax.f32 %v671_v19, %v672_v11  ;;  %v686_v26 = vrot.slane %v685_v52, 2  ;;  %v667_v35 = vrot.slane %v666_v30, 1  ;;  %v699_v48 = vmax.f32 %v697_v29, %v698_v0 }
  0xa1   :  { %v680_v42 = vmax.f32 %v678_v12, %v679_v32  ;;  %v693_v44 = vrot.slane %v692_v33, 2  ;;  %v705_v50 = vrot.slane %v704_v34, 4  ;;  %v1242_v21 = vsel %vm1179_vm1, %v4288_v31, %v4282_v17  ;;  %v106_v32 = vld [vmem:[%s5702_s0 + $0x2a0] sm:$0xff] }
  0xa2   :  { %v674_v9 = vrot.slane %v673_v59, 1  ;;  %v687_v36 = vmax.f32 %v685_v52, %v686_v26  ;;  %v668_v51 = vmax.f32 %v666_v30, %v667_v35  ;;  %v700_v40 = vrot.slane %v699_v48, 2 }
  0xa3   :  { %v681_v37 = vrot.slane %v680_v42, 1  ;;  %v694_v54 = vmax.f32 %v692_v33, %v693_v44  ;;  %v706_v57 = vmax.f32 %v704_v34, %v705_v50  ;;  %v1243_v60 = vsel %vm1181_vm2, %v4293_v53, %v1242_v21  ;;  %v3598_v53 = vld [vmem:[%s5703_s1 + $0x2c] sm:$0xf0] }
  0xa4   :  { %v675_v55 = vmax.f32 %v673_v59, %v674_v9  ;;  %v688_v38 = vrot.slane %v687_v36, 1  ;;  %v701_v31 = vmax.f32 %v699_v48, %v700_v40  ;;  %v1244_v43 = vsel %vm1183_vm3, %v4300_v56, %v1243_v60  ;;  %v3236_v56 = vld [vmem:[%s5703_s1 + $0x38] sm:$0xf0]  ;;  %v108_v33 = vld [vmem:[%s5702_s0 + $0x2b0] sm:$0xff] }
  0xa5   :  { %v682_v39 = vmax.f32 %v680_v42, %v681_v37  ;;  %v695_v17 = vrot.slane %v694_v54, 1  ;;  %v707_v3 = vrot.slane %v706_v57, 2  ;;  %v1245_v6 = vsel %vm1185_vm4, %v4305_v47, %v1244_v43  ;;  %v3594_v47 = vld [vmem:[%s5703_s1 + $0x14] sm:$0xf]  ;;  %v109_v48 = vld [vmem:[%s5702_s0 + $0x2b8] sm:$0xff] }
  0xa6   :  { %v689_v2 = vmax.f32 %v687_v36, %v688_v38  ;;  %v1249_v7 = vsel %vm1179_vm1, %v668_v51, %v661_v4  ;;  %v702_v45 = vrot.slane %v701_v31, 1  ;;  %v1246_v58 = vsel %vm1187_vm5, %v4315_v1, %v1245_v6  ;;  %v102_v1 = vld [vmem:[%s5702_s0 + $0x280] sm:$0xff] }
  0xa7   :  { %v696_v13 = vmax.f32 %v694_v54, %v695_v17  ;;  %v1250_v14 = vsel %vm1181_vm2, %v675_v55, %v1249_v7  ;;  %v708_v16 = vmax.f32 %v706_v57, %v707_v3  ;;  %v1247_v18 = vsel %vm1189_vm6, %v4322_v49, %v1246_v58 }
  0xa8   :  { %v1251_v19 = vsel %vm1183_vm3, %v682_v39, %v1250_v14  ;;  %v3235_v5 = vor.u32 %v3599_v62, %v3234_v61  ;;  %v703_v25 = vmax.f32 %v701_v31, %v702_v45  ;;  %v1248_v12 = vsel %vm1191_vm7, %v654_v24, %v1247_v18  ;;  %v107_v24 = vld [vmem:[%s5702_s0 + $0x2a8] sm:$0xff]  ;;  %v110_v18 = vld [vmem:[%s5702_s0 + $0x2c0] sm:$0xff] }
  0xa9   :  { %v1252_v49 = vsel %vm1185_vm4, %v689_v2, %v1251_v19  ;;  %v3227_v27 = vor.u32 %v3598_v53, %v3226_v63  ;;  %v709_v11 = vrot.slane %v708_v16, 1  ;;  %1322 = vst.msk [vmem:[#allocation2 + $0x40] sm:$0xff] %vm150_vm0, %v1248_v12  ;;  %v3239_v29 = vor.u32 %v3595_v8, %v3236_v56  ;;  %v111_v19 = vld [vmem:[%s5702_s0 + $0x2c8] sm:$0xff] }
  0xaa   :  { %v1253_v52 = vsel %vm1187_vm5, %v696_v13, %v1252_v49  ;;  %2111 = vmatpush.bf16.msrb.mxu2 %v3235_v5  ;;  %v3231_v30 = vor.u32 %v3594_v47, %v3228_v15  ;;  %v711_v4 = vsel %vm150_vm0, %v102_v1, -inf  ;;  %v718_v59 = vsel %vm150_vm0, %v103_v20, -inf }
  0xab   :  { %v1254_v0 = vsel %vm1189_vm6, %v703_v25, %v1253_v52  ;;  %2013 = vmatpush.bf16.msrb.mxu0 %v3227_v27  ;;  %v725_v26 = vsel %vm150_vm0, %v104_v23, -inf  ;;  %v710_v34 = vmax.f32 %v708_v16, %v709_v11  ;;  %2160 = vmatpush.bf16.msrb.mxu3 %v3239_v29  ;;  %v712_v35 = vrot.slane %v711_v4, 4  ;;  %v112_v52 = vld [vmem:[%s5702_s0 + $0x2d0] sm:$0xff] }
  0xac   :  { %2062 = vmatpush.bf16.msrb.mxu1 %v3231_v30  ;;  %v719_v42 = vrot.slane %v718_v59, 4  ;;  %v726_v44 = vrot.slane %v725_v26, 4  ;;  %v732_v9 = vsel %vm150_vm0, %v105_v10, -inf  ;;  %v739_v36 = vsel %vm150_vm0, %v106_v32, -inf }
  0xad   :  { %v746_v50 = vsel %vm150_vm0, %v107_v24, -inf  ;;  %v753_v21 = vsel %vm150_vm0, %v108_v33, -inf  ;;  %v1255_v51 = vsel %vm1191_vm7, %v710_v34, %v1254_v0  ;;  %v713_v37 = vmax.f32 %v711_v4, %v712_v35  ;;  %v113_v24 = vld [vmem:[%s5702_s0 + $0x2d8] sm:$0xff]  ;;  %v114_v33 = vld [vmem:[%s5702_s0 + $0x2e0] sm:$0xff] }
  0xae   :  { %v720_v54 = vmax.f32 %v718_v59, %v719_v42  ;;  %v727_v40 = vmax.f32 %v725_v26, %v726_v44  ;;  %1323 = vst.msk [vmem:[#allocation2 + $0x48] sm:$0xff] %vm150_vm0, %v1255_v51  ;;  %v733_v55 = vrot.slane %v732_v9, 4  ;;  %v740_v38 = vrot.slane %v739_v36, 4 }
  0xaf   :  { %v747_v57 = vrot.slane %v746_v50, 4  ;;  %v754_v60 = vrot.slane %v753_v21, 4  ;;  %v714_v61 = vrot.slane %v713_v37, 2  ;;  %v760_v17 = vsel %vm150_vm0, %v109_v48, -inf  ;;  %v115_v48 = vld [vmem:[%s5702_s0 + $0x2e8] sm:$0xff] }
  0xb0   :  { %v721_v62 = vrot.slane %v720_v54, 2  ;;  %v728_v39 = vrot.slane %v727_v40, 2  ;;  %v734_v31 = vmax.f32 %v732_v9, %v733_v55  ;;  %v741_v43 = vmax.f32 %v739_v36, %v740_v38  ;;  %v1656_v58 = vld [vmem:[#allocation2 + $0x40] sm:$0xff]  ;;  %v116_v9 = vld [vmem:[%s5702_s0 + $0x2f0] sm:$0xff]  ;;  %v117_v38 = vld [vmem:[%s5702_s0 + $0x2f8] sm:$0xff] }
  0xb1   :  { %v748_v63 = vmax.f32 %v746_v50, %v747_v57  ;;  %v755_v53 = vmax.f32 %v753_v21, %v754_v60  ;;  %v715_v2 = vmax.f32 %v713_v37, %v714_v61  ;;  %v761_v7 = vrot.slane %v760_v17, 4 }
  0xb2   :  { %v722_v3 = vmax.f32 %v720_v54, %v721_v62  ;;  %v729_v6 = vmax.f32 %v727_v40, %v728_v39  ;;  %v735_v8 = vrot.slane %v734_v31, 2  ;;  %v742_v56 = vrot.slane %v741_v43, 2 }
  0xb3   :  { %v749_v13 = vrot.slane %v748_v63, 2  ;;  %v756_v45 = vrot.slane %v755_v53, 2  ;;  %v716_v14 = vrot.slane %v715_v2, 1  ;;  %v762_v16 = vmax.f32 %v760_v17, %v761_v7 }
  0xb4   :  { %v723_v47 = vrot.slane %v722_v3, 1  ;;  %v730_v15 = vrot.slane %v729_v6, 1  ;;  %v736_v5 = vmax.f32 %v734_v31, %v735_v8  ;;  %v743_v1 = vmax.f32 %v741_v43, %v742_v56 }
  0xb5   :  { %v750_v20 = vmax.f32 %v748_v63, %v749_v13  ;;  %v757_v23 = vmax.f32 %v755_v53, %v756_v45  ;;  %v1657_v25 = vld [vmem:[#allocation2 + $0x48] sm:$0xff]  ;;  %v4420_v12 = vmax.f32 %v715_v2, %v716_v14  ;;  %v763_v10 = vrot.slane %v762_v16, 2 }
  0xb6   :  { %v4422_v49 = vmax.f32 %v722_v3, %v723_v47  ;;  %v4424_v27 = vmax.f32 %v729_v6, %v730_v15  ;;  %v4426_v11 = vpack.c.bf16 %v1657_v25, %v1656_v58  ;;  %v737_v29 = vrot.slane %v736_v5, 1 }
  0xb7   :  { %v744_v30 = vrot.slane %v743_v1, 1  ;;  %v751_v32 = vrot.slane %v750_v20, 1  ;;  %v758_v0 = vrot.slane %v757_v23, 1  ;;  %v764_v4 = vmax.f32 %v762_v16, %v763_v10 }
  0xb8   :  { %v767_v59 = vsel %vm150_vm0, %v110_v18, -inf  ;;  %v774_v26 = vsel %vm150_vm0, %v111_v19, -inf  ;;  %3276 = vmatmul.msk.bf16.gmra.mxu0 %vm150_vm0, %v4426_v11  ;;  %3284 = vmatmul.msk.bf16.gmra.mxu1 %vm150_vm0, %v4426_v11  ;;  %v4443_v34 = vmax.f32 %v736_v5, %v737_v29  ;;  %v781_v51 = vsel %vm150_vm0, %v112_v52, -inf }
  0xb9   :  { %v4445_v35 = vmax.f32 %v743_v1, %v744_v30  ;;  %v4447_v42 = vmax.f32 %v750_v20, %v751_v32  ;;  %v768_v44 = vrot.slane %v767_v59, 4  ;;  %3292 = vmatmul.msk.bf16.gmra.mxu2 %vm150_vm0, %v4426_v11  ;;  %3300 = vmatmul.msk.bf16.gmra.mxu3 %vm150_vm0, %v4426_v11  ;;  %v4459_v36 = vmax.f32 %v757_v23, %v758_v0 }
  0xba   :  { %v765_v50 = vrot.slane %v764_v4, 1  ;;  %v775_v21 = vrot.slane %v774_v26, 4  ;;  %v782_v54 = vrot.slane %v781_v51, 4  ;;  %v788_v40 = vsel %vm150_vm0, %v113_v24, -inf }
  0xbb   :  { %v769_v37 = vmax.f32 %v767_v59, %v768_v44  ;;  %v795_v55 = vsel %vm150_vm0, %v114_v33, -inf  ;;  %v789_v61 = vrot.slane %v788_v40, 4  ;;  %v802_v31 = vsel %vm150_vm0, %v115_v48, -inf }
  0xbc   :  { %v4467_v57 = vmax.f32 %v764_v4, %v765_v50  ;;  %v776_v60 = vmax.f32 %v774_v26, %v775_v21  ;;  %v796_v62 = vrot.slane %v795_v55, 4  ;;  %v783_v17 = vmax.f32 %v781_v51, %v782_v54  ;;  %v118_v26 = vld [vmem:[%s5702_s0 + $0x300] sm:$0xff] }
  0xbd   :  { %v770_v39 = vrot.slane %v769_v37, 2  ;;  %v809_v43 = vsel %vm150_vm0, %v116_v9, -inf  ;;  %v790_v53 = vmax.f32 %v788_v40, %v789_v61  ;;  %v803_v3 = vrot.slane %v802_v31, 4 }
  0xbe   :  { %v777_v63 = vrot.slane %v776_v60, 2  ;;  %v797_v2 = vmax.f32 %v795_v55, %v796_v62  ;;  %v784_v7 = vrot.slane %v783_v17, 2  ;;  %v810_v8 = vrot.slane %v809_v43, 4  ;;  %v120_v62 = vld [vmem:[%s5702_s0 + $0x310] sm:$0xff] }
  0xbf   :  { %v771_v6 = vmax.f32 %v769_v37, %v770_v39  ;;  %v816_v56 = vsel %vm150_vm0, %v117_v38, -inf  ;;  %v791_v45 = vrot.slane %v790_v53, 2  ;;  %v804_v14 = vmax.f32 %v802_v31, %v803_v3  ;;  %v121_v39 = vld [vmem:[%s5702_s0 + $0x318] sm:$0xff]  ;;  %v123_v3 = vld [vmem:[%s5702_s0 + $0x328] sm:$0xff] }
  0xc0   :  { %v778_v13 = vmax.f32 %v776_v60, %v777_v63  ;;  %v798_v58 = vrot.slane %v797_v2, 2  ;;  %v785_v15 = vmax.f32 %v783_v17, %v784_v7  ;;  %v811_v16 = vmax.f32 %v809_v43, %v810_v8 }
  0xc1   :  { %v772_v47 = vrot.slane %v771_v6, 1  ;;  %v817_v18 = vrot.slane %v816_v56, 4  ;;  %v792_v5 = vmax.f32 %v790_v53, %v791_v45  ;;  %v805_v20 = vrot.slane %v804_v14, 2  ;;  %v125_v45 = vld [vmem:[%s5702_s0 + $0x338] sm:$0xff] }
  0xc2   :  { %v779_v19 = vrot.slane %v778_v13, 1  ;;  %v799_v1 = vmax.f32 %v797_v2, %v798_v58  ;;  %v786_v25 = vrot.slane %v785_v15, 1  ;;  %v812_v10 = vrot.slane %v811_v16, 2  ;;  %v122_v2 = vld [vmem:[%s5702_s0 + $0x320] sm:$0xff] }
  0xc3   :  { %v773_v23 = vmax.f32 %v771_v6, %v772_v47  ;;  %v818_v52 = vmax.f32 %v816_v56, %v817_v18  ;;  %v793_v30 = vrot.slane %v792_v5, 1  ;;  %v806_v24 = vmax.f32 %v804_v14, %v805_v20 }
  0xc4   :  { %v780_v29 = vmax.f32 %v778_v13, %v779_v19  ;;  %v800_v32 = vrot.slane %v799_v1, 1  ;;  %v787_v33 = vmax.f32 %v785_v15, %v786_v25  ;;  %v813_v0 = vmax.f32 %v811_v16, %v812_v10 }
  0xc5   :  { %v819_v4 = vrot.slane %v818_v52, 2  ;;  %v1256_v59 = vsel %vm1179_vm1, %v4422_v49, %v4420_v12  ;;  %v794_v44 = vmax.f32 %v792_v5, %v793_v30  ;;  %v807_v9 = vrot.slane %v806_v24, 1  ;;  %v119_v12 = vld [vmem:[%s5702_s0 + $0x308] sm:$0xff] }
  0xc6   :  { %v801_v48 = vmax.f32 %v799_v1, %v800_v32  ;;  %v1257_v50 = vsel %vm1181_vm2, %v4424_v27, %v1256_v59  ;;  %v814_v21 = vrot.slane %v813_v0, 1  ;;  %v1263_v54 = vsel %vm1179_vm1, %v780_v29, %v773_v23 }
  0xc7   :  { %v820_v51 = vmax.f32 %v818_v52, %v819_v4  ;;  %v1258_v37 = vsel %vm1183_vm3, %v4443_v34, %v1257_v50  ;;  %v808_v49 = vmax.f32 %v806_v24, %v807_v9  ;;  %v1264_v55 = vsel %vm1181_vm2, %v787_v33, %v1263_v54 }
  0xc8   :  { %v1259_v40 = vsel %vm1185_vm4, %v4445_v35, %v1258_v37  ;;  %v823_v38 = vsel %vm150_vm0, %v118_v26, -inf  ;;  %v815_v27 = vmax.f32 %v813_v0, %v814_v21  ;;  %v1265_v34 = vsel %vm1183_vm3, %v794_v44, %v1264_v55 }
  0xc9   :  { %v821_v60 = vrot.slane %v820_v51, 1  ;;  %v1260_v61 = vsel %vm1187_vm5, %v4447_v42, %v1259_v40  ;;  %v1266_v17 = vsel %vm1185_vm4, %v801_v48, %v1265_v34  ;;  %v824_v31 = vrot.slane %v823_v38, 4  ;;  %v127_v34 = vld [vmem:[%s5702_s0 + $0x348] sm:$0xff] }
  0xca   :  { %v1261_v35 = vsel %vm1189_vm6, %v4459_v36, %v1260_v61  ;;  %v830_v43 = vsel %vm150_vm0, %v119_v12, -inf  ;;  %v1267_v53 = vsel %vm1187_vm5, %v808_v49, %v1266_v17  ;;  %v124_v36 = vld [vmem:[%s5702_s0 + $0x330] sm:$0xff]  ;;  %v837_v8 = vsel %vm150_vm0, %v120_v62, -inf }
  0xcb   :  { %v822_v63 = vmax.f32 %v820_v51, %v821_v60  ;;  %v1262_v42 = vsel %vm1191_vm7, %v4467_v57, %v1261_v35  ;;  %v831_v6 = vrot.slane %v830_v43, 4  ;;  %v1268_v7 = vsel %vm1189_vm6, %v815_v27, %v1267_v53  ;;  %v126_v51 = vld [vmem:[%s5702_s0 + $0x340] sm:$0xff]  ;;  %v128_v62 = vld [vmem:[%s5702_s0 + $0x350] sm:$0xff] }
  0xcc   :  { %1324 = vst.msk [vmem:[#allocation2 + $0x50] sm:$0xff] %vm150_vm0, %v1262_v42  ;;  %v825_v57 = vmax.f32 %v823_v38, %v824_v31  ;;  %v844_v56 = vsel %vm150_vm0, %v121_v39, -inf  ;;  %v838_v14 = vrot.slane %v837_v8, 4  ;;  %v851_v16 = vsel %vm150_vm0, %v122_v2, -inf  ;;  %v129_v39 = vld [vmem:[%s5702_s0 + $0x358] sm:$0xff]  ;;  %v130_v2 = vld [vmem:[%s5702_s0 + $0x360] sm:$0xff] }
  0xcd   :  { %v1269_v13 = vsel %vm1191_vm7, %v822_v63, %v1268_v7  ;;  %v832_v58 = vmax.f32 %v830_v43, %v831_v6  ;;  %v845_v47 = vrot.slane %v844_v56, 4  ;;  %v858_v18 = vsel %vm150_vm0, %v123_v3, -inf }
  0xce   :  { %1325 = vst.msk [vmem:[#allocation2 + $0x58] sm:$0xff] %vm150_vm0, %v1269_v13  ;;  %v826_v15 = vrot.slane %v825_v57, 2  ;;  %v865_v19 = vsel %vm150_vm0, %v124_v36, -inf  ;;  %v839_v1 = vmax.f32 %v837_v8, %v838_v14  ;;  %v852_v23 = vrot.slane %v851_v16, 4 }
  0xcf   :  { %v833_v5 = vrot.slane %v832_v58, 2  ;;  %v846_v20 = vmax.f32 %v844_v56, %v845_v47  ;;  %v859_v10 = vrot.slane %v858_v18, 4  ;;  %v866_v52 = vrot.slane %v865_v19, 4 }
  0xd0   :  { %v827_v25 = vmax.f32 %v825_v57, %v826_v15  ;;  %v872_v29 = vsel %vm150_vm0, %v125_v45, -inf  ;;  %v840_v32 = vrot.slane %v839_v1, 2  ;;  %v853_v33 = vmax.f32 %v851_v16, %v852_v23  ;;  %v131_v57 = vld [vmem:[%s5702_s0 + $0x368] sm:$0xff]  ;;  %v132_v16 = vld [vmem:[%s5702_s0 + $0x370] sm:$0xff] }
  0xd1   :  { %v834_v30 = vmax.f32 %v832_v58, %v833_v5  ;;  %v847_v24 = vrot.slane %v846_v20, 2  ;;  %v860_v4 = vmax.f32 %v858_v18, %v859_v10  ;;  %v867_v59 = vmax.f32 %v865_v19, %v866_v52  ;;  %v133_v18 = vld [vmem:[%s5702_s0 + $0x378] sm:$0xff] }
  0xd2   :  { %v828_v0 = vrot.slane %v827_v25, 1  ;;  %v873_v26 = vrot.slane %v872_v29, 4  ;;  %v841_v9 = vmax.f32 %v839_v1, %v840_v32  ;;  %v854_v21 = vrot.slane %v853_v33, 2 }
  0xd3   :  { %v1658_v44 = vld [vmem:[#allocation2 + $0x50] sm:$0xff]  ;;  %v835_v48 = vrot.slane %v834_v30, 1  ;;  %v848_v50 = vmax.f32 %v846_v20, %v847_v24  ;;  %v861_v54 = vrot.slane %v860_v4, 2  ;;  %v868_v12 = vrot.slane %v867_v59, 2 }
  0xd4   :  { %v4531_v37 = vmax.f32 %v827_v25, %v828_v0  ;;  %v874_v49 = vmax.f32 %v872_v29, %v873_v26  ;;  %v842_v38 = vrot.slane %v841_v9, 1  ;;  %v855_v60 = vmax.f32 %v853_v33, %v854_v21 }
  0xd5   :  { %v1659_v40 = vld [vmem:[#allocation2 + $0x58] sm:$0xff]  ;;  %v4533_v55 = vmax.f32 %v834_v30, %v835_v48  ;;  %v849_v27 = vrot.slane %v848_v50, 1  ;;  %v862_v35 = vmax.f32 %v860_v4, %v861_v54  ;;  %v869_v17 = vmax.f32 %v867_v59, %v868_v12 }
  0xd6   :  { %v4535_v61 = vpack.c.bf16 %v1659_v40, %v1658_v44  ;;  %v875_v31 = vrot.slane %v874_v49, 2  ;;  %v4546_v43 = vmax.f32 %v841_v9, %v842_v38  ;;  %v856_v42 = vrot.slane %v855_v60, 1 }
  0xd7   :  { %v4548_v63 = vmax.f32 %v848_v50, %v849_v27  ;;  %v879_v53 = vsel %vm150_vm0, %v126_v51, -inf  ;;  %v863_v3 = vrot.slane %v862_v35, 1  ;;  %v870_v36 = vrot.slane %v869_v17, 1 }
  0xd8   :  { %3277 = vmatmul.msk.bf16.gmra.mxu0 %vm150_vm0, %v4535_v61  ;;  %3285 = vmatmul.msk.bf16.gmra.mxu1 %vm150_vm0, %v4535_v61  ;;  %v876_v6 = vmax.f32 %v874_v49, %v875_v31  ;;  %v880_v7 = vrot.slane %v879_v53, 4  ;;  %v4565_v8 = vmax.f32 %v855_v60, %v856_v42  ;;  %v886_v56 = vsel %vm150_vm0, %v127_v34, -inf }
  0xd9   :  { %3293 = vmatmul.msk.bf16.gmra.mxu2 %vm150_vm0, %v4535_v61  ;;  %3301 = vmatmul.msk.bf16.gmra.mxu3 %vm150_vm0, %v4535_v61  ;;  %v893_v13 = vsel %vm150_vm0, %v128_v62, -inf  ;;  %v900_v45 = vsel %vm150_vm0, %v129_v39, -inf  ;;  %v4570_v58 = vmax.f32 %v862_v35, %v863_v3  ;;  %v4572_v14 = vmax.f32 %v869_v17, %v870_v36  ;;  %v134_v36 = vld [vmem:[%s5702_s0 + $0x380] sm:$0xff] }
  0xda   :  { %v877_v47 = vrot.slane %v876_v6, 1  ;;  %v881_v15 = vmax.f32 %v879_v53, %v880_v7  ;;  %v887_v19 = vrot.slane %v886_v56, 4  ;;  %v894_v5 = vrot.slane %v893_v13, 4 }
  0xdb   :  { %v901_v1 = vrot.slane %v900_v45, 4  ;;  %v907_v20 = vsel %vm150_vm0, %v130_v2, -inf  ;;  %v914_v52 = vsel %vm150_vm0, %v131_v57, -inf  ;;  %v921_v4 = vsel %vm150_vm0, %v132_v16, -inf  ;;  %v135_v16 = vld [vmem:[%s5702_s0 + $0x388] sm:$0xff] }
  0xdc   :  { %v4581_v23 = vmax.f32 %v876_v6, %v877_v47  ;;  %v882_v25 = vrot.slane %v881_v15, 2  ;;  %v908_v10 = vrot.slane %v907_v20, 4  ;;  %v888_v29 = vmax.f32 %v886_v56, %v887_v19 }
  0xdd   :  { %v895_v30 = vmax.f32 %v893_v13, %v894_v5  ;;  %v902_v32 = vmax.f32 %v900_v45, %v901_v1  ;;  %v915_v24 = vrot.slane %v914_v52, 4  ;;  %v928_v59 = vsel %vm150_vm0, %v133_v18, -inf }
  0xde   :  { %v883_v33 = vmax.f32 %v881_v15, %v882_v25  ;;  %v909_v0 = vmax.f32 %v907_v20, %v908_v10  ;;  %v889_v26 = vrot.slane %v888_v29, 2  ;;  %v922_v51 = vrot.slane %v921_v4, 4 }
  0xdf   :  { %v896_v44 = vrot.slane %v895_v30, 2  ;;  %v903_v48 = vrot.slane %v902_v32, 2  ;;  %v916_v9 = vmax.f32 %v914_v52, %v915_v24  ;;  %v929_v54 = vrot.slane %v928_v59, 4  ;;  %v137_v52 = vld [vmem:[%s5702_s0 + $0x398] sm:$0xff] }
  0xe0   :  { %v884_v50 = vrot.slane %v883_v33, 1  ;;  %v910_v21 = vrot.slane %v909_v0, 2  ;;  %v890_v12 = vmax.f32 %v888_v29, %v889_v26  ;;  %v923_v34 = vmax.f32 %v921_v4, %v922_v51  ;;  %v138_v29 = vld [vmem:[%s5702_s0 + $0x3a0] sm:$0xff]  ;;  %v140_v26 = vld [vmem:[%s5702_s0 + $0x3b0] sm:$0xff]  ;;  %v141_v51 = vld [vmem:[%s5702_s0 + $0x3b8] sm:$0xff] }
  0xe1   :  { %v897_v49 = vmax.f32 %v895_v30, %v896_v44  ;;  %v904_v40 = vmax.f32 %v902_v32, %v903_v48  ;;  %v917_v38 = vrot.slane %v916_v9, 2  ;;  %v930_v62 = vmax.f32 %v928_v59, %v929_v54  ;;  %v139_v59 = vld [vmem:[%s5702_s0 + $0x3a8] sm:$0xff] }
  0xe2   :  { %v885_v27 = vmax.f32 %v883_v33, %v884_v50  ;;  %v911_v60 = vmax.f32 %v909_v0, %v910_v21  ;;  %v891_v39 = vrot.slane %v890_v12, 1  ;;  %v924_v53 = vrot.slane %v923_v34, 2 }
  0xe3   :  { %v898_v35 = vrot.slane %v897_v49, 1  ;;  %v905_v17 = vrot.slane %v904_v40, 1  ;;  %v918_v31 = vmax.f32 %v916_v9, %v917_v38  ;;  %v931_v2 = vrot.slane %v930_v62, 2 }
  0xe4   :  { %v912_v42 = vrot.slane %v911_v60, 1  ;;  %v1270_v3 = vsel %vm1179_vm1, %v4533_v55, %v4531_v37  ;;  %v892_v6 = vmax.f32 %v890_v12, %v891_v39  ;;  %v925_v45 = vmax.f32 %v923_v34, %v924_v53 }
  0xe5   :  { %v899_v7 = vmax.f32 %v897_v49, %v898_v35  ;;  %v906_v57 = vmax.f32 %v904_v40, %v905_v17  ;;  %v919_v56 = vrot.slane %v918_v31, 1  ;;  %v932_v47 = vmax.f32 %v930_v62, %v931_v2 }
  0xe6   :  { %v913_v13 = vmax.f32 %v911_v60, %v912_v42  ;;  %v1271_v15 = vsel %vm1181_vm2, %v4546_v43, %v1270_v3  ;;  %v1277_v55 = vsel %vm1179_vm1, %v892_v6, %v885_v27  ;;  %v935_v19 = vsel %vm150_vm0, %v134_v36, -inf }
  0xe7   :  { %v920_v18 = vmax.f32 %v918_v31, %v919_v56  ;;  %v1272_v37 = vsel %vm1183_vm3, %v4548_v63, %v1271_v15  ;;  %v926_v5 = vrot.slane %v925_v45, 1  ;;  %v933_v1 = vrot.slane %v932_v47, 1  ;;  %v136_v63 = vld [vmem:[%s5702_s0 + $0x390] sm:$0xff] }
  0xe8   :  { %v1273_v20 = vsel %vm1185_vm4, %v4565_v8, %v1272_v37  ;;  %v1278_v25 = vsel %vm1181_vm2, %v899_v7, %v1277_v55  ;;  %v936_v8 = vrot.slane %v935_v19, 4  ;;  %v942_v30 = vsel %vm150_vm0, %v135_v16, -inf  ;;  %v142_v7 = vld [vmem:[%s5702_s0 + $0x3c0] sm:$0xff] }
  0xe9   :  { %v1274_v43 = vsel %vm1187_vm5, %v4570_v58, %v1273_v20  ;;  %v1279_v10 = vsel %vm1183_vm3, %v906_v57, %v1278_v25  ;;  %v927_v32 = vmax.f32 %v925_v45, %v926_v5  ;;  %v934_v24 = vmax.f32 %v932_v47, %v933_v1  ;;  %v143_v20 = vld [vmem:[%s5702_s0 + $0x3c8] sm:$0xff] }
  0xea   :  { %v1275_v58 = vsel %vm1189_vm6, %v4572_v14, %v1274_v43  ;;  %v1280_v33 = vsel %vm1185_vm4, %v913_v13, %v1279_v10  ;;  %v937_v44 = vmax.f32 %v935_v19, %v936_v8  ;;  %v943_v48 = vrot.slane %v942_v30, 4 }
  0xeb   :  { %v1276_v0 = vsel %vm1191_vm7, %v4581_v23, %v1275_v58  ;;  %v1281_v4 = vsel %vm1187_vm5, %v920_v18, %v1280_v33  ;;  %v949_v14 = vsel %vm150_vm0, %v136_v63, -inf  ;;  %v956_v23 = vsel %vm150_vm0, %v137_v52, -inf  ;;  %v146_v58 = vld [vmem:[%s5702_s0 + $0x3e0] sm:$0xff] }
  0xec   :  { %v1282_v9 = vsel %vm1189_vm6, %v927_v32, %v1281_v4  ;;  %1326 = vst.msk [vmem:[#allocation2 + $0x60] sm:$0xff] %vm150_vm0, %v1276_v0  ;;  %v963_v50 = vsel %vm150_vm0, %v138_v29, -inf  ;;  %v938_v54 = vrot.slane %v937_v44, 2  ;;  %v944_v12 = vmax.f32 %v942_v30, %v943_v48  ;;  %v144_v32 = vld [vmem:[%s5702_s0 + $0x3d0] sm:$0xff] }
  0xed   :  { %v1283_v21 = vsel %vm1191_vm7, %v934_v24, %v1282_v9  ;;  %v950_v49 = vrot.slane %v949_v14, 4  ;;  %v957_v40 = vrot.slane %v956_v23, 4  ;;  %v964_v38 = vrot.slane %v963_v50, 4  ;;  %v145_v24 = vld [vmem:[%s5702_s0 + $0x3d8] sm:$0xff] }
  0xee   :  { %1327 = vst.msk [vmem:[#allocation2 + $0x68] sm:$0xff] %vm150_vm0, %v1283_v21  ;;  %v970_v27 = vsel %vm150_vm0, %v139_v59, -inf  ;;  %v977_v60 = vsel %vm150_vm0, %v140_v26, -inf  ;;  %v939_v34 = vmax.f32 %v937_v44, %v938_v54  ;;  %v945_v62 = vrot.slane %v944_v12, 2 }
  0xef   :  { %v951_v39 = vmax.f32 %v949_v14, %v950_v49  ;;  %v971_v35 = vrot.slane %v970_v27, 4  ;;  %v958_v17 = vmax.f32 %v956_v23, %v957_v40  ;;  %v965_v31 = vmax.f32 %v963_v50, %v964_v38  ;;  %v147_v14 = vld [vmem:[%s5702_s0 + $0x3e8] sm:$0xff]  ;;  %v148_v23 = vld [vmem:[%s5702_s0 + $0x3f0] sm:$0xff] }
  0xf0   :  { %v978_v42 = vrot.slane %v977_v60, 4  ;;  %v984_v53 = vsel %vm150_vm0, %v141_v51, -inf  ;;  %v940_v2 = vrot.slane %v939_v34, 1  ;;  %v946_v3 = vmax.f32 %v944_v12, %v945_v62 }
  0xf1   :  { %v952_v36 = vrot.slane %v951_v39, 2  ;;  %v972_v6 = vmax.f32 %v970_v27, %v971_v35  ;;  %v959_v57 = vrot.slane %v958_v17, 2  ;;  %v966_v56 = vrot.slane %v965_v31, 2 }
  0xf2   :  { %v979_v13 = vmax.f32 %v977_v60, %v978_v42  ;;  %v985_v45 = vrot.slane %v984_v53, 4  ;;  %v947_v15 = vrot.slane %v946_v3, 1  ;;  %v4648_v25 = vmax.f32 %v939_v34, %v940_v2 }
  0xf3   :  { %v1660_v47 = vld [vmem:[#allocation2 + $0x60] sm:$0xff]  ;;  %v953_v16 = vmax.f32 %v951_v39, %v952_v36  ;;  %v973_v18 = vrot.slane %v972_v6, 2  ;;  %v960_v37 = vmax.f32 %v958_v17, %v959_v57  ;;  %v967_v55 = vmax.f32 %v965_v31, %v966_v56  ;;  %v149_v39 = vld [vmem:[%s5702_s0 + $0x3f8] sm:$0xff] }
  0xf4   :  { %v980_v19 = vrot.slane %v979_v13, 2  ;;  %v986_v5 = vmax.f32 %v984_v53, %v985_v45  ;;  %v991_v63 = vsel %vm150_vm0, %v142_v7, -inf  ;;  %v948_v33 = vmax.f32 %v946_v3, %v947_v15 }
  0xf5   :  { %v1661_v1 = vld [vmem:[#allocation2 + $0x68] sm:$0xff]  ;;  %v954_v43 = vrot.slane %v953_v16, 1  ;;  %v974_v10 = vmax.f32 %v972_v6, %v973_v18  ;;  %v961_v29 = vrot.slane %v960_v37, 1  ;;  %v968_v8 = vrot.slane %v967_v55, 1 }
  0xf6   :  { %v4651_v52 = vpack.c.bf16 %v1661_v1, %v1660_v47  ;;  %v981_v30 = vmax.f32 %v979_v13, %v980_v19  ;;  %v987_v4 = vrot.slane %v986_v5, 2  ;;  %v992_v59 = vrot.slane %v991_v63, 4 }
  0xf7   :  { %v975_v0 = vrot.slane %v974_v10, 1  ;;  %v955_v26 = vmax.f32 %v953_v16, %v954_v43  ;;  %v4666_v44 = vmax.f32 %v960_v37, %v961_v29  ;;  %v998_v9 = vsel %vm150_vm0, %v143_v20, -inf }
  0xf8   :  { %3278 = vmatmul.msk.bf16.gmra.mxu0 %vm150_vm0, %v4651_v52  ;;  %3286 = vmatmul.msk.bf16.gmra.mxu1 %vm150_vm0, %v4651_v52  ;;  %v982_v48 = vrot.slane %v981_v30, 1  ;;  %v4679_v50 = vmax.f32 %v967_v55, %v968_v8  ;;  %v988_v21 = vmax.f32 %v986_v5, %v987_v4  ;;  %v993_v51 = vmax.f32 %v991_v63, %v992_v59 }
  0xf9   :  { %3294 = vmatmul.msk.bf16.gmra.mxu2 %vm150_vm0, %v4651_v52  ;;  %3302 = vmatmul.msk.bf16.gmra.mxu3 %vm150_vm0, %v4651_v52  ;;  %v999_v54 = vrot.slane %v998_v9, 4  ;;  %v4681_v12 = vmax.f32 %v974_v10, %v975_v0  ;;  %v1005_v49 = vsel %vm150_vm0, %v144_v32, -inf  ;;  %v1012_v40 = vsel %vm150_vm0, %v145_v24, -inf }
  0xfa   :  { %v1019_v38 = vsel %vm150_vm0, %v146_v58, -inf  ;;  %v4686_v27 = vmax.f32 %v981_v30, %v982_v48  ;;  %v994_v60 = vrot.slane %v993_v51, 2  ;;  %v1006_v62 = vrot.slane %v1005_v49, 4 }
  0xfb   :  { %v1000_v34 = vmax.f32 %v998_v9, %v999_v54  ;;  %v1013_v35 = vrot.slane %v1012_v40, 4  ;;  %v1020_v17 = vrot.slane %v1019_v38, 4  ;;  %v1026_v31 = vsel %vm150_vm0, %v147_v14, -inf }
  0xfc   :  { %v1033_v42 = vsel %vm150_vm0, %v148_v23, -inf  ;;  %v989_v53 = vrot.slane %v988_v21, 1  ;;  %v995_v2 = vmax.f32 %v993_v51, %v994_v60  ;;  %v1007_v36 = vmax.f32 %v1005_v49, %v1006_v62 }
  0xfd   :  { %v1001_v3 = vrot.slane %v1000_v34, 2  ;;  %v1014_v6 = vmax.f32 %v1012_v40, %v1013_v35  ;;  %v1021_v7 = vmax.f32 %v1019_v38, %v1020_v17  ;;  %v1027_v57 = vrot.slane %v1026_v31, 4 }
  0xfe   :  { %v1034_v56 = vrot.slane %v1033_v42, 4  ;;  %v996_v13 = vrot.slane %v995_v2, 1  ;;  %v1008_v47 = vrot.slane %v1007_v36, 2  ;;  %v1040_v15 = vsel %vm150_vm0, %v149_v39, -inf }
  0xff   :  { %v1002_v45 = vmax.f32 %v1000_v34, %v1001_v3  ;;  %v1015_v16 = vrot.slane %v1014_v6, 2  ;;  %v1022_v18 = vrot.slane %v1021_v7, 2  ;;  %v1028_v37 = vmax.f32 %v1026_v31, %v1027_v57  ;;  %v3623_v3 = vld [vmem:[%s5705_s3 + $0x78] sm:$0xff] }
 0x100   :  { %v1035_v55 = vmax.f32 %v1033_v42, %v1034_v56  ;;  %v997_v19 = vmax.f32 %v995_v2, %v996_v13  ;;  %v1009_v1 = vmax.f32 %v1007_v36, %v1008_v47  ;;  %v1041_v20 = vrot.slane %v1040_v15, 4  ;;  %v4709_v42 = vpop.f32.mrf.mxu1  ;;  %2831 = vmatpush.bf16.msra.mxu1 %v3623_v3  ;;  %v4733_v56 = vpop.f32.mrf.mxu3  ;;  %v3634_v3 = vld [vmem:[%s5705_s3 + $0xd0] sm:$0xff] }
 0x101   :  { %v1003_v5 = vrot.slane %v1002_v45, 1  ;;  %v1016_v43 = vmax.f32 %v1014_v6, %v1015_v16  ;;  %v1023_v10 = vmax.f32 %v1021_v7, %v1022_v18  ;;  %v1029_v63 = vrot.slane %v1028_v37, 2  ;;  %v3630_v18 = vld [vmem:[%s5705_s3 + $0xb0] sm:$0xff] }
 0x102   :  { %v1036_v29 = vrot.slane %v1035_v55, 2  ;;  %v1010_v30 = vrot.slane %v1009_v1, 1  ;;  %v1042_v32 = vmax.f32 %v1040_v15, %v1041_v20  ;;  %v1284_v24 = vsel %vm1179_vm1, %v948_v33, %v4648_v25 }
 0x103   :  { %v1004_v8 = vmax.f32 %v1002_v45, %v1003_v5  ;;  %v1017_v58 = vrot.slane %v1016_v43, 1  ;;  %v1024_v0 = vrot.slane %v1023_v10, 1  ;;  %v1030_v4 = vmax.f32 %v1028_v37, %v1029_v63  ;;  %v3614_v37 = vld [vmem:[%s5705_s3 + $0x30] sm:$0xff] }
 0x104   :  { %v1037_v59 = vmax.f32 %v1035_v55, %v1036_v29  ;;  %v1011_v48 = vmax.f32 %v1009_v1, %v1010_v30  ;;  %v1043_v9 = vrot.slane %v1042_v32, 2  ;;  %v1285_v14 = vsel %vm1181_vm2, %v955_v26, %v1284_v24  ;;  %v3638_v55 = vld [vmem:[%s5705_s3 + $0xf0] sm:$0xff]  ;;  %v3629_v30 = vld [vmem:[%s5705_s3 + $0xa8] sm:$0xff] }
 0x105   :  { %v1291_v23 = vsel %vm1179_vm1, %v1004_v8, %v997_v19  ;;  %v1018_v51 = vmax.f32 %v1016_v43, %v1017_v58  ;;  %v1025_v54 = vmax.f32 %v1023_v10, %v1024_v0  ;;  %v1031_v49 = vrot.slane %v1030_v4, 1  ;;  %v3622_v1 = vld [vmem:[%s5705_s3 + $0x70] sm:$0xff]  ;;  %v3637_v24 = vld [vmem:[%s5705_s3 + $0xe8] sm:$0xff] }
 0x106   :  { %v1038_v40 = vrot.slane %v1037_v59, 1  ;;  %v990_v38 = vmax.f32 %v988_v21, %v989_v53  ;;  %v1044_v60 = vmax.f32 %v1042_v32, %v1043_v9  ;;  %v1286_v34 = vsel %vm1183_vm3, %v4666_v44, %v1285_v14  ;;  %v4707_v21 = vpop.f32.mrf.mxu0  ;;  %v3631_v44 = vld [vmem:[%s5705_s3 + $0xb8] sm:$0xff]  ;;  %2832 = vmatpush.bf16.msra.mxu1 %v3622_v1  ;;  %v3613_v32 = vld [vmem:[%s5705_s3 + $0x28] sm:$0xff]  ;;  %v3628_v14 = vld [vmem:[%s5705_s3 + $0xa0] sm:$0xff] }
 0x107   :  { %v1292_v25 = vsel %vm1181_vm2, %v1011_v48, %v1291_v23  ;;  %v1032_v33 = vmax.f32 %v1030_v4, %v1031_v49  ;;  %v1287_v39 = vsel %vm1185_vm4, %v4679_v50, %v1286_v34  ;;  %v3615_v50 = vld [vmem:[%s5705_s3 + $0x38] sm:$0xff]  ;;  %2880 = vmatpush.bf16.msra.mxu2 %v3631_v44  ;;  %v3621_v58 = vld [vmem:[%s5705_s3 + $0x68] sm:$0xff]  ;;  %v3612_v23 = vld [vmem:[%s5705_s3 + $0x20] sm:$0xff] }
 0x108   :  { %v1039_v62 = vmax.f32 %v1037_v59, %v1038_v40  ;;  %v1293_v26 = vsel %vm1183_vm3, %v1018_v51, %v1292_v25  ;;  %v1045_v35 = vrot.slane %v1044_v60, 1  ;;  %v1288_v17 = vsel %vm1187_vm5, %v4681_v12, %v1287_v39  ;;  %v3639_v53 = vld [vmem:[%s5705_s3 + $0xf8] sm:$0xff]  ;;  %2782 = vmatpush.bf16.msra.mxu0 %v3615_v50  ;;  %v4737_v47 = vpop.f32.mrf.mxu1  ;;  %v4760_v5 = vpop.f32.mrf.mxu3  ;;  %v3636_v51 = vld [vmem:[%s5705_s3 + $0xe0] sm:$0xff] }
 0x109   :  { %v1294_v31 = vsel %vm1185_vm4, %v1025_v54, %v1293_v26  ;;  %v1289_v12 = vsel %vm1189_vm6, %v4686_v27, %v1288_v17  ;;  %2929 = vmatpush.bf16.msra.mxu3 %v3639_v53  ;;  %v4731_v27 = vpop.f32.mrf.mxu2  ;;  %v3620_v54 = vld [vmem:[%s5705_s3 + $0x60] sm:$0xff]  ;;  %v3627_v25 = vld [vmem:[%s5705_s3 + $0x98] sm:$0xff] }
 0x10a   :  { %v1295_v2 = vsel %vm1187_vm5, %v1032_v33, %v1294_v31  ;;  %v1046_v36 = vmax.f32 %v1044_v60, %v1045_v35  ;;  %v1290_v6 = vsel %vm1191_vm7, %v990_v38, %v1289_v12  ;;  %2833 = vmatpush.bf16.msra.mxu1 %v3621_v58  ;;  %v3611_v33 = vld [vmem:[%s5705_s3 + $0x18] sm:$0xff]  ;;  %v3626_v12 = vld [vmem:[%s5705_s3 + $0x90] sm:$0xff] }
 0x10b   :  { %v1296_v7 = vsel %vm1189_vm6, %v1039_v62, %v1295_v2  ;;  %1328 = vst.msk [vmem:[#allocation2 + $0x70] sm:$0xff] %vm150_vm0, %v1290_v6  ;;  %2881 = vmatpush.bf16.msra.mxu2 %v3630_v18  ;;  %v3635_v62 = vld [vmem:[%s5705_s3 + $0xd8] sm:$0xff]  ;;  %v3610_v2 = vld [vmem:[%s5705_s3 + $0x10] sm:$0xff]  ;;  %v3633_v18 = vld [vmem:[%s5705_s3 + $0xc8] sm:$0xff] }
 0x10c   :  { %v1297_v57 = vsel %vm1191_vm7, %v1046_v36, %v1296_v7  ;;  %2783 = vmatpush.bf16.msra.mxu0 %v3614_v37  ;;  %v3619_v39 = vld [vmem:[%s5705_s3 + $0x58] sm:$0xff] }
 0x10d   :  { %1329 = vst.msk [vmem:[#allocation2 + $0x78] sm:$0xff] %vm150_vm0, %v1297_v57  ;;  %2930 = vmatpush.bf16.msra.mxu3 %v3638_v55 }
 0x10e   :  { %v4735_v45 = vpop.f32.mrf.mxu0  ;;  %2834 = vmatpush.bf16.msra.mxu1 %v3620_v54  ;;  %v3632_v54 = vld [vmem:[%s5705_s3 + $0xc0] sm:$0xff] }
 0x10f   :  { %2882 = vmatpush.bf16.msra.mxu2 %v3629_v30 }
 0x110   :  { %v4767_v43 = vpop.f32.mrf.mxu1  ;;  %v4771_v63 = vpop.f32.mrf.mxu3  ;;  %2784 = vmatpush.bf16.msra.mxu0 %v3613_v32 }
 0x111   :  { %v4758_v19 = vpop.f32.mrf.mxu2  ;;  %2931 = vmatpush.bf16.msra.mxu3 %v3637_v24 }
 0x112   :  { %v1662_v13 = vld [vmem:[#allocation2 + $0x70] sm:$0xff]  ;;  %2835 = vmatpush.bf16.msra.mxu1 %v3619_v39 }
 0x113   :  { %2883 = vmatpush.bf16.msra.mxu2 %v3628_v14 }
 0x114   :  { %v1663_v15 = vld [vmem:[#allocation2 + $0x78] sm:$0xff]  ;;  %2785 = vmatpush.bf16.msra.mxu0 %v3612_v23  ;;  %v3624_v23 = vld [vmem:[%s5705_s3 + $0x80] sm:$0xff] }
 0x115   :  { %v4739_v16 = vpack.c.bf16 %v1663_v15, %v1662_v13  ;;  %2932 = vmatpush.bf16.msra.mxu3 %v3636_v51  ;;  %v3625_v13 = vld [vmem:[%s5705_s3 + $0x88] sm:$0xff]  ;;  %v3608_v51 = vld [vmem:[%s5705_s3] sm:$0xff] }
 0x116   :  { %v4765_v20 = vpop.f32.mrf.mxu0  ;;  %v3609_v15 = vld [vmem:[%s5705_s3 + $0x8] sm:$0xff] }
 0x117   :  { %3279 = vmatmul.msk.bf16.gmra.mxu0 %vm150_vm0, %v4739_v16  ;;  %3287 = vmatmul.msk.bf16.gmra.mxu1 %vm150_vm0, %v4739_v16 }
 0x118   :  { %3295 = vmatmul.msk.bf16.gmra.mxu2 %vm150_vm0, %v4739_v16  ;;  %3303 = vmatmul.msk.bf16.gmra.mxu3 %vm150_vm0, %v4739_v16  ;;  %v4775_v8 = vpop.f32.mrf.mxu1  ;;  %v4799_v0 = vpop.f32.mrf.mxu3 }
 0x119   :  { %v4769_v10 = vpop.f32.mrf.mxu2  ;;  %2884 = vmatpush.bf16.msra.mxu2 %v3627_v25  ;;  %2786 = vmatpush.bf16.msra.mxu0 %v3611_v33  ;;  %v3616_v25 = vld [vmem:[%s5705_s3 + $0x40] sm:$0xff] }
 0x11a   :  { %2933 = vmatpush.bf16.msra.mxu3 %v3635_v62 }
 0x11d   :  { %2885 = vmatpush.bf16.msra.mxu2 %v3626_v12  ;;  %2787 = vmatpush.bf16.msra.mxu0 %v3610_v2 }
 0x11e   :  { %v4773_v29 = vpop.f32.mrf.mxu0  ;;  %2934 = vmatpush.bf16.msra.mxu3 %v3634_v3  ;;  %v3663_v3 = vld [vmem:[%s5705_s3 + $0x1b8] sm:$0xff] }
 0x120   :  { %v4803_v59 = vpop.f32.mrf.mxu1  ;;  %v4811_v9 = vpop.f32.mrf.mxu3 }
 0x121   :  { %2886 = vmatpush.bf16.msra.mxu2 %v3625_v13  ;;  %2788 = vmatpush.bf16.msra.mxu0 %v3609_v15  ;;  %v3671_v13 = vld [vmem:[%s5705_s3 + $0x1f8] sm:$0xff] }
 0x122   :  { %2935 = vmatpush.bf16.msra.mxu3 %v3633_v18 }
 0x125   :  { %2887 = vmatpush.bf16.msra.mxu2 %v3624_v23  ;;  %2789 = vmatpush.bf16.msra.mxu0 %v3608_v51 }
 0x126   :  { %v4801_v4 = vpop.f32.mrf.mxu0  ;;  %2936 = vmatpush.bf16.msra.mxu3 %v3632_v54 }
 0x127   :  { %3304 = vmatmul.msk.bf16.vlgmr.msrb.gmra.mxu0 %vm150_vm0, %v3955_v46  ;;  %3312 = vmatmul.msk.bf16.vlgmr.msrb.gmra.mxu1 %vm150_vm0, %v3955_v46 }
 0x128   :  { %3320 = vmatmul.msk.bf16.vlgmr.msrb.gmra.mxu2 %vm150_vm0, %v3955_v46  ;;  %3328 = vmatmul.msk.bf16.vlgmr.msrb.gmra.mxu3 %vm150_vm0, %v3955_v46  ;;  %v4797_v46 = vpop.f32.mrf.mxu2  ;;  %v4831_v40 = vpop.f32.mrf.mxu1 }
 0x129   :  { %v4835_v38 = vpop.f32.mrf.mxu3  ;;  %3076 = vmatpush.bf16.msrb.mxu2 %v3663_v3  ;;  %v3662_v3 = vld [vmem:[%s5705_s3 + $0x1b0] sm:$0xff] }
 0x12a   :  { %3125 = vmatpush.bf16.msrb.mxu3 %v3671_v13  ;;  %v3670_v13 = vld [vmem:[%s5705_s3 + $0x1f0] sm:$0xff] }
 0x12d   :  { %3077 = vmatpush.bf16.msrb.mxu2 %v3662_v3 }
 0x12e   :  { %v4829_v49 = vpop.f32.mrf.mxu0  ;;  %3126 = vmatpush.bf16.msrb.mxu3 %v3670_v13 }
 0x130   :  { %v4809_v48 = vpop.f32.mrf.mxu2  ;;  %v4839_v34 = vpop.f32.mrf.mxu1 }
 0x136   :  { %v4837_v60 = vpop.f32.mrf.mxu0 }
 0x137   :  { %3305 = vmatmul.msk.bf16.gmra.mxu0 %vm150_vm0, %v4071_v22  ;;  %3313 = vmatmul.msk.bf16.gmra.mxu1 %vm150_vm0, %v4071_v22 }
 0x138   :  { %3321 = vmatmul.msk.bf16.gmra.mxu2 %vm150_vm0, %v4071_v22  ;;  %3329 = vmatmul.msk.bf16.gmra.mxu3 %vm150_vm0, %v4071_v22  ;;  %v4833_v22 = vpop.f32.mrf.mxu2  ;;  %v4867_v17 = vpop.f32.mrf.mxu1 }
 0x13e   :  { %v4865_v35 = vpop.f32.mrf.mxu0 }
 0x140   :  { %v4861_v26 = vpop.f32.mrf.mxu2  ;;  %v4883_v53 = vpop.f32.mrf.mxu1 }
 0x146   :  { %v4881_v50 = vpop.f32.mrf.mxu0 }
 0x147   :  { %3306 = vmatmul.msk.bf16.gmra.mxu0 %vm150_vm0, %v4188_v28  ;;  %3314 = vmatmul.msk.bf16.gmra.mxu1 %vm150_vm0, %v4188_v28 }
 0x148   :  { %3322 = vmatmul.msk.bf16.gmra.mxu2 %vm150_vm0, %v4188_v28  ;;  %3330 = vmatmul.msk.bf16.gmra.mxu3 %vm150_vm0, %v4188_v28  ;;  %v4863_v28 = vpop.f32.mrf.mxu3  ;;  %v4869_v31 = vpop.f32.mrf.mxu2 }
 0x149   :  { %v4903_v57 = vpop.f32.mrf.mxu1 }
 0x14e   :  { %v4901_v7 = vpop.f32.mrf.mxu0 }
 0x150   :  { %v4871_v44 = vpop.f32.mrf.mxu3  ;;  %v4897_v36 = vpop.f32.mrf.mxu2 }
 0x155   :  { %v4931_v30 = vpop.f32.mrf.mxu1 }
 0x156   :  { %v4929_v1 = vpop.f32.mrf.mxu0  ;;  %5728 = vst [vmem:[#allocation7_spill] sm:$0xff] %v4931_v30 }
 0x157   :  { %3307 = vmatmul.msk.bf16.gmra.mxu0 %vm150_vm0, %v4295_v41  ;;  %3315 = vmatmul.msk.bf16.gmra.mxu1 %vm150_vm0, %v4295_v41  ;;  %5727 = vst [vmem:[#allocation6_spill] sm:$0xff] %v4929_v1 }
 0x158   :  { %3323 = vmatmul.msk.bf16.gmra.mxu2 %vm150_vm0, %v4295_v41  ;;  %3331 = vmatmul.msk.bf16.gmra.mxu3 %vm150_vm0, %v4295_v41  ;;  %v3618_v41 = vld [vmem:[%s5705_s3 + $0x50] sm:$0xff]  ;;  %v4899_v6 = vpop.f32.mrf.mxu3  ;;  %v4922_v37 = vpop.f32.mrf.mxu2 }
 0x159   :  { %2836 = vmatpush.bf16.msra.mxu1 %v3618_v41  ;;  %v3647_v41 = vld [vmem:[%s5705_s3 + $0x138] sm:$0xff] }
 0x15a   :  { %2978 = vmatpush.bf16.msrb.mxu0 %v3647_v41  ;;  %v3646_v41 = vld [vmem:[%s5705_s3 + $0x130] sm:$0xff] }
 0x15d   :  { %v4939_v14 = vpop.f32.mrf.mxu1 }
 0x15e   :  { %v4937_v58 = vpop.f32.mrf.mxu0  ;;  %2979 = vmatpush.bf16.msrb.mxu0 %v3646_v41 }
 0x160   :  { %v4924_v55 = vpop.f32.mrf.mxu3  ;;  %v4933_v32 = vpop.f32.mrf.mxu2 }
 0x161   :  { %5729 = vst [vmem:[#allocation8_spill] sm:$0xff] %v4933_v32 }
 0x167   :  { %3308 = vmatmul.msk.bf16.gmra.mxu0 %vm150_vm0, %v4426_v11  ;;  %3316 = vmatmul.msk.bf16.gmra.mxu1 %vm150_vm0, %v4426_v11 }
 0x168   :  { %3324 = vmatmul.msk.bf16.gmra.mxu2 %vm150_vm0, %v4426_v11  ;;  %3332 = vmatmul.msk.bf16.gmra.mxu3 %vm150_vm0, %v4426_v11  ;;  %v3617_v11 = vld [vmem:[%s5705_s3 + $0x48] sm:$0xff]  ;;  %v4935_v24 = vpop.f32.mrf.mxu3 }
 0x169   :  { %2837 = vmatpush.bf16.msra.mxu1 %v3617_v11  ;;  %5730 = vst [vmem:[#allocation9_spill] sm:$0xff] %v4935_v24 }
 0x16d   :  { %2838 = vmatpush.bf16.msra.mxu1 %v3616_v25  ;;  %v5004_v25 = vld [vmem:[%s5704_s2] sm:$0xff]  ;;  %s3196_s2 = sshll.u32 %s5707_s5, 4  ;;  %s3197_s2 = int_to_ptr.hbm [resolvable:$true] %s3196_s2 }
 0x16e   :  { %v5045_v13 = vperm.slane %v5004_v25, 2 }
 0x170   :  { %v4963_v33 = vpop.f32.mrf.mxu3 }
 0x175   :  { %v4965_v62 = vpop.f32.mrf.mxu0  ;;  %v4967_v39 = vpop.f32.mrf.mxu1 }
 0x176   :  { %5731 = vst [vmem:[#allocation10_spill] sm:$0xff] %v4965_v62 }
 0x177   :  { %3309 = vmatmul.msk.bf16.gmra.mxu0 %vm150_vm0, %v4535_v61  ;;  %3317 = vmatmul.msk.bf16.gmra.mxu1 %vm150_vm0, %v4535_v61  ;;  %5732 = vst [vmem:[#allocation11_spill] sm:$0xff] %v4967_v39 }
 0x178   :  { %3325 = vmatmul.msk.bf16.gmra.mxu2 %vm150_vm0, %v4535_v61  ;;  %3333 = vmatmul.msk.bf16.gmra.mxu3 %vm150_vm0, %v4535_v61  ;;  %v4961_v61 = vpop.f32.mrf.mxu2 }
 0x17c   :  { %v4975_v2 = vpop.f32.mrf.mxu3 }
 0x17d   :  { %5734 = vst [vmem:[#allocation13_spill] sm:$0xff] %v4975_v2  ;;  %v4990_v15 = vpop.f32.mrf.mxu0  ;;  %v4992_v18 = vpop.f32.mrf.mxu1  ;;  %v5027_v2 = vperm.slane %v5004_v25, 1 }
 0x17e   :  { %5735 = vst [vmem:[#allocation14_spill] sm:$0xff] %v4990_v15  ;;  %v5048_v15 = vperm.slane %v5004_v25, 3 }
 0x17f   :  { %5736 = vst [vmem:[#allocation15_spill] sm:$0xff] %v4992_v18 }
 0x180   :  { %v4973_v12 = vpop.f32.mrf.mxu2  ;;  %v1969_v24 = vadd.f32 %v4760_v5, %v5048_v15 }
 0x181   :  { %5733 = vst [vmem:[#allocation12_spill] sm:$0xff] %v4973_v12 }
 0x184   :  { %v4999_v23 = vpop.f32.mrf.mxu3 }
 0x185   :  { %5738 = vst [vmem:[#allocation17_spill] sm:$0xff] %v4999_v23  ;;  %v3654_v23 = vld [vmem:[%s5705_s3 + $0x170] sm:$0xff] }
 0x187   :  { %3310 = vmatmul.msk.bf16.gmra.mxu0 %vm150_vm0, %v4651_v52  ;;  %3318 = vmatmul.msk.bf16.gmra.mxu1 %vm150_vm0, %v4651_v52 }
 0x188   :  { %3326 = vmatmul.msk.bf16.gmra.mxu2 %vm150_vm0, %v4651_v52  ;;  %3334 = vmatmul.msk.bf16.gmra.mxu3 %vm150_vm0, %v4651_v52  ;;  %v3655_v52 = vld [vmem:[%s5705_s3 + $0x178] sm:$0xff]  ;;  %v4997_v11 = vpop.f32.mrf.mxu2 }
 0x189   :  { %3027 = vmatpush.bf16.msrb.mxu1 %v3655_v52  ;;  %5737 = vst [vmem:[#allocation16_spill] sm:$0xff] %v4997_v11  ;;  %v5024_v52 = vperm.slane %v5004_v25, 0 }
 0x18b   :  { %v1820_v32 = vadd.f32 %v4707_v21, %v5024_v52 }
 0x18d   :  { %3028 = vmatpush.bf16.msrb.mxu1 %v3654_v23  ;;  %v1920_v23 = vadd.f32 %v4758_v19, %v5045_v13 }
 0x194   :  { %v1854_v51 = vpop.f32.mrf.mxu0  ;;  %v1903_v54 = vpop.f32.mrf.mxu1 }
 0x195   :  { %v5033_v11 = vadd.f32 %v1854_v51, %v5024_v52  ;;  %v5036_v3 = vadd.f32 %v1903_v54, %v5027_v2  ;;  %v1869_v51 = vadd.f32 %v4709_v42, %v5027_v2  ;;  %v1918_v54 = vadd.f32 %v4731_v27, %v5045_v13 }
 0x197   :  { %3311 = vmatmul.msk.bf16.gmra.mxu0 %vm150_vm0, %v4739_v16  ;;  %3319 = vmatmul.msk.bf16.gmra.mxu1 %vm150_vm0, %v4739_v16  ;;  %5739 = vst [vmem:[#allocation18_spill] sm:$0xff] %v5033_v11  ;;  %v2204_v30 = vpack.c.bf16 %v1920_v23, %v1918_v54 }
 0x198   :  { %3327 = vmatmul.msk.bf16.gmra.mxu2 %vm150_vm0, %v4739_v16  ;;  %3335 = vmatmul.msk.bf16.gmra.mxu3 %vm150_vm0, %v4739_v16  ;;  %5740 = vst [vmem:[#allocation19_spill] sm:$0xff] %v5036_v3 }
 0x19b   :  { %v1952_v16 = vpop.f32.mrf.mxu2  ;;  %v2001_v12 = vpop.f32.mrf.mxu3 }
 0x19c   :  { %v1856_v39 = vpop.f32.mrf.mxu0  ;;  %v1905_v62 = vpop.f32.mrf.mxu1  ;;  %v5074_v19 = vadd.f32 %v2001_v12, %v5048_v15  ;;  %v3661_v12 = vld [vmem:[%s5705_s3 + $0x1a8] sm:$0xff] }
 0x19d   :  { %v5039_v41 = vadd.f32 %v1856_v39, %v5024_v52  ;;  %v5042_v18 = vadd.f32 %v1905_v62, %v5027_v2  ;;  %v1822_v39 = vadd.f32 %v4735_v45, %v5024_v52  ;;  %v1871_v62 = vadd.f32 %v4737_v47, %v5027_v2  ;;  %3078 = vmatpush.bf16.msrb.mxu2 %v3661_v12 }
 0x19e   :  { %v1967_v45 = vadd.f32 %v4733_v56, %v5048_v15  ;;  %v1874_v12 = vadd.f32 %v4767_v43, %v5027_v2 }
 0x19f   :  { %5741 = vst [vmem:[#allocation20_spill] sm:$0xff] %v5039_v41  ;;  %v2202_v27 = vpack.c.bf16 %v1822_v39, %v1820_v32  ;;  %v2203_v41 = vpack.c.bf16 %v1871_v62, %v1869_v51  ;;  %v3645_v32 = vld [vmem:[%s5705_s3 + $0x128] sm:$0xff]  ;;  %v5099_v51 = vperm.slane %v5004_v25, 5 }
 0x1a0   :  { %5742 = vst [vmem:[#allocation21_spill] sm:$0xff] %v5042_v18  ;;  %v5071_v18 = vadd.f32 %v1952_v16, %v5045_v13  ;;  %v2205_v56 = vpack.c.bf16 %v1969_v24, %v1967_v45  ;;  %v3669_v24 = vld [vmem:[%s5705_s3 + $0x1e8] sm:$0xff]  ;;  %2980 = vmatpush.bf16.msrb.mxu0 %v3645_v32  ;;  %v5121_v32 = vperm.slane %v5004_v25, 6 }
 0x1a1   :  { %3127 = vmatpush.bf16.msrb.mxu3 %v3669_v24  ;;  %v3653_v62 = vld [vmem:[%s5705_s3 + $0x168] sm:$0xff]  ;;  %v1876_v24 = vadd.f32 %v4775_v8, %v5027_v2 }
 0x1a2   :  { %3029 = vmatpush.bf16.msrb.mxu1 %v3653_v62  ;;  %v1825_v62 = vadd.f32 %v4765_v20, %v5024_v52 }
 0x1a3   :  { %v1954_v3 = vpop.f32.mrf.mxu2  ;;  %v2003_v47 = vpop.f32.mrf.mxu3 }
 0x1a4   :  { %v5077_v5 = vadd.f32 %v1954_v3, %v5045_v13  ;;  %v5080_v21 = vadd.f32 %v2003_v47, %v5048_v15  ;;  %v2015_v42 = vpop.f32.mrf.mxu0  ;;  %v2064_v11 = vpop.f32.mrf.mxu1  ;;  %v5096_v3 = vperm.slane %v5004_v25, 4 }
 0x1a5   :  { %v5108_v45 = vadd.f32 %v2064_v11, %v5099_v51  ;;  %v1827_v11 = vadd.f32 %v4773_v29, %v5024_v52  ;;  %v1972_v29 = vadd.f32 %v4771_v63, %v5048_v15 }
 0x1a6   :  { %v5105_v23 = vadd.f32 %v2015_v42, %v5096_v3  ;;  %v5124_v42 = vperm.slane %v5004_v25, 7  ;;  %v1923_v25 = vadd.f32 %v4769_v10, %v5045_v13 }
 0x1a7   :  { %2790 = vmatmul.bf16.vlgmr.msra.gmra.mxu0 %v2202_v27  ;;  %2839 = vmatmul.bf16.vlgmr.msra.gmra.mxu1 %v2203_v41  ;;  %5744 = vst [vmem:[#allocation23_spill] sm:$0xff] %v5108_v45  ;;  %v2210_v10 = vpack.c.bf16 %v1827_v11, %v1825_v62  ;;  %v2211_v45 = vpack.c.bf16 %v1876_v24, %v1874_v12  ;;  %v3668_v12 = vld [vmem:[%s5705_s3 + $0x1e0] sm:$0xff] }
 0x1a8   :  { %2888 = vmatmul.bf16.vlgmr.msra.gmra.mxu2 %v2204_v30  ;;  %2937 = vmatmul.bf16.vlgmr.msra.gmra.mxu3 %v2205_v56  ;;  %5743 = vst [vmem:[#allocation22_spill] sm:$0xff] %v5105_v23 }
 0x1a9   :  { %3128 = vmatpush.bf16.msrb.mxu3 %v3668_v12  ;;  %v1879_v12 = vadd.f32 %v4803_v59, %v5027_v2 }
 0x1ab   :  { %v2113_v30 = vpop.f32.mrf.mxu2  ;;  %v2162_v41 = vpop.f32.mrf.mxu3 }
 0x1ac   :  { %v2017_v54 = vpop.f32.mrf.mxu0  ;;  %v2066_v39 = vpop.f32.mrf.mxu1  ;;  %v5143_v16 = vadd.f32 %v2113_v30, %v5121_v32 }
 0x1ad   :  { %v5111_v47 = vadd.f32 %v2017_v54, %v5096_v3  ;;  %v5114_v27 = vadd.f32 %v2066_v39, %v5099_v51  ;;  %v1925_v54 = vadd.f32 %v4797_v46, %v5045_v13  ;;  %v1974_v39 = vadd.f32 %v4799_v0, %v5048_v15 }
 0x1ae   :  { %v5146_v46 = vadd.f32 %v2162_v41, %v5124_v42  ;;  %v3660_v41 = vld [vmem:[%s5705_s3 + $0x1a0] sm:$0xff] }
 0x1af   :  { %5745 = vst [vmem:[#allocation24_spill] sm:$0xff] %v5114_v27  ;;  %v2212_v27 = vpack.c.bf16 %v1925_v54, %v1923_v25  ;;  %v2213_v63 = vpack.c.bf16 %v1974_v39, %v1972_v29  ;;  %3079 = vmatpush.bf16.msrb.mxu2 %v3660_v41  ;;  %v3652_v54 = vld [vmem:[%s5705_s3 + $0x160] sm:$0xff]  ;;  %v1979_v41 = vadd.f32 %v4835_v38, %v5048_v15 }
 0x1b0   :  { %3030 = vmatpush.bf16.msrb.mxu1 %v3652_v54 }
 0x1b3   :  { %v2115_v56 = vpop.f32.mrf.mxu2  ;;  %v2164_v8 = vpop.f32.mrf.mxu3 }
 0x1b4   :  { %v5149_v0 = vadd.f32 %v2115_v56, %v5121_v32  ;;  %v5152_v20 = vadd.f32 %v2164_v8, %v5124_v42  ;;  %v2020_v43 = vpop.f32.mrf.mxu0  ;;  %v2069_v1 = vpop.f32.mrf.mxu1  ;;  %v3644_v56 = vld [vmem:[%s5705_s3 + $0x120] sm:$0xff] }
 0x1b5   :  { %2981 = vmatpush.bf16.msrb.mxu0 %v3644_v56  ;;  %v5171_v39 = vadd.f32 %v2020_v43, %v5096_v3  ;;  %v5174_v62 = vadd.f32 %v2069_v1, %v5099_v51  ;;  %v1832_v43 = vadd.f32 %v4829_v49, %v5024_v52  ;;  %v1881_v1 = vadd.f32 %v4831_v40, %v5027_v2 }
 0x1b6   :  { %v1830_v56 = vadd.f32 %v4801_v4, %v5024_v52  ;;  %v1977_v49 = vadd.f32 %v4811_v9, %v5048_v15 }
 0x1b7   :  { %2795 = vmatmul.bf16.gmra.mxu0 %v2210_v10  ;;  %2844 = vmatmul.bf16.gmra.mxu1 %v2211_v45  ;;  %v2219_v8 = vpack.c.bf16 %v1881_v1, %v1879_v12  ;;  %v3667_v1 = vld [vmem:[%s5705_s3 + $0x1d8] sm:$0xff] }
 0x1b8   :  { %2893 = vmatmul.bf16.gmra.mxu2 %v2212_v27  ;;  %2942 = vmatmul.bf16.gmra.mxu3 %v2213_v63  ;;  %v1930_v63 = vadd.f32 %v4833_v22, %v5045_v13  ;;  %v2221_v9 = vpack.c.bf16 %v1979_v41, %v1977_v49 }
 0x1b9   :  { %3129 = vmatpush.bf16.msrb.mxu3 %v3667_v1  ;;  %v1884_v1 = vadd.f32 %v4839_v34, %v5027_v2 }
 0x1bb   :  { %v2118_v11 = vpop.f32.mrf.mxu2  ;;  %v2167_v24 = vpop.f32.mrf.mxu3 }
 0x1bc   :  { %v2022_v45 = vpop.f32.mrf.mxu0  ;;  %v2071_v27 = vpop.f32.mrf.mxu1  ;;  %v5203_v54 = vadd.f32 %v2118_v11, %v5121_v32  ;;  %v5206_v22 = vadd.f32 %v2167_v24, %v5124_v42  ;;  %v3659_v24 = vld [vmem:[%s5705_s3 + $0x198] sm:$0xff] }
 0x1bd   :  { %v5177_v25 = vadd.f32 %v2022_v45, %v5096_v3  ;;  %v5180_v29 = vadd.f32 %v2071_v27, %v5099_v51  ;;  %v1928_v45 = vadd.f32 %v4809_v48, %v5045_v13  ;;  %v2218_v48 = vpack.c.bf16 %v1832_v43, %v1830_v56  ;;  %v3643_v43 = vld [vmem:[%s5705_s3 + $0x118] sm:$0xff]  ;;  %3080 = vmatpush.bf16.msrb.mxu2 %v3659_v24 }
 0x1be   :  { %2982 = vmatpush.bf16.msrb.mxu0 %v3643_v43  ;;  %v3651_v56 = vld [vmem:[%s5705_s3 + $0x158] sm:$0xff]  ;;  %v1984_v24 = vadd.f32 %v4871_v44, %v5048_v15  ;;  %v1835_v43 = vadd.f32 %v4837_v60, %v5024_v52 }
 0x1bf   :  { %v2220_v30 = vpack.c.bf16 %v1930_v63, %v1928_v45  ;;  %3031 = vmatpush.bf16.msrb.mxu1 %v3651_v56 }
 0x1c3   :  { %v2120_v27 = vpop.f32.mrf.mxu2  ;;  %v2169_v40 = vpop.f32.mrf.mxu3 }
 0x1c4   :  { %v5209_v38 = vadd.f32 %v2120_v27, %v5121_v32  ;;  %v5212_v4 = vadd.f32 %v2169_v40, %v5124_v42  ;;  %v2025_v59 = vpop.f32.mrf.mxu0  ;;  %v2074_v10 = vpop.f32.mrf.mxu1 }
 0x1c5   :  { %v5231_v12 = vadd.f32 %v2025_v59, %v5096_v3  ;;  %v5234_v45 = vadd.f32 %v2074_v10, %v5099_v51  ;;  %v1837_v59 = vadd.f32 %v4865_v35, %v5024_v52  ;;  %v1886_v10 = vadd.f32 %v4867_v17, %v5027_v2 }
 0x1c6   :  { %v1982_v35 = vadd.f32 %v4863_v28, %v5048_v15 }
 0x1c7   :  { %2800 = vmatmul.bf16.gmra.mxu0 %v2218_v48  ;;  %2849 = vmatmul.bf16.gmra.mxu1 %v2219_v8  ;;  %v2227_v40 = vpack.c.bf16 %v1886_v10, %v1884_v1  ;;  %v3666_v10 = vld [vmem:[%s5705_s3 + $0x1d0] sm:$0xff] }
 0x1c8   :  { %2898 = vmatmul.bf16.gmra.mxu2 %v2220_v30  ;;  %2947 = vmatmul.bf16.gmra.mxu3 %v2221_v9  ;;  %v1935_v9 = vadd.f32 %v4869_v31, %v5045_v13  ;;  %v2229_v28 = vpack.c.bf16 %v1984_v24, %v1982_v35 }
 0x1c9   :  { %3130 = vmatpush.bf16.msrb.mxu3 %v3666_v10  ;;  %v1889_v10 = vadd.f32 %v4883_v53, %v5027_v2 }
 0x1cb   :  { %v2123_v63 = vpop.f32.mrf.mxu2  ;;  %v2172_v41 = vpop.f32.mrf.mxu3 }
 0x1cc   :  { %v2027_v8 = vpop.f32.mrf.mxu0  ;;  %v2076_v30 = vpop.f32.mrf.mxu1  ;;  %v5263_v56 = vadd.f32 %v2123_v63, %v5121_v32  ;;  %v5266_v31 = vadd.f32 %v2172_v41, %v5124_v42  ;;  %v3658_v41 = vld [vmem:[%s5705_s3 + $0x190] sm:$0xff] }
 0x1cd   :  { %v5237_v49 = vadd.f32 %v2027_v8, %v5096_v3  ;;  %v5240_v27 = vadd.f32 %v2076_v30, %v5099_v51  ;;  %v1933_v8 = vadd.f32 %v4861_v26, %v5045_v13  ;;  %v2226_v26 = vpack.c.bf16 %v1837_v59, %v1835_v43  ;;  %v3642_v59 = vld [vmem:[%s5705_s3 + $0x110] sm:$0xff]  ;;  %3081 = vmatpush.bf16.msrb.mxu2 %v3658_v41 }
 0x1ce   :  { %2983 = vmatpush.bf16.msrb.mxu0 %v3642_v59  ;;  %v3650_v43 = vld [vmem:[%s5705_s3 + $0x150] sm:$0xff]  ;;  %v1989_v41 = vadd.f32 %v4924_v55, %v5048_v15  ;;  %v1840_v59 = vadd.f32 %v4881_v50, %v5024_v52 }
 0x1cf   :  { %v2228_v11 = vpack.c.bf16 %v1935_v9, %v1933_v8  ;;  %3032 = vmatpush.bf16.msrb.mxu1 %v3650_v43 }
 0x1d3   :  { %v2125_v30 = vpop.f32.mrf.mxu2  ;;  %v2174_v17 = vpop.f32.mrf.mxu3 }
 0x1d4   :  { %v5269_v44 = vadd.f32 %v2125_v30, %v5121_v32  ;;  %v5272_v60 = vadd.f32 %v2174_v17, %v5124_v42  ;;  %v2030_v34 = vpop.f32.mrf.mxu0  ;;  %v2079_v48 = vpop.f32.mrf.mxu1 }
 0x1d5   :  { %v5291_v1 = vadd.f32 %v2030_v34, %v5096_v3  ;;  %v5294_v8 = vadd.f32 %v2079_v48, %v5099_v51  ;;  %v1842_v34 = vadd.f32 %v4901_v7, %v5024_v52  ;;  %v1891_v48 = vadd.f32 %v4903_v57, %v5027_v2 }
 0x1d6   :  { %v1987_v7 = vadd.f32 %v4899_v6, %v5048_v15 }
 0x1d7   :  { %2805 = vmatmul.bf16.gmra.mxu0 %v2226_v26  ;;  %2854 = vmatmul.bf16.gmra.mxu1 %v2227_v40  ;;  %v2235_v17 = vpack.c.bf16 %v1891_v48, %v1889_v10  ;;  %v3665_v48 = vld [vmem:[%s5705_s3 + $0x1c8] sm:$0xff] }
 0x1d8   :  { %2903 = vmatmul.bf16.gmra.mxu2 %v2228_v11  ;;  %2952 = vmatmul.bf16.gmra.mxu3 %v2229_v28  ;;  %v1940_v28 = vadd.f32 %v4922_v37, %v5045_v13  ;;  %v2237_v6 = vpack.c.bf16 %v1989_v41, %v1987_v7 }
 0x1d9   :  { %3131 = vmatpush.bf16.msrb.mxu3 %v3665_v48 }
 0x1db   :  { %v2128_v9 = vpop.f32.mrf.mxu2  ;;  %v2177_v24 = vpop.f32.mrf.mxu3 }
 0x1dc   :  { %v2032_v40 = vpop.f32.mrf.mxu0  ;;  %v2081_v11 = vpop.f32.mrf.mxu1  ;;  %v5323_v43 = vadd.f32 %v2128_v9, %v5121_v32  ;;  %v5326_v37 = vadd.f32 %v2177_v24, %v5124_v42  ;;  %v3657_v24 = vld [vmem:[%s5705_s3 + $0x188] sm:$0xff] }
 0x1dd   :  { %v5297_v35 = vadd.f32 %v2032_v40, %v5096_v3  ;;  %v5300_v30 = vadd.f32 %v2081_v11, %v5099_v51  ;;  %v1938_v40 = vadd.f32 %v4897_v36, %v5045_v13  ;;  %v2234_v36 = vpack.c.bf16 %v1842_v34, %v1840_v59  ;;  %v3641_v34 = vld [vmem:[%s5705_s3 + $0x108] sm:$0xff]  ;;  %3082 = vmatpush.bf16.msrb.mxu2 %v3657_v24 }
 0x1de   :  { %2984 = vmatpush.bf16.msrb.mxu0 %v3641_v34  ;;  %v3649_v59 = vld [vmem:[%s5705_s3 + $0x148] sm:$0xff]  ;;  %v1994_v24 = vadd.f32 %v4963_v33, %v5048_v15  ;;  %v5750_v34 = vld [vmem:[#allocation6_spill] sm:$0xff] }
 0x1df   :  { %v2236_v63 = vpack.c.bf16 %v1940_v28, %v1938_v40  ;;  %3033 = vmatpush.bf16.msrb.mxu1 %v3649_v59  ;;  %v1845_v48 = vadd.f32 %v5750_v34, %v5024_v52  ;;  %v5752_v59 = vld [vmem:[#allocation8_spill] sm:$0xff] }
 0x1e3   :  { %v2130_v11 = vpop.f32.mrf.mxu2  ;;  %v2179_v57 = vpop.f32.mrf.mxu3 }
 0x1e4   :  { %v5329_v55 = vadd.f32 %v2130_v11, %v5121_v32  ;;  %v5332_v50 = vadd.f32 %v2179_v57, %v5124_v42  ;;  %v2035_v53 = vpop.f32.mrf.mxu0  ;;  %v2084_v26 = vpop.f32.mrf.mxu1 }
 0x1e5   :  { %v5351_v10 = vadd.f32 %v2035_v53, %v5096_v3  ;;  %v5354_v40 = vadd.f32 %v2084_v26, %v5099_v51  ;;  %v1847_v53 = vadd.f32 %v4937_v58, %v5024_v52  ;;  %v1896_v26 = vadd.f32 %v4939_v14, %v5027_v2  ;;  %v5753_v58 = vld [vmem:[#allocation9_spill] sm:$0xff] }
 0x1e6   :  { %v1992_v57 = vadd.f32 %v5753_v58, %v5048_v15 }
 0x1e7   :  { %2810 = vmatmul.bf16.gmra.mxu0 %v2234_v36  ;;  %2859 = vmatmul.bf16.gmra.mxu1 %v2235_v17  ;;  %5746 = vst [vmem:[#allocation25_spill] sm:$0xff] %v5351_v10  ;;  %v1943_v36 = vadd.f32 %v5752_v59, %v5045_v13  ;;  %v2242_v59 = vpack.c.bf16 %v1847_v53, %v1845_v48 }
 0x1e8   :  { %2908 = vmatmul.bf16.gmra.mxu2 %v2236_v63  ;;  %2957 = vmatmul.bf16.gmra.mxu3 %v2237_v6  ;;  %5747 = vst [vmem:[#allocation26_spill] sm:$0xff] %v5354_v40  ;;  %v1945_v6 = vadd.f32 %v4961_v61, %v5045_v13  ;;  %v2245_v58 = vpack.c.bf16 %v1994_v24, %v1992_v57  ;;  %v3664_v57 = vld [vmem:[%s5705_s3 + $0x1c0] sm:$0xff] }
 0x1e9   :  { %3132 = vmatpush.bf16.msrb.mxu3 %v3664_v57 }
 0x1ea   :  { %v2244_v10 = vpack.c.bf16 %v1945_v6, %v1943_v36 }
 0x1eb   :  { %v2133_v28 = vpop.f32.mrf.mxu2  ;;  %v2182_v41 = vpop.f32.mrf.mxu3 }
 0x1ec   :  { %v2037_v17 = vpop.f32.mrf.mxu0  ;;  %v2086_v63 = vpop.f32.mrf.mxu1  ;;  %v5383_v23 = vadd.f32 %v2133_v28, %v5121_v32  ;;  %v5386_v61 = vadd.f32 %v2182_v41, %v5124_v42  ;;  %v3640_v41 = vld [vmem:[%s5705_s3 + $0x100] sm:$0xff] }
 0x1ed   :  { %v5357_v7 = vadd.f32 %v2037_v17, %v5096_v3  ;;  %v5360_v11 = vadd.f32 %v2086_v63, %v5099_v51  ;;  %v5751_v17 = vld [vmem:[#allocation7_spill] sm:$0xff]  ;;  %2985 = vmatpush.bf16.msrb.mxu0 %v3640_v41  ;;  %v5762_v41 = vld [vmem:[#allocation16_spill] sm:$0xff] }
 0x1ee   :  { %v1894_v63 = vadd.f32 %v5751_v17, %v5027_v2  ;;  %5754 = vst [vmem:[#allocation6_spill] sm:$0xff] %v5386_v61  ;;  %v1950_v57 = vadd.f32 %v5762_v41, %v5045_v13 }
 0x1ef   :  { %5748 = vst [vmem:[#allocation27_spill] sm:$0xff] %v5357_v7 }
 0x1f0   :  { %5749 = vst [vmem:[#allocation28_spill] sm:$0xff] %v5360_v11  ;;  %v2243_v11 = vpack.c.bf16 %v1896_v26, %v1894_v63  ;;  %v3648_v26 = vld [vmem:[%s5705_s3 + $0x140] sm:$0xff] }
 0x1f1   :  { %3034 = vmatpush.bf16.msrb.mxu1 %v3648_v26  ;;  %v5764_v26 = vld [vmem:[#allocation10_spill] sm:$0xff] }
 0x1f2   :  { %v1850_v28 = vadd.f32 %v5764_v26, %v5024_v52 }
 0x1f3   :  { %v2135_v9 = vpop.f32.mrf.mxu2  ;;  %v2184_v14 = vpop.f32.mrf.mxu3 }
 0x1f4   :  { %v5389_v33 = vadd.f32 %v2135_v9, %v5121_v32  ;;  %v5392_v34 = vadd.f32 %v2184_v14, %v5124_v42  ;;  %v2040_v17 = vpop.f32.mrf.mxu0  ;;  %v2089_v40 = vpop.f32.mrf.mxu1  ;;  %v3656_v9 = vld [vmem:[%s5705_s3 + $0x180] sm:$0xff]  ;;  %v5765_v14 = vld [vmem:[#allocation11_spill] sm:$0xff] }
 0x1f5   :  { %3083 = vmatpush.bf16.msrb.mxu2 %v3656_v9  ;;  %v5411_v6 = vadd.f32 %v2040_v17, %v5096_v3  ;;  %v5414_v24 = vadd.f32 %v2089_v40, %v5099_v51  ;;  %v5761_v9 = vld [vmem:[#allocation15_spill] sm:$0xff]  ;;  %v1899_v7 = vadd.f32 %v5765_v14, %v5027_v2 }
 0x1f6   :  { %5755 = vst [vmem:[#allocation7_spill] sm:$0xff] %v5392_v34  ;;  %v1901_v40 = vadd.f32 %v5761_v9, %v5027_v2 }
 0x1f7   :  { %2815 = vmatmul.bf16.gmra.mxu0 %v2242_v59  ;;  %2864 = vmatmul.bf16.gmra.mxu1 %v2243_v11  ;;  %5756 = vst [vmem:[#allocation8_spill] sm:$0xff] %v5411_v6  ;;  %v5766_v59 = vld [vmem:[#allocation12_spill] sm:$0xff] }
 0x1f8   :  { %2913 = vmatmul.bf16.gmra.mxu2 %v2244_v10  ;;  %2962 = vmatmul.bf16.gmra.mxu3 %v2245_v58  ;;  %5757 = vst [vmem:[#allocation9_spill] sm:$0xff] %v5414_v24  ;;  %v5760_v58 = vld [vmem:[#allocation14_spill] sm:$0xff]  ;;  %v1948_v24 = vadd.f32 %v5766_v59, %v5045_v13  ;;  %v2251_v59 = vpack.c.bf16 %v1901_v40, %v1899_v7 }
 0x1f9   :  { %v1852_v17 = vadd.f32 %v5760_v58, %v5024_v52  ;;  %v5767_v58 = vld [vmem:[#allocation13_spill] sm:$0xff] }
 0x1fa   :  { %v2252_v26 = vpack.c.bf16 %v1950_v57, %v1948_v24 }
 0x1fb   :  { %v2138_v36 = vpop.f32.mrf.mxu2  ;;  %v2187_v53 = vpop.f32.mrf.mxu3  ;;  %v2250_v13 = vpack.c.bf16 %v1852_v17, %v1850_v28 }
 0x1fc   :  { %v2042_v11 = vpop.f32.mrf.mxu0  ;;  %v2091_v10 = vpop.f32.mrf.mxu1  ;;  %v5446_v41 = vadd.f32 %v2187_v53, %v5124_v42 }
 0x1fd   :  { %v5417_v48 = vadd.f32 %v2042_v11, %v5096_v3  ;;  %v5420_v63 = vadd.f32 %v2091_v10, %v5099_v51  ;;  %v5763_v11 = vld [vmem:[#allocation17_spill] sm:$0xff] }
 0x1fe   :  { %v1999_v10 = vadd.f32 %v5763_v11, %v5048_v15 }
 0x1ff   :  { %5758 = vst [vmem:[#allocation29_spill] sm:$0xff] %v5417_v48  ;;  %v5443_v48 = vadd.f32 %v2138_v36, %v5121_v32 }
 0x200   :  { %5759 = vst [vmem:[#allocation30_spill] sm:$0xff] %v5420_v63  ;;  %v1997_v63 = vadd.f32 %v5767_v58, %v5048_v15 }
 0x202   :  { %v2253_v15 = vpack.c.bf16 %v1999_v10, %v1997_v63  ;;  %v5774_v63 = vld [vmem:[#allocation19_spill] sm:$0xff] }
 0x203   :  { %v2140_v6 = vpop.f32.mrf.mxu2  ;;  %v2189_v9 = vpop.f32.mrf.mxu3 }
 0x204   :  { %v5449_v11 = vadd.f32 %v2140_v6, %v5121_v32  ;;  %v5452_v52 = vadd.f32 %v2189_v9, %v5124_v42  ;;  %v2045_v2 = vpop.f32.mrf.mxu0  ;;  %v2094_v14 = vpop.f32.mrf.mxu1 }
 0x205   :  { %v5459_v34 = vadd.f32 %v2045_v2, %v5096_v3  ;;  %v5462_v7 = vadd.f32 %v2094_v14, %v5099_v51 }
 0x207   :  { %2820 = vmatmul.bf16.gmra.mxu0 %v2250_v13  ;;  %2869 = vmatmul.bf16.gmra.mxu1 %v2251_v59 }
 0x208   :  { %2918 = vmatmul.bf16.gmra.mxu2 %v2252_v26  ;;  %2967 = vmatmul.bf16.gmra.mxu3 %v2253_v15 }
 0x20b   :  { %v2143_v53 = vpop.f32.mrf.mxu2  ;;  %v2192_v6 = vpop.f32.mrf.mxu3 }
 0x20c   :  { %v2047_v9 = vpop.f32.mrf.mxu0  ;;  %v2096_v61 = vpop.f32.mrf.mxu1  ;;  %v5475_v10 = vadd.f32 %v2143_v53, %v5121_v32  ;;  %v5478_v2 = vadd.f32 %v2192_v6, %v5124_v42  ;;  %v5771_v53 = vld [vmem:[#allocation18_spill] sm:$0xff]  ;;  %v5773_v6 = vld [vmem:[#allocation21_spill] sm:$0xff] }
 0x20d   :  { %v5465_v28 = vadd.f32 %v2047_v9, %v5096_v3  ;;  %v5468_v24 = vadd.f32 %v2096_v61, %v5099_v51  ;;  %v5770_v9 = vld [vmem:[#allocation20_spill] sm:$0xff]  ;;  %v5775_v36 = vpack.c.bf16 %v5773_v6, %v5774_v63 }
 0x20e   :  { %5768 = vst [vmem:[#allocation14_spill] sm:$0xff] %v5475_v10  ;;  %v5772_v17 = vpack.c.bf16 %v5770_v9, %v5771_v53 }
 0x20f   :  { %5769 = vst [vmem:[#allocation15_spill] sm:$0xff] %v5478_v2 }
 0x213   :  { %v2145_v40 = vpop.f32.mrf.mxu2  ;;  %v2194_v57 = vpop.f32.mrf.mxu3 }
 0x214   :  { %v5481_v14 = vadd.f32 %v2145_v40, %v5121_v32  ;;  %v5484_v61 = vadd.f32 %v2194_v57, %v5124_v42  ;;  %v2050_v13 = vpop.f32.mrf.mxu0  ;;  %v2099_v59 = vpop.f32.mrf.mxu1  ;;  %v5776_v40 = vpack.c.bf16 %v5077_v5, %v5071_v18  ;;  %v5777_v57 = vpack.c.bf16 %v5080_v21, %v5074_v19  ;;  %v5521_v21 = vld [vmem:[%s5706_s4] ss:$0 sm:$0xff]  ;;  %s3702_s4 = smov [#allocation3]  }
 0x215   :  { %v5503_v2 = vadd.f32 %v2050_v13, %v5096_v3  ;;  %s3194_s28 = sshll.u32 %s3702_s4, 4  ;;  %s3195_s28 = int_to_ptr.vmem [resolvable:$true] %s3194_s28 }
 0x217   :  { %2825 = vmatmul.bf16.gmra.mxu0 %v5772_v17  ;;  %2874 = vmatmul.bf16.gmra.mxu1 %v5775_v36  ;;  %v5506_v17 = vadd.f32 %v2099_v59, %v5099_v51 }
 0x218   :  { %2923 = vmatmul.bf16.gmra.mxu2 %v5776_v40  ;;  %2972 = vmatmul.bf16.gmra.mxu3 %v5777_v57 }
 0x21b   :  { %v2148_v26 = vpop.f32.mrf.mxu2  ;;  %v2197_v58 = vpop.f32.mrf.mxu3 }
 0x21c   :  { %v2052_v10 = vpop.f32.mrf.mxu0  ;;  %v2101_v15 = vpop.f32.mrf.mxu1  ;;  %v5524_v59 = vadd.f32 %v2148_v26, %v5121_v32 }
 0x21d   :  { %v5509_v36 = vadd.f32 %v2052_v10, %v5096_v3  ;;  %v5512_v18 = vadd.f32 %v2101_v15, %v5099_v51  ;;  %v5527_v3 = vadd.f32 %v2197_v58, %v5124_v42  ;;  %v5778_v58 = vld [vmem:[#allocation22_spill] sm:$0xff] }
 0x21e   :  { %v5779_v57 = vpack.c.bf16 %v5111_v47, %v5778_v58 }
 0x223   :  { %v2150_v63 = vpop.f32.mrf.mxu2  ;;  %v2199_v13 = vpop.f32.mrf.mxu3 }
 0x224   :  { %v5530_v51 = vadd.f32 %v2150_v63, %v5121_v32  ;;  %v5533_v10 = vadd.f32 %v2199_v13, %v5124_v42  ;;  %v2791_v15 = vpop.f32.mrf.mxu0  ;;  %v2840_v9 = vpop.f32.mrf.mxu1  ;;  %v5780_v32 = vld [vmem:[#allocation24_spill] sm:$0xff]  ;;  %v5781_v63 = vld [vmem:[#allocation23_spill] sm:$0xff]  ;;  %v5783_v42 = vpack.c.bf16 %v5149_v0, %v5143_v16  ;;  %v5784_v13 = vpack.c.bf16 %v5152_v20, %v5146_v46 }
 0x225   :  { %v2792_v53 = vadd.f32 %v5521_v21, %v2791_v15  ;;  %v5782_v5 = vpack.c.bf16 %v5780_v32, %v5781_v63  ;;  %v5785_v20 = vpack.c.bf16 %v5177_v25, %v5171_v39 }
 0x227   :  { %v2841_v40 = vadd.f32 %v2840_v9, %v2792_v53  ;;  %2986 = vmatmul.bf16.vlgmr.msrb.gmra.mxu0 %v5779_v57  ;;  %3035 = vmatmul.bf16.vlgmr.msrb.gmra.mxu1 %v5782_v5 }
 0x228   :  { %3084 = vmatmul.bf16.vlgmr.msrb.gmra.mxu2 %v5783_v42  ;;  %3133 = vmatmul.bf16.vlgmr.msrb.gmra.mxu3 %v5784_v13 }
 0x22b   :  { %v2889_v15 = vpop.f32.mrf.mxu2  ;;  %v2938_v6 = vpop.f32.mrf.mxu3 }
 0x22c   :  { %v2890_v26 = vadd.f32 %v2889_v15, %v2841_v40  ;;  %v2793_v9 = vpop.f32.mrf.mxu0  ;;  %v2842_v53 = vpop.f32.mrf.mxu1  ;;  %v5786_v40 = vpack.c.bf16 %v5180_v29, %v5174_v62 }
 0x22d   :  { %v2794_v47 = vadd.f32 %v5521_v21, %v2793_v9 }
 0x22e   :  { %v5553_v58 = vadd.f32 %v2938_v6, %v2890_v26  ;;  %v5787_v6 = vpack.c.bf16 %v5209_v38, %v5203_v54  ;;  %v5788_v26 = vpack.c.bf16 %v5212_v4, %v5206_v22  ;;  %v5789_v4 = vpack.c.bf16 %v5237_v49, %v5231_v12 }
 0x22f   :  { %v2843_v57 = vadd.f32 %v2842_v53, %v2794_v47 }
 0x233   :  { %v2891_v32 = vpop.f32.mrf.mxu2  ;;  %v2940_v5 = vpop.f32.mrf.mxu3 }
 0x234   :  { %v2892_v63 = vadd.f32 %v2891_v32, %v2843_v57  ;;  %v2796_v19 = vpop.f32.mrf.mxu0  ;;  %v2845_v16 = vpop.f32.mrf.mxu1 }
 0x235   :  { %v2797_v0 = vadd.f32 %v5521_v21, %v2796_v19 }
 0x236   :  { %v5556_v42 = vadd.f32 %v2940_v5, %v2892_v63  ;;  %v5790_v63 = vpack.c.bf16 %v5240_v27, %v5234_v45 }
 0x237   :  { %v2846_v46 = vadd.f32 %v2845_v16, %v2797_v0  ;;  %2991 = vmatmul.bf16.gmra.mxu0 %v5785_v20  ;;  %3040 = vmatmul.bf16.gmra.mxu1 %v5786_v40  ;;  %v5791_v16 = vpack.c.bf16 %v5269_v44, %v5263_v56  ;;  %v5792_v0 = vpack.c.bf16 %v5272_v60, %v5266_v31 }
 0x238   :  { %3089 = vmatmul.bf16.gmra.mxu2 %v5787_v6  ;;  %3138 = vmatmul.bf16.gmra.mxu3 %v5788_v26  ;;  %v5793_v60 = vpack.c.bf16 %v5297_v35, %v5291_v1 }
 0x23b   :  { %v2894_v19 = vpop.f32.mrf.mxu2  ;;  %v2943_v13 = vpop.f32.mrf.mxu3 }
 0x23c   :  { %v2895_v15 = vadd.f32 %v2894_v19, %v2846_v46  ;;  %v2798_v9 = vpop.f32.mrf.mxu0  ;;  %v2847_v53 = vpop.f32.mrf.mxu1 }
 0x23d   :  { %v2799_v39 = vadd.f32 %v5521_v21, %v2798_v9 }
 0x23e   :  { %v5571_v25 = vadd.f32 %v2943_v13, %v2895_v15 }
 0x23f   :  { %v2848_v47 = vadd.f32 %v2847_v53, %v2799_v39  ;;  %v5794_v53 = vpack.c.bf16 %v5300_v30, %v5294_v8  ;;  %v5795_v39 = vpack.c.bf16 %v5329_v55, %v5323_v43 }
 0x243   :  { %v2896_v62 = vpop.f32.mrf.mxu2  ;;  %v2945_v29 = vpop.f32.mrf.mxu3 }
 0x244   :  { %v2897_v57 = vadd.f32 %v2896_v62, %v2848_v47  ;;  %v2801_v32 = vpop.f32.mrf.mxu0  ;;  %v2850_v54 = vpop.f32.mrf.mxu1  ;;  %v5796_v47 = vpack.c.bf16 %v5332_v50, %v5326_v37  ;;  %v5797_v50 = vld [vmem:[#allocation27_spill] sm:$0xff] }
 0x245   :  { %v2802_v38 = vadd.f32 %v5521_v21, %v2801_v32 }
 0x246   :  { %v5574_v5 = vadd.f32 %v2945_v29, %v2897_v57 }
 0x247   :  { %v2851_v22 = vadd.f32 %v2850_v54, %v2802_v38  ;;  %2996 = vmatmul.bf16.gmra.mxu0 %v5789_v4  ;;  %3045 = vmatmul.bf16.gmra.mxu1 %v5790_v63 }
 0x248   :  { %3094 = vmatmul.bf16.gmra.mxu2 %v5791_v16  ;;  %3143 = vmatmul.bf16.gmra.mxu3 %v5792_v0  ;;  %v5798_v16 = vld [vmem:[#allocation25_spill] sm:$0xff] }
 0x249   :  { %v5799_v0 = vpack.c.bf16 %v5797_v50, %v5798_v16 }
 0x24b   :  { %v2899_v46 = vpop.f32.mrf.mxu2  ;;  %v2948_v20 = vpop.f32.mrf.mxu3 }
 0x24c   :  { %v2900_v40 = vadd.f32 %v2899_v46, %v2851_v22  ;;  %v2803_v6 = vpop.f32.mrf.mxu0  ;;  %v2852_v26 = vpop.f32.mrf.mxu1  ;;  %v5800_v46 = vld [vmem:[#allocation28_spill] sm:$0xff] }
 0x24d   :  { %v2804_v12 = vadd.f32 %v5521_v21, %v2803_v6  ;;  %v5803_v6 = vpack.c.bf16 %v5389_v33, %v5383_v23 }
 0x24e   :  { %v5589_v49 = vadd.f32 %v2948_v20, %v2900_v40  ;;  %v5801_v20 = vld [vmem:[#allocation26_spill] sm:$0xff] }
 0x24f   :  { %v2853_v19 = vadd.f32 %v2852_v26, %v2804_v12  ;;  %v5802_v40 = vpack.c.bf16 %v5800_v46, %v5801_v20  ;;  %v5804_v26 = vld [vmem:[#allocation7_spill] sm:$0xff]  ;;  %v5805_v12 = vld [vmem:[#allocation6_spill] sm:$0xff] }
 0x253   :  { %v2901_v45 = vpop.f32.mrf.mxu2  ;;  %v2950_v27 = vpop.f32.mrf.mxu3 }
 0x254   :  { %v2902_v13 = vadd.f32 %v2901_v45, %v2853_v19  ;;  %v2806_v15 = vpop.f32.mrf.mxu0  ;;  %v2855_v56 = vpop.f32.mrf.mxu1  ;;  %v5806_v19 = vpack.c.bf16 %v5804_v26, %v5805_v12 }
 0x255   :  { %v2807_v44 = vadd.f32 %v5521_v21, %v2806_v15 }
 0x256   :  { %v5592_v9 = vadd.f32 %v2950_v27, %v2902_v13 }
 0x257   :  { %v2856_v31 = vadd.f32 %v2855_v56, %v2807_v44  ;;  %3001 = vmatmul.bf16.gmra.mxu0 %v5793_v60  ;;  %3050 = vmatmul.bf16.gmra.mxu1 %v5794_v53 }
 0x258   :  { %3099 = vmatmul.bf16.gmra.mxu2 %v5795_v39  ;;  %3148 = vmatmul.bf16.gmra.mxu3 %v5796_v47 }
 0x25b   :  { %v2904_v62 = vpop.f32.mrf.mxu2  ;;  %v2953_v29 = vpop.f32.mrf.mxu3 }
 0x25c   :  { %v2905_v57 = vadd.f32 %v2904_v62, %v2856_v31  ;;  %v2808_v32 = vpop.f32.mrf.mxu0  ;;  %v2857_v54 = vpop.f32.mrf.mxu1 }
 0x25d   :  { %v2809_v1 = vadd.f32 %v5521_v21, %v2808_v32  ;;  %v5807_v32 = vld [vmem:[#allocation29_spill] sm:$0xff] }
 0x25e   :  { %v5607_v35 = vadd.f32 %v2953_v29, %v2905_v57 }
 0x25f   :  { %v2858_v38 = vadd.f32 %v2857_v54, %v2809_v1  ;;  %v5808_v54 = vld [vmem:[#allocation8_spill] sm:$0xff] }
 0x260   :  { %v5809_v1 = vpack.c.bf16 %v5807_v32, %v5808_v54  ;;  %v5821_v54 = vpack.c.bf16 %v5509_v36, %v5503_v2 }
 0x263   :  { %v2906_v8 = vpop.f32.mrf.mxu2  ;;  %v2955_v30 = vpop.f32.mrf.mxu3 }
 0x264   :  { %v2907_v22 = vadd.f32 %v2906_v8, %v2858_v38  ;;  %v2811_v4 = vpop.f32.mrf.mxu0  ;;  %v2860_v43 = vpop.f32.mrf.mxu1  ;;  %v5810_v38 = vld [vmem:[#allocation30_spill] sm:$0xff]  ;;  %v5811_v8 = vld [vmem:[#allocation9_spill] sm:$0xff] }
 0x265   :  { %v2812_v55 = vadd.f32 %v5521_v21, %v2811_v4  ;;  %v5814_v4 = vpack.c.bf16 %v5452_v52, %v5446_v41  ;;  %v5815_v52 = vpack.c.bf16 %v5465_v28, %v5459_v34 }
 0x266   :  { %v5610_v63 = vadd.f32 %v2955_v30, %v2907_v22  ;;  %v5812_v30 = vpack.c.bf16 %v5810_v38, %v5811_v8  ;;  %v5813_v22 = vpack.c.bf16 %v5449_v11, %v5443_v48  ;;  %v5823_v38 = vpack.c.bf16 %v5530_v51, %v5524_v59 }
 0x267   :  { %v2861_v37 = vadd.f32 %v2860_v43, %v2812_v55  ;;  %3006 = vmatmul.bf16.gmra.mxu0 %v5799_v0  ;;  %3055 = vmatmul.bf16.gmra.mxu1 %v5802_v40  ;;  %v5824_v8 = vpack.c.bf16 %v5533_v10, %v5527_v3 }
 0x268   :  { %3104 = vmatmul.bf16.gmra.mxu2 %v5803_v6  ;;  %3153 = vmatmul.bf16.gmra.mxu3 %v5806_v19 }
 0x26b   :  { %v2909_v45 = vpop.f32.mrf.mxu2  ;;  %v2958_v27 = vpop.f32.mrf.mxu3 }
 0x26c   :  { %v2910_v13 = vadd.f32 %v2909_v45, %v2861_v37  ;;  %v2813_v15 = vpop.f32.mrf.mxu0  ;;  %v2862_v56 = vpop.f32.mrf.mxu1  ;;  %v5816_v45 = vpack.c.bf16 %v5468_v24, %v5462_v7 }
 0x26d   :  { %v2814_v44 = vadd.f32 %v5521_v21, %v2813_v15  ;;  %v5819_v15 = vld [vmem:[#allocation15_spill] sm:$0xff] }
 0x26e   :  { %v5625_v31 = vadd.f32 %v2958_v27, %v2910_v13  ;;  %v5817_v27 = vld [vmem:[#allocation14_spill] sm:$0xff] }
 0x26f   :  { %v2863_v60 = vadd.f32 %v2862_v56, %v2814_v44  ;;  %v5818_v13 = vpack.c.bf16 %v5481_v14, %v5817_v27  ;;  %v5820_v56 = vpack.c.bf16 %v5484_v61, %v5819_v15 }
 0x273   :  { %v2911_v53 = vpop.f32.mrf.mxu2  ;;  %v2960_v39 = vpop.f32.mrf.mxu3 }
 0x274   :  { %v2912_v47 = vadd.f32 %v2911_v53, %v2863_v60  ;;  %v2816_v62 = vpop.f32.mrf.mxu0  ;;  %v2865_v23 = vpop.f32.mrf.mxu1 }
 0x275   :  { %v2817_v33 = vadd.f32 %v5521_v21, %v2816_v62 }
 0x276   :  { %v5628_v29 = vadd.f32 %v2960_v39, %v2912_v47 }
 0x277   :  { %v2866_v57 = vadd.f32 %v2865_v23, %v2817_v33  ;;  %3011 = vmatmul.bf16.gmra.mxu0 %v5809_v1  ;;  %3060 = vmatmul.bf16.gmra.mxu1 %v5812_v30  ;;  %v5822_v1 = vpack.c.bf16 %v5512_v18, %v5506_v17 }
 0x278   :  { %3109 = vmatmul.bf16.gmra.mxu2 %v5813_v22  ;;  %3158 = vmatmul.bf16.gmra.mxu3 %v5814_v4 }
 0x27b   :  { %v2914_v43 = vpop.f32.mrf.mxu2  ;;  %v2963_v55 = vpop.f32.mrf.mxu3 }
 0x27c   :  { %v2915_v37 = vadd.f32 %v2914_v43, %v2866_v57  ;;  %v2818_v50 = vpop.f32.mrf.mxu0  ;;  %v2867_v16 = vpop.f32.mrf.mxu1 }
 0x27d   :  { %v2819_v0 = vadd.f32 %v5521_v21, %v2818_v50 }
 0x27e   :  { %v5643_v46 = vadd.f32 %v2963_v55, %v2915_v37 }
 0x27f   :  { %v2868_v20 = vadd.f32 %v2867_v16, %v2819_v0 }
 0x283   :  { %v2916_v40 = vpop.f32.mrf.mxu2  ;;  %v2965_v6 = vpop.f32.mrf.mxu3 }
 0x284   :  { %v2917_v26 = vadd.f32 %v2916_v40, %v2868_v20  ;;  %v2821_v12 = vpop.f32.mrf.mxu0  ;;  %v2870_v48 = vpop.f32.mrf.mxu1 }
 0x285   :  { %v2822_v11 = vadd.f32 %v5521_v21, %v2821_v12 }
 0x286   :  { %v5646_v19 = vadd.f32 %v2965_v6, %v2917_v26 }
 0x287   :  { %v2871_v41 = vadd.f32 %v2870_v48, %v2822_v11  ;;  %3016 = vmatmul.bf16.gmra.mxu0 %v5815_v52  ;;  %3065 = vmatmul.bf16.gmra.mxu1 %v5816_v45 }
 0x288   :  { %3114 = vmatmul.bf16.gmra.mxu2 %v5818_v13  ;;  %3163 = vmatmul.bf16.gmra.mxu3 %v5820_v56 }
 0x28b   :  { %v2919_v44 = vpop.f32.mrf.mxu2  ;;  %v2968_v60 = vpop.f32.mrf.mxu3 }
 0x28c   :  { %v2920_v53 = vadd.f32 %v2919_v44, %v2871_v41  ;;  %v2823_v39 = vpop.f32.mrf.mxu0  ;;  %v2872_v47 = vpop.f32.mrf.mxu1 }
 0x28d   :  { %v2824_v34 = vadd.f32 %v5521_v21, %v2823_v39 }
 0x28e   :  { %v5661_v28 = vadd.f32 %v2968_v60, %v2920_v53 }
 0x28f   :  { %v2873_v62 = vadd.f32 %v2872_v47, %v2824_v34 }
 0x293   :  { %v2921_v7 = vpop.f32.mrf.mxu2  ;;  %v2970_v24 = vpop.f32.mrf.mxu3 }
 0x294   :  { %v2922_v23 = vadd.f32 %v2921_v7, %v2873_v62  ;;  %v2826_v33 = vpop.f32.mrf.mxu0  ;;  %v2875_v14 = vpop.f32.mrf.mxu1 }
 0x295   :  { %v2827_v57 = vadd.f32 %v5521_v21, %v2826_v33 }
 0x296   :  { %v5664_v32 = vadd.f32 %v2970_v24, %v2922_v23 }
 0x297   :  { %v2876_v61 = vadd.f32 %v2875_v14, %v2827_v57  ;;  %3021 = vmatmul.bf16.gmra.mxu0 %v5821_v54  ;;  %3070 = vmatmul.bf16.gmra.mxu1 %v5822_v1 }
 0x298   :  { %3119 = vmatmul.bf16.gmra.mxu2 %v5823_v38  ;;  %3168 = vmatmul.bf16.gmra.mxu3 %v5824_v8 }
 0x29b   :  { %v2924_v30 = vpop.f32.mrf.mxu2  ;;  %v2973_v22 = vpop.f32.mrf.mxu3 }
 0x29c   :  { %v2925_v4 = vadd.f32 %v2924_v30, %v2876_v61  ;;  %v2828_v43 = vpop.f32.mrf.mxu0  ;;  %v2877_v55 = vpop.f32.mrf.mxu1 }
 0x29d   :  { %v2829_v2 = vadd.f32 %v5521_v21, %v2828_v43 }
 0x29e   :  { %v5679_v36 = vadd.f32 %v2973_v22, %v2925_v4 }
 0x29f   :  { %v2878_v37 = vadd.f32 %v2877_v55, %v2829_v2 }
 0x2a3   :  { %v2926_v17 = vpop.f32.mrf.mxu2  ;;  %v2975_v18 = vpop.f32.mrf.mxu3 }
 0x2a4   :  { %v2927_v50 = vadd.f32 %v2926_v17, %v2878_v37  ;;  %v2987_v16 = vpop.f32.mrf.mxu0  ;;  %v3036_v59 = vpop.f32.mrf.mxu1 }
 0x2a5   :  { %v2988_v3 = vadd.f32 %v2987_v16, %v5553_v58 }
 0x2a6   :  { %v5681_v51 = vadd.f32 %v2975_v18, %v2927_v50 }
 0x2a7   :  { %v3037_v10 = vadd.f32 %v3036_v59, %v2988_v3 }
 0x2ab   :  { %v3085_v0 = vpop.f32.mrf.mxu2  ;;  %v3134_v20 = vpop.f32.mrf.mxu3 }
 0x2ac   :  { %v3086_v40 = vadd.f32 %v3085_v0, %v3037_v10  ;;  %v2989_v6 = vpop.f32.mrf.mxu0  ;;  %v3038_v26 = vpop.f32.mrf.mxu1 }
 0x2ad   :  { %v2990_v21 = vadd.f32 %v2989_v6, %v5556_v42 }
 0x2ae   :  { %v3135_v12 = vadd.f32 %v3134_v20, %v3086_v40 }
 0x2af   :  { %v3039_v48 = vadd.f32 %v3038_v26, %v2990_v21 }
 0x2b0   :  { %3174 = vst [vmem:[#allocation3] sm:$0xff] %v3135_v12 }
 0x2b3   :  { %v3087_v11 = vpop.f32.mrf.mxu2  ;;  %v3136_v41 = vpop.f32.mrf.mxu3 }
 0x2b4   :  { %v3088_v52 = vadd.f32 %v3087_v11, %v3039_v48  ;;  %v2992_v45 = vpop.f32.mrf.mxu0  ;;  %v3041_v27 = vpop.f32.mrf.mxu1 }
 0x2b5   :  { %v2993_v15 = vadd.f32 %v2992_v45, %v5571_v25 }
 0x2b6   :  { %v3137_v13 = vadd.f32 %v3136_v41, %v3088_v52 }
 0x2b7   :  { %v3042_v58 = vadd.f32 %v3041_v27, %v2993_v15 }
 0x2b8   :  { %3175 = vst [vmem:[#allocation3 + $0x8] sm:$0xff] %v3137_v13 }
 0x2bb   :  { %v3090_v56 = vpop.f32.mrf.mxu2  ;;  %v3139_v44 = vpop.f32.mrf.mxu3 }
 0x2bc   :  { %v3091_v60 = vadd.f32 %v3090_v56, %v3042_v58  ;;  %v2994_v53 = vpop.f32.mrf.mxu0  ;;  %v3043_v39 = vpop.f32.mrf.mxu1 }
 0x2bd   :  { %v2995_v42 = vadd.f32 %v2994_v53, %v5574_v5 }
 0x2be   :  { %v3140_v47 = vadd.f32 %v3139_v44, %v3091_v60 }
 0x2bf   :  { %v3044_v34 = vadd.f32 %v3043_v39, %v2995_v42 }
 0x2c0   :  { %3176 = vst [vmem:[#allocation3 + $0x10] sm:$0xff] %v3140_v47 }
 0x2c3   :  { %v3092_v62 = vpop.f32.mrf.mxu2  ;;  %v3141_v7 = vpop.f32.mrf.mxu3 }
 0x2c4   :  { %v3093_v24 = vadd.f32 %v3092_v62, %v3044_v34  ;;  %v2997_v23 = vpop.f32.mrf.mxu0  ;;  %v3046_v33 = vpop.f32.mrf.mxu1 }
 0x2c5   :  { %v2998_v25 = vadd.f32 %v2997_v23, %v5589_v49 }
 0x2c6   :  { %v3142_v14 = vadd.f32 %v3141_v7, %v3093_v24 }
 0x2c7   :  { %v3047_v57 = vadd.f32 %v3046_v33, %v2998_v25 }
 0x2c8   :  { %3177 = vst [vmem:[#allocation3 + $0x18] sm:$0xff] %v3142_v14 }
 0x2cb   :  { %v3095_v61 = vpop.f32.mrf.mxu2  ;;  %v3144_v54 = vpop.f32.mrf.mxu3 }
 0x2cc   :  { %v3096_v1 = vadd.f32 %v3095_v61, %v3047_v57  ;;  %v2999_v38 = vpop.f32.mrf.mxu0  ;;  %v3048_v8 = vpop.f32.mrf.mxu1 }
 0x2cd   :  { %v3000_v5 = vadd.f32 %v2999_v38, %v5592_v9 }
 0x2ce   :  { %v3145_v30 = vadd.f32 %v3144_v54, %v3096_v1 }
 0x2cf   :  { %v3049_v22 = vadd.f32 %v3048_v8, %v3000_v5 }
 0x2d0   :  { %3178 = vst [vmem:[#allocation3 + $0x20] sm:$0xff] %v3145_v30 }
 0x2d3   :  { %v3097_v4 = vpop.f32.mrf.mxu2  ;;  %v3146_v43 = vpop.f32.mrf.mxu3 }
 0x2d4   :  { %v3098_v55 = vadd.f32 %v3097_v4, %v3049_v22  ;;  %v3002_v2 = vpop.f32.mrf.mxu0  ;;  %v3051_v37 = vpop.f32.mrf.mxu1 }
 0x2d5   :  { %v3003_v49 = vadd.f32 %v3002_v2, %v5607_v35 }
 0x2d6   :  { %v3147_v17 = vadd.f32 %v3146_v43, %v3098_v55 }
 0x2d7   :  { %v3052_v18 = vadd.f32 %v3051_v37, %v3003_v49 }
 0x2d8   :  { %3179 = vst [vmem:[#allocation3 + $0x28] sm:$0xff] %v3147_v17 }
 0x2db   :  { %v3100_v50 = vpop.f32.mrf.mxu2  ;;  %v3149_v16 = vpop.f32.mrf.mxu3 }
 0x2dc   :  { %v3101_v59 = vadd.f32 %v3100_v50, %v3052_v18  ;;  %v3004_v3 = vpop.f32.mrf.mxu0  ;;  %v3053_v10 = vpop.f32.mrf.mxu1 }
 0x2dd   :  { %v3005_v9 = vadd.f32 %v3004_v3, %v5610_v63 }
 0x2de   :  { %v3150_v0 = vadd.f32 %v3149_v16, %v3101_v59 }
 0x2df   :  { %v3054_v20 = vadd.f32 %v3053_v10, %v3005_v9 }
 0x2e0   :  { %3180 = vst [vmem:[#allocation3 + $0x30] sm:$0xff] %v3150_v0 }
 0x2e3   :  { %v3102_v40 = vpop.f32.mrf.mxu2  ;;  %v3151_v6 = vpop.f32.mrf.mxu3 }
 0x2e4   :  { %v3103_v26 = vadd.f32 %v3102_v40, %v3054_v20  ;;  %v3007_v12 = vpop.f32.mrf.mxu0  ;;  %v3056_v21 = vpop.f32.mrf.mxu1 }
 0x2e5   :  { %v3008_v35 = vadd.f32 %v3007_v12, %v5625_v31 }
 0x2e6   :  { %v3152_v48 = vadd.f32 %v3151_v6, %v3103_v26 }
 0x2e7   :  { %v3057_v11 = vadd.f32 %v3056_v21, %v3008_v35 }
 0x2e8   :  { %3181 = vst [vmem:[#allocation3 + $0x38] sm:$0xff] %v3152_v48 }
 0x2eb   :  { %v3105_v41 = vpop.f32.mrf.mxu2  ;;  %v3154_v52 = vpop.f32.mrf.mxu3 }
 0x2ec   :  { %v3106_v45 = vadd.f32 %v3105_v41, %v3057_v11  ;;  %v3009_v27 = vpop.f32.mrf.mxu0  ;;  %v3058_v13 = vpop.f32.mrf.mxu1 }
 0x2ed   :  { %v3010_v63 = vadd.f32 %v3009_v27, %v5628_v29 }
 0x2ee   :  { %v3155_v15 = vadd.f32 %v3154_v52, %v3106_v45 }
 0x2ef   :  { %v3059_v58 = vadd.f32 %v3058_v13, %v3010_v63 }
 0x2f0   :  { %3182 = vst [vmem:[#allocation3 + $0x40] sm:$0xff] %v3155_v15 }
 0x2f3   :  { %v3107_v56 = vpop.f32.mrf.mxu2  ;;  %v3156_v44 = vpop.f32.mrf.mxu3 }
 0x2f4   :  { %v3108_v60 = vadd.f32 %v3107_v56, %v3059_v58  ;;  %v3012_v53 = vpop.f32.mrf.mxu0  ;;  %v3061_v39 = vpop.f32.mrf.mxu1 }
 0x2f5   :  { %v3013_v31 = vadd.f32 %v3012_v53, %v5643_v46 }
 0x2f6   :  { %v3157_v47 = vadd.f32 %v3156_v44, %v3108_v60 }
 0x2f7   :  { %v3062_v42 = vadd.f32 %v3061_v39, %v3013_v31 }
 0x2f8   :  { %3183 = vst [vmem:[#allocation3 + $0x48] sm:$0xff] %v3157_v47 }
 0x2fb   :  { %v3110_v34 = vpop.f32.mrf.mxu2  ;;  %v3159_v62 = vpop.f32.mrf.mxu3 }
 0x2fc   :  { %v3111_v7 = vadd.f32 %v3110_v34, %v3062_v42  ;;  %v3014_v24 = vpop.f32.mrf.mxu0  ;;  %v3063_v23 = vpop.f32.mrf.mxu1 }
 0x2fd   :  { %v3015_v29 = vadd.f32 %v3014_v24, %v5646_v19 }
 0x2fe   :  { %v3160_v33 = vadd.f32 %v3159_v62, %v3111_v7 }
 0x2ff   :  { %v3064_v14 = vadd.f32 %v3063_v23, %v3015_v29 }
 0x300   :  { %3184 = vst [vmem:[#allocation3 + $0x50] sm:$0xff] %v3160_v33 }
 0x303   :  { %v3112_v25 = vpop.f32.mrf.mxu2  ;;  %v3161_v57 = vpop.f32.mrf.mxu3 }
 0x304   :  { %v3113_v61 = vadd.f32 %v3112_v25, %v3064_v14  ;;  %v3017_v54 = vpop.f32.mrf.mxu0  ;;  %v3066_v1 = vpop.f32.mrf.mxu1 }
 0x305   :  { %v3018_v46 = vadd.f32 %v3017_v54, %v5661_v28 }
 0x306   :  { %v3162_v38 = vadd.f32 %v3161_v57, %v3113_v61 }
 0x307   :  { %v3067_v8 = vadd.f32 %v3066_v1, %v3018_v46 }
 0x308   :  { %3185 = vst [vmem:[#allocation3 + $0x58] sm:$0xff] %v3162_v38 }
 0x30b   :  { %v3115_v30 = vpop.f32.mrf.mxu2  ;;  %v3164_v5 = vpop.f32.mrf.mxu3 }
 0x30c   :  { %v3116_v22 = vadd.f32 %v3115_v30, %v3067_v8  ;;  %v3019_v4 = vpop.f32.mrf.mxu0  ;;  %v3068_v43 = vpop.f32.mrf.mxu1 }
 0x30d   :  { %v3020_v19 = vadd.f32 %v3019_v4, %v5664_v32 }
 0x30e   :  { %v3165_v55 = vadd.f32 %v3164_v5, %v3116_v22 }
 0x30f   :  { %v3069_v2 = vadd.f32 %v3068_v43, %v3020_v19 }
 0x310   :  { %3186 = vst [vmem:[#allocation3 + $0x60] sm:$0xff] %v3165_v55 }
 0x313   :  { %v3117_v37 = vpop.f32.mrf.mxu2  ;;  %v3166_v17 = vpop.f32.mrf.mxu3 }
 0x314   :  { %v3118_v49 = vadd.f32 %v3117_v37, %v3069_v2  ;;  %v3022_v18 = vpop.f32.mrf.mxu0  ;;  %v3071_v28 = vpop.f32.mrf.mxu1 }
 0x315   :  { %v3023_v16 = vadd.f32 %v3022_v18, %v5679_v36 }
 0x316   :  { %v3167_v50 = vadd.f32 %v3166_v17, %v3118_v49 }
 0x317   :  { %v3072_v59 = vadd.f32 %v3071_v28, %v3023_v16 }
 0x318   :  { %3187 = vst [vmem:[#allocation3 + $0x68] sm:$0xff] %v3167_v50 }
 0x31b   :  { %v3120_v3 = vpop.f32.mrf.mxu2  ;;  %v3169_v10 = vpop.f32.mrf.mxu3 }
 0x31c   :  { %v3121_v0 = vadd.f32 %v3120_v3, %v3072_v59  ;;  %v3024_v9 = vpop.f32.mrf.mxu0  ;;  %v3073_v32 = vpop.f32.mrf.mxu1 }
 0x31d   :  { %v3025_v40 = vadd.f32 %v3024_v9, %v5681_v51 }
 0x31e   :  { %v3170_v20 = vadd.f32 %v3169_v10, %v3121_v0 }
 0x31f   :  { %v3074_v6 = vadd.f32 %v3073_v32, %v3025_v40 }
 0x320   :  { %3188 = vst [vmem:[#allocation3 + $0x70] sm:$0xff] %v3170_v20 }
 0x323   :  { %v3122_v36 = vpop.f32.mrf.mxu2  ;;  %v3171_v12 = vpop.f32.mrf.mxu3 }
 0x324   :  { %v3123_v26 = vadd.f32 %v3122_v36, %v3074_v6 }
 0x326   :  { %v3172_v21 = vadd.f32 %v3171_v12, %v3123_v26 }
 0x328   :  { %3189 = vst [vmem:[#allocation3 + $0x78] sm:$0xff] %v3172_v21 }
 0x329   :  { %3202 = dma.vmem_to_hbm [thread:$0]  %s3195_s28, 2048, %s3197_s2, [#allocation4], %s3703_s6, %s3703_s6, %s3704_s7  }
 0x32a   :  { %3700 = dma.done.wait [#allocation4], 2048  }
 0x32b   :  { %3701 = vsyncadd [#allocation4], 4294965248 }
 0x32c   :  { %3207 = vsyncpa [#allocation4], 1 }

</bundles_post_ra>
